<compile_context>
chip_gen: v7x
topology: tpu7x:2x2x1
jax: 0.10.0
libtpu: 0.0.40
codegen_flags: <defaults>
</compile_context>

<pallas_src>
import numpy as np
import jax
import jax.numpy as jnp
from jax.experimental import pallas as pl
from jax.experimental.pallas import tpu as pltpu

EPS = 1e-5  # nn.InstanceNorm2d default


# ----------------------------------------------------------------------------
# Host-side helpers: gather matrices + weight flattening
# ----------------------------------------------------------------------------
def _reflect(i, n):
    if i < 0:
        return -i
    if i >= n:
        return 2 * n - 2 - i
    return i


def _gather_mats(h, w, k, stride, pad):
    """Per-tap one-hot matrices folding reflect-pad + tap offset + stride.

    G[t, src, dst] = 1 iff output pixel `dst` reads input pixel `src` for tap t.
    In-kernel, the conv "gather" is x[C, H*W] @ G[t] -> [C, Ho*Wo] on the MXU.
    """
    ho = (h + 2 * pad - k) // stride + 1
    wo = (w + 2 * pad - k) // stride + 1
    g = np.zeros((k * k, h * w, ho * wo), np.float32)
    for di in range(k):
        for dj in range(k):
            t = di * k + dj
            for y in range(ho):
                sy = _reflect(stride * y + di - pad, h)
                for x in range(wo):
                    sx = _reflect(stride * x + dj - pad, w)
                    g[t, sy * w + sx, y * wo + x] = 1.0
    return g, ho, wo


def _wflat(layer):
    """[K,K,Cin,Cout] (HWIO) -> [Cout, K*K*Cin], column order (tap, cin)."""
    k, cin, cout = layer["k"], layer["cin"], layer["cout"]
    return jnp.transpose(layer["w4"].reshape(k * k * cin, cout))


# ----------------------------------------------------------------------------
# In-kernel helpers (all plain 2-D dots / elementwise / lane reductions)
# ----------------------------------------------------------------------------
def _inorm(y, inv_hw):
    # Single-pass InstanceNorm2d (affine=False): stats over the lane (spatial) axis.
    s1 = jnp.sum(y, axis=1, keepdims=True)
    s2 = jnp.sum(y * y, axis=1, keepdims=True)
    mean = s1 * inv_hw
    var = s2 * inv_hw - mean * mean
    return (y - mean) * jax.lax.rsqrt(var + EPS)


def _act(y, name):
    return jnp.maximum(y, 0.0) if name == "relu" else y


def _conv_gather(x, w_ref, g_ref, kk):
    """Conv = in-VMEM im2col via one-hot gather matmuls + ONE weight matmul.

    x: [Cin, HWin] value; g_ref: [kk, HWin, HoWo]; w_ref: [Cout, kk*Cin].
    Bias is intentionally omitted: InstanceNorm cancels per-channel biases.
    """
    pieces = [jnp.dot(x, g_ref[t], preferred_element_type=jnp.float32)
              for t in range(kk)]
    patches = jnp.concatenate(pieces, axis=0)                 # [kk*Cin, HoWo]
    return jnp.dot(w_ref[...], patches, preferred_element_type=jnp.float32)


def _make_kernel(plan, num_inputs):
    """Straight-line fused kernel running every encoder layer for one image."""
    def kernel(*refs):
        in_refs, out_refs = refs[:num_inputs], refs[num_inputs:]
        a = None
        for li, (kind, m) in enumerate(plan):
            if kind == "conv0":
                # 7x7 input conv from host-built, lane-dense patches [KKC, HW].
                a = jnp.dot(in_refs[m["w_idx"]][...], in_refs[m["p_idx"]][0],
                            preferred_element_type=jnp.float32)
                a = _act(_inorm(a, m["inv_hw"]), m["activ"])
            elif kind == "conv":
                a = _conv_gather(a, in_refs[m["w_idx"]], in_refs[m["g_idx"]],
                                 m["kk"])
                a = _act(_inorm(a, m["inv_hw"]), m["activ"])
            else:  # "res": conv-in-relu -> conv-in, + skip
                y = _conv_gather(a, in_refs[m["w1_idx"]], in_refs[m["g_idx"]],
                                 m["kk"])
                y = _act(_inorm(y, m["inv_hw"]), m["activ1"])
                y = _conv_gather(y, in_refs[m["w2_idx"]], in_refs[m["g_idx"]],
                                 m["kk"])
                y = _act(_inorm(y, m["inv_hw"]), m["activ2"])
                a = a + y
            out_refs[li][0] = a          # lane-dense [Cout, Ho*Wo] (== NCHW slab)
    return kernel


# ----------------------------------------------------------------------------
# Fused forward: builds constants + plan, issues ONE pallas_call
# ----------------------------------------------------------------------------
def _fused_forward(params, x_nchw):
    n, cin, h, w = x_nchw.shape
    convs, res = params["convs"], params["res"]

    inputs, in_specs = [], []

    def add_input(arr, per_image=False):
        arr = jnp.asarray(arr, jnp.float32)
        idx = len(inputs)
        inputs.append(arr)
        if per_image:
            in_specs.append(pl.BlockSpec(
                (1,) + arr.shape[1:],
                lambda i, _r=arr.ndim - 1: (i,) + (0,) * _r))
        else:  # same block every grid step -> DMA'd once, never re-fetched
            in_specs.append(pl.BlockSpec(
                arr.shape, lambda i, _z=(0,) * arr.ndim: _z))
        return idx

    plan, out_meta = [], []

    # ---- layer 0: host reflect-pad + TRANSPOSED (lane-dense) im2col ----
    c0 = convs[0]
    k0, s0, p0 = c0["k"], c0["s"], c0["p"]
    ho = (h + 2 * p0 - k0) // s0 + 1
    wo = (w + 2 * p0 - k0) // s0 + 1
    xp = x_nchw
    if p0 > 0:
        xp = jnp.pad(x_nchw, ((0, 0), (0, 0), (p0, p0), (p0, p0)),
                     mode="reflect")
    taps = [xp[:, :, di:di + s0 * ho:s0, dj:dj + s0 * wo:s0]
            .reshape(n, cin, ho * wo)
            for di in range(k0) for dj in range(k0)]
    patches0 = jnp.concatenate(taps, axis=1)          # [N, K*K*Cin, Ho*Wo]
    p_idx = add_input(patches0, per_image=True)
    w_idx = add_input(_wflat(c0))
    plan.append(("conv0", dict(p_idx=p_idx, w_idx=w_idx,
                               inv_hw=1.0 / (ho * wo), activ=c0["activ"])))
    out_meta.append((c0["cout"], ho, wo))
    cur_h, cur_w = ho, wo

    # ---- downsampling convs: fully in-kernel gather conv ----
    for c in convs[1:]:
        g, ho, wo = _gather_mats(cur_h, cur_w, c["k"], c["s"], c["p"])
        g_idx = add_input(g)
        w_idx = add_input(_wflat(c))
        plan.append(("conv", dict(w_idx=w_idx, g_idx=g_idx, kk=c["k"] * c["k"],
                                  inv_hw=1.0 / (ho * wo), activ=c["activ"])))
        out_meta.append((c["cout"], ho, wo))
        cur_h, cur_w = ho, wo

    # ---- residual blocks (all share one 3x3 gather set) ----
    if res:
        kres, pres = res[0]["conv1"]["k"], res[0]["conv1"]["p"]
        gres, _, _ = _gather_mats(cur_h, cur_w, kres, 1, pres)
        gres_idx = add_input(gres)
        for rb in res:
            w1_idx = add_input(_wflat(rb["conv1"]))
            w2_idx = add_input(_wflat(rb["conv2"]))
            plan.append(("res", dict(w1_idx=w1_idx, w2_idx=w2_idx,
                                     g_idx=gres_idx, kk=kres * kres,
                                     inv_hw=1.0 / (cur_h * cur_w),
                                     activ1=rb["conv1"]["activ"],
                                     activ2=rb["conv2"]["activ"])))
            out_meta.append((rb["conv2"]["cout"], cur_h, cur_w))

    out_shapes = tuple(jax.ShapeDtypeStruct((n, c, hh * ww), jnp.float32)
                       for (c, hh, ww) in out_meta)
    out_specs = tuple(pl.BlockSpec((1, c, hh * ww), lambda i: (i, 0, 0))
                      for (c, hh, ww) in out_meta)

    kernel = _make_kernel(tuple(plan), len(inputs))
    outs = pl.pallas_call(
        kernel,
        out_shape=out_shapes,
        grid_spec=pltpu.PrefetchScalarGridSpec(
            num_scalar_prefetch=0,
            grid=(n,),                     # one image per step
            in_specs=in_specs,
            out_specs=out_specs,
        ),
        compiler_params=pltpu.CompilerParams(
            dimension_semantics=("parallel",),        # 2 TCs on v7x for N>=2
            vmem_limit_bytes=32 * 1024 * 1024,        # explicit cap; usage ~3MB
        ),
    )(*inputs)

    # [N, C, H*W] -> NCHW is a pure metadata reshape (no transpose needed).
    return [o.reshape(n, c, hh, ww) for o, (c, hh, ww) in zip(outs, out_meta)]


# ----------------------------------------------------------------------------
# Public forward (matches RGBEncoder.forward incl. layers / encode_only)
# ----------------------------------------------------------------------------
def rgb_encoder_forward(params, x_nchw, layers=(), encode_only=False):
    acts = _fused_forward(params, x_nchw)   # one activation per model layer
    if len(layers) > 0:
        feats = []
        for layer_id in range(len(acts)):
            if layer_id in layers:
                feats.append(acts[layer_id])
            if layer_id == layers[-1] and encode_only:
                return feats
        return acts[-1], feats
    return acts[-1]


# ----------------------------------------------------------------------------
# Parameter construction (deterministic, synthetic)
# ----------------------------------------------------------------------------
def _init_conv(key, cin, cout, k, s, p, activ):
    kw, kb = jax.random.split(key)
    w4 = jax.random.normal(kw, (k, k, cin, cout), jnp.float32) / np.sqrt(k * k * cin)
    b = 0.01 * jax.random.normal(kb, (cout,), jnp.float32)
    return {"w4": w4, "b": b, "k": k, "s": s, "p": p,
            "cin": cin, "cout": cout, "activ": activ}


def build_rgb_encoder(input_dim, dim, n_downsample, n_res, key):
    keys = jax.random.split(key, 1 + n_downsample + 2 * n_res)
    ki = 0
    convs = [_init_conv(keys[ki], input_dim, dim, 7, 1, 3, "relu")]; ki += 1
    d = dim
    for _ in range(n_downsample):
        convs.append(_init_conv(keys[ki], d, 2 * d, 4, 2, 1, "relu")); ki += 1
        d *= 2
    res = []
    for _ in range(n_res):
        c1 = _init_conv(keys[ki], d, d, 3, 1, 1, "relu"); ki += 1
        c2 = _init_conv(keys[ki], d, d, 3, 1, 1, "none"); ki += 1
        res.append({"conv1": c1, "conv2": c2})
    return {"convs": convs, "res": res, "output_dim": d}


# ----------------------------------------------------------------------------
# Pure-JAX reference (lax.conv, WITH bias) for the correctness check
# ----------------------------------------------------------------------------
def _ref_conv(x, layer, residual=None):
    k, s, p = layer["k"], layer["s"], layer["p"]
    xp = jnp.pad(x, ((0, 0), (0, 0), (p, p), (p, p)), mode="reflect") if p else x
    y = jax.lax.conv_general_dilated(
        xp, layer["w4"], (s, s), "VALID",
        dimension_numbers=("NCHW", "HWIO", "NCHW"))
    y = y + layer["b"][None, :, None, None]   # bias kept: IN cancels it exactly
    mean = jnp.mean(y, axis=(2, 3), keepdims=True)
    var = jnp.mean(jnp.square(y - mean), axis=(2, 3), keepdims=True)
    y = (y - mean) * jax.lax.rsqrt(var + EPS)
    if layer["activ"] == "relu":
        y = jnp.maximum(y, 0.0)
    if residual is not None:
        y = y + residual
    return y


def rgb_encoder_ref(params, x_nchw):
    x = x_nchw
    for c in params["convs"]:
        x = _ref_conv(x, c)
    for rb in params["res"]:
        y = _ref_conv(x, rb["conv1"])
        x = _ref_conv(y, rb["conv2"], residual=x)
    return x


# ----------------------------------------------------------------------------
if __name__ == "__main__":
    x = jax.random.normal(jax.random.PRNGKey(0), (2, 3, 16, 16), jnp.float32)
    params = build_rgb_encoder(input_dim=3, dim=8, n_downsample=2, n_res=2,
                               key=jax.random.PRNGKey(1))

    out = rgb_encoder_forward(params, x)
    out = jax.block_until_ready(out)
    assert out.shape == (2, params["output_dim"], 4, 4), out.shape

    ref = rgb_encoder_ref(params, x)
    max_err = float(jnp.max(jnp.abs(out - ref)))
    assert max_err < 1e-3, f"mismatch vs reference: {max_err}"

    # Feature-extraction path (layers / encode_only) reuses the same fused call.
    feats = rgb_encoder_forward(params, x, layers=[0, 2, 4], encode_only=True)
    assert len(feats) == 3 and feats[0].shape == (2, 8, 16, 16)

    print("KERNEL_OK")
</pallas_src>

<mosaic_0001>
module attributes {stable_mosaic.version = 11 : i64} {
  func.func @kernel(%arg0: i32, %arg1: memref<1x147x256xf32, #tpu.memory_space<vmem>>, %arg2: memref<8x147xf32, #tpu.memory_space<vmem>>, %arg3: memref<16x256x64xf32, #tpu.memory_space<vmem>>, %arg4: memref<16x128xf32, #tpu.memory_space<vmem>>, %arg5: memref<16x64x16xf32, #tpu.memory_space<vmem>>, %arg6: memref<32x256xf32, #tpu.memory_space<vmem>>, %arg7: memref<9x16x16xf32, #tpu.memory_space<vmem>>, %arg8: memref<32x288xf32, #tpu.memory_space<vmem>>, %arg9: memref<32x288xf32, #tpu.memory_space<vmem>>, %arg10: memref<32x288xf32, #tpu.memory_space<vmem>>, %arg11: memref<32x288xf32, #tpu.memory_space<vmem>>, %arg12: memref<1x8x256xf32, #tpu.memory_space<vmem>>, %arg13: memref<1x16x64xf32, #tpu.memory_space<vmem>>, %arg14: memref<1x32x16xf32, #tpu.memory_space<vmem>>, %arg15: memref<1x32x16xf32, #tpu.memory_space<vmem>>, %arg16: memref<1x32x16xf32, #tpu.memory_space<vmem>>) attributes {dimension_semantics = [#tpu.dimension_semantics<parallel>], iteration_bounds = array<i64: 2>, scalar_prefetch = 0 : i64, scratch_operands = 0 : i64, tpu.core_type = #tpu.core_type<tc>, window_params = [{transform_indices = @transform_0, window_bounds = array<i64: 1, 147, 256>}, {pipeline_mode = #tpu.pipeline_mode<synchronous>, transform_indices = @transform_1, window_bounds = array<i64: 8, 147>}, {pipeline_mode = #tpu.pipeline_mode<synchronous>, transform_indices = @transform_2, window_bounds = array<i64: 16, 256, 64>}, {pipeline_mode = #tpu.pipeline_mode<synchronous>, transform_indices = @transform_3, window_bounds = array<i64: 16, 128>}, {pipeline_mode = #tpu.pipeline_mode<synchronous>, transform_indices = @transform_4, window_bounds = array<i64: 16, 64, 16>}, {pipeline_mode = #tpu.pipeline_mode<synchronous>, transform_indices = @transform_5, window_bounds = array<i64: 32, 256>}, {pipeline_mode = #tpu.pipeline_mode<synchronous>, transform_indices = @transform_6, window_bounds = array<i64: 9, 16, 16>}, {pipeline_mode = #tpu.pipeline_mode<synchronous>, transform_indices = @transform_7, window_bounds = array<i64: 32, 288>}, {pipeline_mode = #tpu.pipeline_mode<synchronous>, transform_indices = @transform_8, window_bounds = array<i64: 32, 288>}, {pipeline_mode = #tpu.pipeline_mode<synchronous>, transform_indices = @transform_9, window_bounds = array<i64: 32, 288>}, {pipeline_mode = #tpu.pipeline_mode<synchronous>, transform_indices = @transform_10, window_bounds = array<i64: 32, 288>}, {transform_indices = @transform_11, window_bounds = array<i64: 1, 8, 256>}, {transform_indices = @transform_12, window_bounds = array<i64: 1, 16, 64>}, {transform_indices = @transform_13, window_bounds = array<i64: 1, 32, 16>}, {transform_indices = @transform_14, window_bounds = array<i64: 1, 32, 16>}, {transform_indices = @transform_15, window_bounds = array<i64: 1, 32, 16>}]} {
    %c0 = arith.constant 0 : index
    %c0_0 = arith.constant 0 : index
    %0 = vector.load %arg2[%c0, %c0_0] : memref<8x147xf32, #tpu.memory_space<vmem>>, vector<8x147xf32>
    %c0_1 = arith.constant 0 : index
    %c0_2 = arith.constant 0 : index
    %c0_3 = arith.constant 0 : index
    %1 = vector.load %arg1[%c0_1, %c0_2, %c0_3] : memref<1x147x256xf32, #tpu.memory_space<vmem>>, vector<1x147x256xf32>
    %2 = vector.shape_cast %1 : vector<1x147x256xf32> to vector<147x256xf32>
    %cst = arith.constant dense<0.000000e+00> : vector<8x256xf32>
    %3 = tpu.matmul %0, %2, %cst {dimension_numbers = #tpu.dot_dimension_numbers<[1], [0], [0], [1], [0, 0, 1, 1], [], []>} : vector<8x147xf32>, vector<147x256xf32>, vector<8x256xf32> -> vector<8x256xf32>
    %cst_4 = arith.constant dense<0.000000e+00> : vector<8xf32>
    %4 = vector.multi_reduction <add>, %3, %cst_4 [1] : vector<8x256xf32> to vector<8xf32>
    %5 = vector.shape_cast %4 : vector<8xf32> to vector<8x1xf32>
    %6 = arith.mulf %3, %3 : vector<8x256xf32>
    %cst_5 = arith.constant dense<0.000000e+00> : vector<8xf32>
    %7 = vector.multi_reduction <add>, %6, %cst_5 [1] : vector<8x256xf32> to vector<8xf32>
    %8 = vector.shape_cast %7 : vector<8xf32> to vector<8x1xf32>
    %cst_6 = arith.constant 3.906250e-03 : f32
    %9 = vector.broadcast %cst_6 : f32 to vector<8x1xf32>
    %10 = arith.mulf %5, %9 : vector<8x1xf32>
    %cst_7 = arith.constant 3.906250e-03 : f32
    %11 = vector.broadcast %cst_7 : f32 to vector<8x1xf32>
    %12 = arith.mulf %8, %11 : vector<8x1xf32>
    %13 = arith.mulf %10, %10 : vector<8x1xf32>
    %14 = arith.subf %12, %13 : vector<8x1xf32>
    %15 = vector.broadcast %10 : vector<8x1xf32> to vector<8x256xf32>
    %16 = arith.subf %3, %15 : vector<8x256xf32>
    %cst_8 = arith.constant 9.99999974E-6 : f32
    %17 = vector.broadcast %cst_8 : f32 to vector<8x1xf32>
    %18 = arith.addf %14, %17 : vector<8x1xf32>
    %19 = math.rsqrt %18 : vector<8x1xf32>
    %20 = vector.broadcast %19 : vector<8x1xf32> to vector<8x256xf32>
    %21 = arith.mulf %16, %20 : vector<8x256xf32>
    %cst_9 = arith.constant 0.000000e+00 : f32
    %22 = vector.broadcast %cst_9 : f32 to vector<8x256xf32>
    %23 = arith.maximumf %21, %22 : vector<8x256xf32>
    %c0_10 = arith.constant 0 : index
    %c0_11 = arith.constant 0 : index
    %c0_12 = arith.constant 0 : index
    %24 = vector.load %arg12[%c0_10, %c0_11, %c0_12] : memref<1x8x256xf32, #tpu.memory_space<vmem>>, vector<1x8x256xf32>
    %25 = vector.shape_cast %24 : vector<1x8x256xf32> to vector<8x256xf32>
    %26 = vector.shape_cast %23 : vector<8x256xf32> to vector<1x8x256xf32>
    tpu.vector_store %arg12[%c0_10, %c0_11, %c0_12], %26 {strides = array<i32>} : memref<1x8x256xf32, #tpu.memory_space<vmem>>, vector<1x8x256xf32>,
    %c0_13 = arith.constant 0 : index
    %c0_14 = arith.constant 0 : index
    %c0_15 = arith.constant 0 : index
    %27 = vector.load %arg3[%c0_13, %c0_14, %c0_15] : memref<16x256x64xf32, #tpu.memory_space<vmem>>, vector<1x256x64xf32>
    %28 = vector.shape_cast %27 : vector<1x256x64xf32> to vector<256x64xf32>
    %cst_16 = arith.constant dense<0.000000e+00> : vector<8x64xf32>
    %29 = tpu.matmul %23, %28, %cst_16 {dimension_numbers = #tpu.dot_dimension_numbers<[1], [0], [0], [1], [0, 0, 1, 1], [], []>} : vector<8x256xf32>, vector<256x64xf32>, vector<8x64xf32> -> vector<8x64xf32>
    %c1 = arith.constant 1 : index
    %c0_17 = arith.constant 0 : index
    %c0_18 = arith.constant 0 : index
    %30 = vector.load %arg3[%c1, %c0_17, %c0_18] : memref<16x256x64xf32, #tpu.memory_space<vmem>>, vector<1x256x64xf32>
    %31 = vector.shape_cast %30 : vector<1x256x64xf32> to vector<256x64xf32>
    %cst_19 = arith.constant dense<0.000000e+00> : vector<8x64xf32>
    %32 = tpu.matmul %23, %31, %cst_19 {dimension_numbers = #tpu.dot_dimension_numbers<[1], [0], [0], [1], [0, 0, 1, 1], [], []>} : vector<8x256xf32>, vector<256x64xf32>, vector<8x64xf32> -> vector<8x64xf32>
    %c2 = arith.constant 2 : index
    %c0_20 = arith.constant 0 : index
    %c0_21 = arith.constant 0 : index
    %33 = vector.load %arg3[%c2, %c0_20, %c0_21] : memref<16x256x64xf32, #tpu.memory_space<vmem>>, vector<1x256x64xf32>
    %34 = vector.shape_cast %33 : vector<1x256x64xf32> to vector<256x64xf32>
    %cst_22 = arith.constant dense<0.000000e+00> : vector<8x64xf32>
    %35 = tpu.matmul %23, %34, %cst_22 {dimension_numbers = #tpu.dot_dimension_numbers<[1], [0], [0], [1], [0, 0, 1, 1], [], []>} : vector<8x256xf32>, vector<256x64xf32>, vector<8x64xf32> -> vector<8x64xf32>
    %c3 = arith.constant 3 : index
    %c0_23 = arith.constant 0 : index
    %c0_24 = arith.constant 0 : index
    %36 = vector.load %arg3[%c3, %c0_23, %c0_24] : memref<16x256x64xf32, #tpu.memory_space<vmem>>, vector<1x256x64xf32>
    %37 = vector.shape_cast %36 : vector<1x256x64xf32> to vector<256x64xf32>
    %cst_25 = arith.constant dense<0.000000e+00> : vector<8x64xf32>
    %38 = tpu.matmul %23, %37, %cst_25 {dimension_numbers = #tpu.dot_dimension_numbers<[1], [0], [0], [1], [0, 0, 1, 1], [], []>} : vector<8x256xf32>, vector<256x64xf32>, vector<8x64xf32> -> vector<8x64xf32>
    %c4 = arith.constant 4 : index
    %c0_26 = arith.constant 0 : index
    %c0_27 = arith.constant 0 : index
    %39 = vector.load %arg3[%c4, %c0_26, %c0_27] : memref<16x256x64xf32, #tpu.memory_space<vmem>>, vector<1x256x64xf32>
    %40 = vector.shape_cast %39 : vector<1x256x64xf32> to vector<256x64xf32>
    %cst_28 = arith.constant dense<0.000000e+00> : vector<8x64xf32>
    %41 = tpu.matmul %23, %40, %cst_28 {dimension_numbers = #tpu.dot_dimension_numbers<[1], [0], [0], [1], [0, 0, 1, 1], [], []>} : vector<8x256xf32>, vector<256x64xf32>, vector<8x64xf32> -> vector<8x64xf32>
    %c5 = arith.constant 5 : index
    %c0_29 = arith.constant 0 : index
    %c0_30 = arith.constant 0 : index
    %42 = vector.load %arg3[%c5, %c0_29, %c0_30] : memref<16x256x64xf32, #tpu.memory_space<vmem>>, vector<1x256x64xf32>
    %43 = vector.shape_cast %42 : vector<1x256x64xf32> to vector<256x64xf32>
    %cst_31 = arith.constant dense<0.000000e+00> : vector<8x64xf32>
    %44 = tpu.matmul %23, %43, %cst_31 {dimension_numbers = #tpu.dot_dimension_numbers<[1], [0], [0], [1], [0, 0, 1, 1], [], []>} : vector<8x256xf32>, vector<256x64xf32>, vector<8x64xf32> -> vector<8x64xf32>
    %c6 = arith.constant 6 : index
    %c0_32 = arith.constant 0 : index
    %c0_33 = arith.constant 0 : index
    %45 = vector.load %arg3[%c6, %c0_32, %c0_33] : memref<16x256x64xf32, #tpu.memory_space<vmem>>, vector<1x256x64xf32>
    %46 = vector.shape_cast %45 : vector<1x256x64xf32> to vector<256x64xf32>
    %cst_34 = arith.constant dense<0.000000e+00> : vector<8x64xf32>
    %47 = tpu.matmul %23, %46, %cst_34 {dimension_numbers = #tpu.dot_dimension_numbers<[1], [0], [0], [1], [0, 0, 1, 1], [], []>} : vector<8x256xf32>, vector<256x64xf32>, vector<8x64xf32> -> vector<8x64xf32>
    %c7 = arith.constant 7 : index
    %c0_35 = arith.constant 0 : index
    %c0_36 = arith.constant 0 : index
    %48 = vector.load %arg3[%c7, %c0_35, %c0_36] : memref<16x256x64xf32, #tpu.memory_space<vmem>>, vector<1x256x64xf32>
    %49 = vector.shape_cast %48 : vector<1x256x64xf32> to vector<256x64xf32>
    %cst_37 = arith.constant dense<0.000000e+00> : vector<8x64xf32>
    %50 = tpu.matmul %23, %49, %cst_37 {dimension_numbers = #tpu.dot_dimension_numbers<[1], [0], [0], [1], [0, 0, 1, 1], [], []>} : vector<8x256xf32>, vector<256x64xf32>, vector<8x64xf32> -> vector<8x64xf32>
    %c8 = arith.constant 8 : index
    %c0_38 = arith.constant 0 : index
    %c0_39 = arith.constant 0 : index
    %51 = vector.load %arg3[%c8, %c0_38, %c0_39] : memref<16x256x64xf32, #tpu.memory_space<vmem>>, vector<1x256x64xf32>
    %52 = vector.shape_cast %51 : vector<1x256x64xf32> to vector<256x64xf32>
    %cst_40 = arith.constant dense<0.000000e+00> : vector<8x64xf32>
    %53 = tpu.matmul %23, %52, %cst_40 {dimension_numbers = #tpu.dot_dimension_numbers<[1], [0], [0], [1], [0, 0, 1, 1], [], []>} : vector<8x256xf32>, vector<256x64xf32>, vector<8x64xf32> -> vector<8x64xf32>
    %c9 = arith.constant 9 : index
    %c0_41 = arith.constant 0 : index
    %c0_42 = arith.constant 0 : index
    %54 = vector.load %arg3[%c9, %c0_41, %c0_42] : memref<16x256x64xf32, #tpu.memory_space<vmem>>, vector<1x256x64xf32>
    %55 = vector.shape_cast %54 : vector<1x256x64xf32> to vector<256x64xf32>
    %cst_43 = arith.constant dense<0.000000e+00> : vector<8x64xf32>
    %56 = tpu.matmul %23, %55, %cst_43 {dimension_numbers = #tpu.dot_dimension_numbers<[1], [0], [0], [1], [0, 0, 1, 1], [], []>} : vector<8x256xf32>, vector<256x64xf32>, vector<8x64xf32> -> vector<8x64xf32>
    %c10 = arith.constant 10 : index
    %c0_44 = arith.constant 0 : index
    %c0_45 = arith.constant 0 : index
    %57 = vector.load %arg3[%c10, %c0_44, %c0_45] : memref<16x256x64xf32, #tpu.memory_space<vmem>>, vector<1x256x64xf32>
    %58 = vector.shape_cast %57 : vector<1x256x64xf32> to vector<256x64xf32>
    %cst_46 = arith.constant dense<0.000000e+00> : vector<8x64xf32>
    %59 = tpu.matmul %23, %58, %cst_46 {dimension_numbers = #tpu.dot_dimension_numbers<[1], [0], [0], [1], [0, 0, 1, 1], [], []>} : vector<8x256xf32>, vector<256x64xf32>, vector<8x64xf32> -> vector<8x64xf32>
    %c11 = arith.constant 11 : index
    %c0_47 = arith.constant 0 : index
    %c0_48 = arith.constant 0 : index
    %60 = vector.load %arg3[%c11, %c0_47, %c0_48] : memref<16x256x64xf32, #tpu.memory_space<vmem>>, vector<1x256x64xf32>
    %61 = vector.shape_cast %60 : vector<1x256x64xf32> to vector<256x64xf32>
    %cst_49 = arith.constant dense<0.000000e+00> : vector<8x64xf32>
    %62 = tpu.matmul %23, %61, %cst_49 {dimension_numbers = #tpu.dot_dimension_numbers<[1], [0], [0], [1], [0, 0, 1, 1], [], []>} : vector<8x256xf32>, vector<256x64xf32>, vector<8x64xf32> -> vector<8x64xf32>
    %c12 = arith.constant 12 : index
    %c0_50 = arith.constant 0 : index
    %c0_51 = arith.constant 0 : index
    %63 = vector.load %arg3[%c12, %c0_50, %c0_51] : memref<16x256x64xf32, #tpu.memory_space<vmem>>, vector<1x256x64xf32>
    %64 = vector.shape_cast %63 : vector<1x256x64xf32> to vector<256x64xf32>
    %cst_52 = arith.constant dense<0.000000e+00> : vector<8x64xf32>
    %65 = tpu.matmul %23, %64, %cst_52 {dimension_numbers = #tpu.dot_dimension_numbers<[1], [0], [0], [1], [0, 0, 1, 1], [], []>} : vector<8x256xf32>, vector<256x64xf32>, vector<8x64xf32> -> vector<8x64xf32>
    %c13 = arith.constant 13 : index
    %c0_53 = arith.constant 0 : index
    %c0_54 = arith.constant 0 : index
    %66 = vector.load %arg3[%c13, %c0_53, %c0_54] : memref<16x256x64xf32, #tpu.memory_space<vmem>>, vector<1x256x64xf32>
    %67 = vector.shape_cast %66 : vector<1x256x64xf32> to vector<256x64xf32>
    %cst_55 = arith.constant dense<0.000000e+00> : vector<8x64xf32>
    %68 = tpu.matmul %23, %67, %cst_55 {dimension_numbers = #tpu.dot_dimension_numbers<[1], [0], [0], [1], [0, 0, 1, 1], [], []>} : vector<8x256xf32>, vector<256x64xf32>, vector<8x64xf32> -> vector<8x64xf32>
    %c14 = arith.constant 14 : index
    %c0_56 = arith.constant 0 : index
    %c0_57 = arith.constant 0 : index
    %69 = vector.load %arg3[%c14, %c0_56, %c0_57] : memref<16x256x64xf32, #tpu.memory_space<vmem>>, vector<1x256x64xf32>
    %70 = vector.shape_cast %69 : vector<1x256x64xf32> to vector<256x64xf32>
    %cst_58 = arith.constant dense<0.000000e+00> : vector<8x64xf32>
    %71 = tpu.matmul %23, %70, %cst_58 {dimension_numbers = #tpu.dot_dimension_numbers<[1], [0], [0], [1], [0, 0, 1, 1], [], []>} : vector<8x256xf32>, vector<256x64xf32>, vector<8x64xf32> -> vector<8x64xf32>
    %c15 = arith.constant 15 : index
    %c0_59 = arith.constant 0 : index
    %c0_60 = arith.constant 0 : index
    %72 = vector.load %arg3[%c15, %c0_59, %c0_60] : memref<16x256x64xf32, #tpu.memory_space<vmem>>, vector<1x256x64xf32>
    %73 = vector.shape_cast %72 : vector<1x256x64xf32> to vector<256x64xf32>
    %cst_61 = arith.constant dense<0.000000e+00> : vector<8x64xf32>
    %74 = tpu.matmul %23, %73, %cst_61 {dimension_numbers = #tpu.dot_dimension_numbers<[1], [0], [0], [1], [0, 0, 1, 1], [], []>} : vector<8x256xf32>, vector<256x64xf32>, vector<8x64xf32> -> vector<8x64xf32>
    %75 = tpu.concatenate %29, %32, %35, %38, %41, %44, %47, %50, %53, %56, %59, %62, %65, %68, %71, %74 in 0 : vector<8x64xf32>, vector<8x64xf32>, vector<8x64xf32>, vector<8x64xf32>, vector<8x64xf32>, vector<8x64xf32>, vector<8x64xf32>, vector<8x64xf32>, vector<8x64xf32>, vector<8x64xf32>, vector<8x64xf32>, vector<8x64xf32>, vector<8x64xf32>, vector<8x64xf32>, vector<8x64xf32>, vector<8x64xf32> -> vector<128x64xf32>
    %c0_62 = arith.constant 0 : index
    %c0_63 = arith.constant 0 : index
    %76 = vector.load %arg4[%c0_62, %c0_63] : memref<16x128xf32, #tpu.memory_space<vmem>>, vector<16x128xf32>
    %cst_64 = arith.constant dense<0.000000e+00> : vector<16x64xf32>
    %77 = tpu.matmul %76, %75, %cst_64 {dimension_numbers = #tpu.dot_dimension_numbers<[1], [0], [0], [1], [0, 0, 1, 1], [], []>} : vector<16x128xf32>, vector<128x64xf32>, vector<16x64xf32> -> vector<16x64xf32>
    %cst_65 = arith.constant dense<0.000000e+00> : vector<16xf32>
    %78 = vector.multi_reduction <add>, %77, %cst_65 [1] : vector<16x64xf32> to vector<16xf32>
    %79 = vector.shape_cast %78 : vector<16xf32> to vector<16x1xf32>
    %80 = arith.mulf %77, %77 : vector<16x64xf32>
    %cst_66 = arith.constant dense<0.000000e+00> : vector<16xf32>
    %81 = vector.multi_reduction <add>, %80, %cst_66 [1] : vector<16x64xf32> to vector<16xf32>
    %82 = vector.shape_cast %81 : vector<16xf32> to vector<16x1xf32>
    %cst_67 = arith.constant 1.562500e-02 : f32
    %83 = vector.broadcast %cst_67 : f32 to vector<16x1xf32>
    %84 = arith.mulf %79, %83 : vector<16x1xf32>
    %cst_68 = arith.constant 1.562500e-02 : f32
    %85 = vector.broadcast %cst_68 : f32 to vector<16x1xf32>
    %86 = arith.mulf %82, %85 : vector<16x1xf32>
    %87 = arith.mulf %84, %84 : vector<16x1xf32>
    %88 = arith.subf %86, %87 : vector<16x1xf32>
    %89 = vector.broadcast %84 : vector<16x1xf32> to vector<16x64xf32>
    %90 = arith.subf %77, %89 : vector<16x64xf32>
    %cst_69 = arith.constant 9.99999974E-6 : f32
    %91 = vector.broadcast %cst_69 : f32 to vector<16x1xf32>
    %92 = arith.addf %88, %91 : vector<16x1xf32>
    %93 = math.rsqrt %92 : vector<16x1xf32>
    %94 = vector.broadcast %93 : vector<16x1xf32> to vector<16x64xf32>
    %95 = arith.mulf %90, %94 : vector<16x64xf32>
    %cst_70 = arith.constant 0.000000e+00 : f32
    %96 = vector.broadcast %cst_70 : f32 to vector<16x64xf32>
    %97 = arith.maximumf %95, %96 : vector<16x64xf32>
    %c0_71 = arith.constant 0 : index
    %c0_72 = arith.constant 0 : index
    %c0_73 = arith.constant 0 : index
    %98 = vector.load %arg13[%c0_71, %c0_72, %c0_73] : memref<1x16x64xf32, #tpu.memory_space<vmem>>, vector<1x16x64xf32>
    %99 = vector.shape_cast %98 : vector<1x16x64xf32> to vector<16x64xf32>
    %100 = vector.shape_cast %97 : vector<16x64xf32> to vector<1x16x64xf32>
    tpu.vector_store %arg13[%c0_71, %c0_72, %c0_73], %100 {strides = array<i32>} : memref<1x16x64xf32, #tpu.memory_space<vmem>>, vector<1x16x64xf32>,
    %c0_74 = arith.constant 0 : index
    %c0_75 = arith.constant 0 : index
    %c0_76 = arith.constant 0 : index
    %101 = vector.load %arg5[%c0_74, %c0_75, %c0_76] : memref<16x64x16xf32, #tpu.memory_space<vmem>>, vector<1x64x16xf32>
    %102 = vector.shape_cast %101 : vector<1x64x16xf32> to vector<64x16xf32>
    %cst_77 = arith.constant dense<0.000000e+00> : vector<16x16xf32>
    %103 = tpu.matmul %97, %102, %cst_77 {dimension_numbers = #tpu.dot_dimension_numbers<[1], [0], [0], [1], [0, 0, 1, 1], [], []>} : vector<16x64xf32>, vector<64x16xf32>, vector<16x16xf32> -> vector<16x16xf32>
    %c1_78 = arith.constant 1 : index
    %c0_79 = arith.constant 0 : index
    %c0_80 = arith.constant 0 : index
    %104 = vector.load %arg5[%c1_78, %c0_79, %c0_80] : memref<16x64x16xf32, #tpu.memory_space<vmem>>, vector<1x64x16xf32>
    %105 = vector.shape_cast %104 : vector<1x64x16xf32> to vector<64x16xf32>
    %cst_81 = arith.constant dense<0.000000e+00> : vector<16x16xf32>
    %106 = tpu.matmul %97, %105, %cst_81 {dimension_numbers = #tpu.dot_dimension_numbers<[1], [0], [0], [1], [0, 0, 1, 1], [], []>} : vector<16x64xf32>, vector<64x16xf32>, vector<16x16xf32> -> vector<16x16xf32>
    %c2_82 = arith.constant 2 : index
    %c0_83 = arith.constant 0 : index
    %c0_84 = arith.constant 0 : index
    %107 = vector.load %arg5[%c2_82, %c0_83, %c0_84] : memref<16x64x16xf32, #tpu.memory_space<vmem>>, vector<1x64x16xf32>
    %108 = vector.shape_cast %107 : vector<1x64x16xf32> to vector<64x16xf32>
    %cst_85 = arith.constant dense<0.000000e+00> : vector<16x16xf32>
    %109 = tpu.matmul %97, %108, %cst_85 {dimension_numbers = #tpu.dot_dimension_numbers<[1], [0], [0], [1], [0, 0, 1, 1], [], []>} : vector<16x64xf32>, vector<64x16xf32>, vector<16x16xf32> -> vector<16x16xf32>
    %c3_86 = arith.constant 3 : index
    %c0_87 = arith.constant 0 : index
    %c0_88 = arith.constant 0 : index
    %110 = vector.load %arg5[%c3_86, %c0_87, %c0_88] : memref<16x64x16xf32, #tpu.memory_space<vmem>>, vector<1x64x16xf32>
    %111 = vector.shape_cast %110 : vector<1x64x16xf32> to vector<64x16xf32>
    %cst_89 = arith.constant dense<0.000000e+00> : vector<16x16xf32>
    %112 = tpu.matmul %97, %111, %cst_89 {dimension_numbers = #tpu.dot_dimension_numbers<[1], [0], [0], [1], [0, 0, 1, 1], [], []>} : vector<16x64xf32>, vector<64x16xf32>, vector<16x16xf32> -> vector<16x16xf32>
    %c4_90 = arith.constant 4 : index
    %c0_91 = arith.constant 0 : index
    %c0_92 = arith.constant 0 : index
    %113 = vector.load %arg5[%c4_90, %c0_91, %c0_92] : memref<16x64x16xf32, #tpu.memory_space<vmem>>, vector<1x64x16xf32>
    %114 = vector.shape_cast %113 : vector<1x64x16xf32> to vector<64x16xf32>
    %cst_93 = arith.constant dense<0.000000e+00> : vector<16x16xf32>
    %115 = tpu.matmul %97, %114, %cst_93 {dimension_numbers = #tpu.dot_dimension_numbers<[1], [0], [0], [1], [0, 0, 1, 1], [], []>} : vector<16x64xf32>, vector<64x16xf32>, vector<16x16xf32> -> vector<16x16xf32>
    %c5_94 = arith.constant 5 : index
    %c0_95 = arith.constant 0 : index
    %c0_96 = arith.constant 0 : index
    %116 = vector.load %arg5[%c5_94, %c0_95, %c0_96] : memref<16x64x16xf32, #tpu.memory_space<vmem>>, vector<1x64x16xf32>
    %117 = vector.shape_cast %116 : vector<1x64x16xf32> to vector<64x16xf32>
    %cst_97 = arith.constant dense<0.000000e+00> : vector<16x16xf32>
    %118 = tpu.matmul %97, %117, %cst_97 {dimension_numbers = #tpu.dot_dimension_numbers<[1], [0], [0], [1], [0, 0, 1, 1], [], []>} : vector<16x64xf32>, vector<64x16xf32>, vector<16x16xf32> -> vector<16x16xf32>
    %c6_98 = arith.constant 6 : index
    %c0_99 = arith.constant 0 : index
    %c0_100 = arith.constant 0 : index
    %119 = vector.load %arg5[%c6_98, %c0_99, %c0_100] : memref<16x64x16xf32, #tpu.memory_space<vmem>>, vector<1x64x16xf32>
    %120 = vector.shape_cast %119 : vector<1x64x16xf32> to vector<64x16xf32>
    %cst_101 = arith.constant dense<0.000000e+00> : vector<16x16xf32>
    %121 = tpu.matmul %97, %120, %cst_101 {dimension_numbers = #tpu.dot_dimension_numbers<[1], [0], [0], [1], [0, 0, 1, 1], [], []>} : vector<16x64xf32>, vector<64x16xf32>, vector<16x16xf32> -> vector<16x16xf32>
    %c7_102 = arith.constant 7 : index
    %c0_103 = arith.constant 0 : index
    %c0_104 = arith.constant 0 : index
    %122 = vector.load %arg5[%c7_102, %c0_103, %c0_104] : memref<16x64x16xf32, #tpu.memory_space<vmem>>, vector<1x64x16xf32>
    %123 = vector.shape_cast %122 : vector<1x64x16xf32> to vector<64x16xf32>
    %cst_105 = arith.constant dense<0.000000e+00> : vector<16x16xf32>
    %124 = tpu.matmul %97, %123, %cst_105 {dimension_numbers = #tpu.dot_dimension_numbers<[1], [0], [0], [1], [0, 0, 1, 1], [], []>} : vector<16x64xf32>, vector<64x16xf32>, vector<16x16xf32> -> vector<16x16xf32>
    %c8_106 = arith.constant 8 : index
    %c0_107 = arith.constant 0 : index
    %c0_108 = arith.constant 0 : index
    %125 = vector.load %arg5[%c8_106, %c0_107, %c0_108] : memref<16x64x16xf32, #tpu.memory_space<vmem>>, vector<1x64x16xf32>
    %126 = vector.shape_cast %125 : vector<1x64x16xf32> to vector<64x16xf32>
    %cst_109 = arith.constant dense<0.000000e+00> : vector<16x16xf32>
    %127 = tpu.matmul %97, %126, %cst_109 {dimension_numbers = #tpu.dot_dimension_numbers<[1], [0], [0], [1], [0, 0, 1, 1], [], []>} : vector<16x64xf32>, vector<64x16xf32>, vector<16x16xf32> -> vector<16x16xf32>
    %c9_110 = arith.constant 9 : index
    %c0_111 = arith.constant 0 : index
    %c0_112 = arith.constant 0 : index
    %128 = vector.load %arg5[%c9_110, %c0_111, %c0_112] : memref<16x64x16xf32, #tpu.memory_space<vmem>>, vector<1x64x16xf32>
    %129 = vector.shape_cast %128 : vector<1x64x16xf32> to vector<64x16xf32>
    %cst_113 = arith.constant dense<0.000000e+00> : vector<16x16xf32>
    %130 = tpu.matmul %97, %129, %cst_113 {dimension_numbers = #tpu.dot_dimension_numbers<[1], [0], [0], [1], [0, 0, 1, 1], [], []>} : vector<16x64xf32>, vector<64x16xf32>, vector<16x16xf32> -> vector<16x16xf32>
    %c10_114 = arith.constant 10 : index
    %c0_115 = arith.constant 0 : index
    %c0_116 = arith.constant 0 : index
    %131 = vector.load %arg5[%c10_114, %c0_115, %c0_116] : memref<16x64x16xf32, #tpu.memory_space<vmem>>, vector<1x64x16xf32>
    %132 = vector.shape_cast %131 : vector<1x64x16xf32> to vector<64x16xf32>
    %cst_117 = arith.constant dense<0.000000e+00> : vector<16x16xf32>
    %133 = tpu.matmul %97, %132, %cst_117 {dimension_numbers = #tpu.dot_dimension_numbers<[1], [0], [0], [1], [0, 0, 1, 1], [], []>} : vector<16x64xf32>, vector<64x16xf32>, vector<16x16xf32> -> vector<16x16xf32>
    %c11_118 = arith.constant 11 : index
    %c0_119 = arith.constant 0 : index
    %c0_120 = arith.constant 0 : index
    %134 = vector.load %arg5[%c11_118, %c0_119, %c0_120] : memref<16x64x16xf32, #tpu.memory_space<vmem>>, vector<1x64x16xf32>
    %135 = vector.shape_cast %134 : vector<1x64x16xf32> to vector<64x16xf32>
    %cst_121 = arith.constant dense<0.000000e+00> : vector<16x16xf32>
    %136 = tpu.matmul %97, %135, %cst_121 {dimension_numbers = #tpu.dot_dimension_numbers<[1], [0], [0], [1], [0, 0, 1, 1], [], []>} : vector<16x64xf32>, vector<64x16xf32>, vector<16x16xf32> -> vector<16x16xf32>
    %c12_122 = arith.constant 12 : index
    %c0_123 = arith.constant 0 : index
    %c0_124 = arith.constant 0 : index
    %137 = vector.load %arg5[%c12_122, %c0_123, %c0_124] : memref<16x64x16xf32, #tpu.memory_space<vmem>>, vector<1x64x16xf32>
    %138 = vector.shape_cast %137 : vector<1x64x16xf32> to vector<64x16xf32>
    %cst_125 = arith.constant dense<0.000000e+00> : vector<16x16xf32>
    %139 = tpu.matmul %97, %138, %cst_125 {dimension_numbers = #tpu.dot_dimension_numbers<[1], [0], [0], [1], [0, 0, 1, 1], [], []>} : vector<16x64xf32>, vector<64x16xf32>, vector<16x16xf32> -> vector<16x16xf32>
    %c13_126 = arith.constant 13 : index
    %c0_127 = arith.constant 0 : index
    %c0_128 = arith.constant 0 : index
    %140 = vector.load %arg5[%c13_126, %c0_127, %c0_128] : memref<16x64x16xf32, #tpu.memory_space<vmem>>, vector<1x64x16xf32>
    %141 = vector.shape_cast %140 : vector<1x64x16xf32> to vector<64x16xf32>
    %cst_129 = arith.constant dense<0.000000e+00> : vector<16x16xf32>
    %142 = tpu.matmul %97, %141, %cst_129 {dimension_numbers = #tpu.dot_dimension_numbers<[1], [0], [0], [1], [0, 0, 1, 1], [], []>} : vector<16x64xf32>, vector<64x16xf32>, vector<16x16xf32> -> vector<16x16xf32>
    %c14_130 = arith.constant 14 : index
    %c0_131 = arith.constant 0 : index
    %c0_132 = arith.constant 0 : index
    %143 = vector.load %arg5[%c14_130, %c0_131, %c0_132] : memref<16x64x16xf32, #tpu.memory_space<vmem>>, vector<1x64x16xf32>
    %144 = vector.shape_cast %143 : vector<1x64x16xf32> to vector<64x16xf32>
    %cst_133 = arith.constant dense<0.000000e+00> : vector<16x16xf32>
    %145 = tpu.matmul %97, %144, %cst_133 {dimension_numbers = #tpu.dot_dimension_numbers<[1], [0], [0], [1], [0, 0, 1, 1], [], []>} : vector<16x64xf32>, vector<64x16xf32>, vector<16x16xf32> -> vector<16x16xf32>
    %c15_134 = arith.constant 15 : index
    %c0_135 = arith.constant 0 : index
    %c0_136 = arith.constant 0 : index
    %146 = vector.load %arg5[%c15_134, %c0_135, %c0_136] : memref<16x64x16xf32, #tpu.memory_space<vmem>>, vector<1x64x16xf32>
    %147 = vector.shape_cast %146 : vector<1x64x16xf32> to vector<64x16xf32>
    %cst_137 = arith.constant dense<0.000000e+00> : vector<16x16xf32>
    %148 = tpu.matmul %97, %147, %cst_137 {dimension_numbers = #tpu.dot_dimension_numbers<[1], [0], [0], [1], [0, 0, 1, 1], [], []>} : vector<16x64xf32>, vector<64x16xf32>, vector<16x16xf32> -> vector<16x16xf32>
    %149 = tpu.concatenate %103, %106, %109, %112, %115, %118, %121, %124, %127, %130, %133, %136, %139, %142, %145, %148 in 0 : vector<16x16xf32>, vector<16x16xf32>, vector<16x16xf32>, vector<16x16xf32>, vector<16x16xf32>, vector<16x16xf32>, vector<16x16xf32>, vector<16x16xf32>, vector<16x16xf32>, vector<16x16xf32>, vector<16x16xf32>, vector<16x16xf32>, vector<16x16xf32>, vector<16x16xf32>, vector<16x16xf32>, vector<16x16xf32> -> vector<256x16xf32>
    %c0_138 = arith.constant 0 : index
    %c0_139 = arith.constant 0 : index
    %150 = vector.load %arg6[%c0_138, %c0_139] : memref<32x256xf32, #tpu.memory_space<vmem>>, vector<32x256xf32>
    %cst_140 = arith.constant dense<0.000000e+00> : vector<32x16xf32>
    %151 = tpu.matmul %150, %149, %cst_140 {dimension_numbers = #tpu.dot_dimension_numbers<[1], [0], [0], [1], [0, 0, 1, 1], [], []>} : vector<32x256xf32>, vector<256x16xf32>, vector<32x16xf32> -> vector<32x16xf32>
    %cst_141 = arith.constant dense<0.000000e+00> : vector<32xf32>
    %152 = vector.multi_reduction <add>, %151, %cst_141 [1] : vector<32x16xf32> to vector<32xf32>
    %153 = vector.shape_cast %152 : vector<32xf32> to vector<32x1xf32>
    %154 = arith.mulf %151, %151 : vector<32x16xf32>
    %cst_142 = arith.constant dense<0.000000e+00> : vector<32xf32>
    %155 = vector.multi_reduction <add>, %154, %cst_142 [1] : vector<32x16xf32> to vector<32xf32>
    %156 = vector.shape_cast %155 : vector<32xf32> to vector<32x1xf32>
    %cst_143 = arith.constant 6.250000e-02 : f32
    %157 = vector.broadcast %cst_143 : f32 to vector<32x1xf32>
    %158 = arith.mulf %153, %157 : vector<32x1xf32>
    %cst_144 = arith.constant 6.250000e-02 : f32
    %159 = vector.broadcast %cst_144 : f32 to vector<32x1xf32>
    %160 = arith.mulf %156, %159 : vector<32x1xf32>
    %161 = arith.mulf %158, %158 : vector<32x1xf32>
    %162 = arith.subf %160, %161 : vector<32x1xf32>
    %163 = vector.broadcast %158 : vector<32x1xf32> to vector<32x16xf32>
    %164 = arith.subf %151, %163 : vector<32x16xf32>
    %cst_145 = arith.constant 9.99999974E-6 : f32
    %165 = vector.broadcast %cst_145 : f32 to vector<32x1xf32>
    %166 = arith.addf %162, %165 : vector<32x1xf32>
    %167 = math.rsqrt %166 : vector<32x1xf32>
    %168 = vector.broadcast %167 : vector<32x1xf32> to vector<32x16xf32>
    %169 = arith.mulf %164, %168 : vector<32x16xf32>
    %cst_146 = arith.constant 0.000000e+00 : f32
    %170 = vector.broadcast %cst_146 : f32 to vector<32x16xf32>
    %171 = arith.maximumf %169, %170 : vector<32x16xf32>
    %c0_147 = arith.constant 0 : index
    %c0_148 = arith.constant 0 : index
    %c0_149 = arith.constant 0 : index
    %172 = vector.load %arg14[%c0_147, %c0_148, %c0_149] : memref<1x32x16xf32, #tpu.memory_space<vmem>>, vector<1x32x16xf32>
    %173 = vector.shape_cast %172 : vector<1x32x16xf32> to vector<32x16xf32>
    %174 = vector.shape_cast %171 : vector<32x16xf32> to vector<1x32x16xf32>
    tpu.vector_store %arg14[%c0_147, %c0_148, %c0_149], %174 {strides = array<i32>} : memref<1x32x16xf32, #tpu.memory_space<vmem>>, vector<1x32x16xf32>,
    %c0_150 = arith.constant 0 : index
    %c0_151 = arith.constant 0 : index
    %c0_152 = arith.constant 0 : index
    %175 = vector.load %arg7[%c0_150, %c0_151, %c0_152] : memref<9x16x16xf32, #tpu.memory_space<vmem>>, vector<1x16x16xf32>
    %176 = vector.shape_cast %175 : vector<1x16x16xf32> to vector<16x16xf32>
    %cst_153 = arith.constant dense<0.000000e+00> : vector<32x16xf32>
    %177 = tpu.matmul %171, %176, %cst_153 {dimension_numbers = #tpu.dot_dimension_numbers<[1], [0], [0], [1], [0, 0, 1, 1], [], []>} : vector<32x16xf32>, vector<16x16xf32>, vector<32x16xf32> -> vector<32x16xf32>
    %c1_154 = arith.constant 1 : index
    %c0_155 = arith.constant 0 : index
    %c0_156 = arith.constant 0 : index
    %178 = vector.load %arg7[%c1_154, %c0_155, %c0_156] : memref<9x16x16xf32, #tpu.memory_space<vmem>>, vector<1x16x16xf32>
    %179 = vector.shape_cast %178 : vector<1x16x16xf32> to vector<16x16xf32>
    %cst_157 = arith.constant dense<0.000000e+00> : vector<32x16xf32>
    %180 = tpu.matmul %171, %179, %cst_157 {dimension_numbers = #tpu.dot_dimension_numbers<[1], [0], [0], [1], [0, 0, 1, 1], [], []>} : vector<32x16xf32>, vector<16x16xf32>, vector<32x16xf32> -> vector<32x16xf32>
    %c2_158 = arith.constant 2 : index
    %c0_159 = arith.constant 0 : index
    %c0_160 = arith.constant 0 : index
    %181 = vector.load %arg7[%c2_158, %c0_159, %c0_160] : memref<9x16x16xf32, #tpu.memory_space<vmem>>, vector<1x16x16xf32>
    %182 = vector.shape_cast %181 : vector<1x16x16xf32> to vector<16x16xf32>
    %cst_161 = arith.constant dense<0.000000e+00> : vector<32x16xf32>
    %183 = tpu.matmul %171, %182, %cst_161 {dimension_numbers = #tpu.dot_dimension_numbers<[1], [0], [0], [1], [0, 0, 1, 1], [], []>} : vector<32x16xf32>, vector<16x16xf32>, vector<32x16xf32> -> vector<32x16xf32>
    %c3_162 = arith.constant 3 : index
    %c0_163 = arith.constant 0 : index
    %c0_164 = arith.constant 0 : index
    %184 = vector.load %arg7[%c3_162, %c0_163, %c0_164] : memref<9x16x16xf32, #tpu.memory_space<vmem>>, vector<1x16x16xf32>
    %185 = vector.shape_cast %184 : vector<1x16x16xf32> to vector<16x16xf32>
    %cst_165 = arith.constant dense<0.000000e+00> : vector<32x16xf32>
    %186 = tpu.matmul %171, %185, %cst_165 {dimension_numbers = #tpu.dot_dimension_numbers<[1], [0], [0], [1], [0, 0, 1, 1], [], []>} : vector<32x16xf32>, vector<16x16xf32>, vector<32x16xf32> -> vector<32x16xf32>
    %c4_166 = arith.constant 4 : index
    %c0_167 = arith.constant 0 : index
    %c0_168 = arith.constant 0 : index
    %187 = vector.load %arg7[%c4_166, %c0_167, %c0_168] : memref<9x16x16xf32, #tpu.memory_space<vmem>>, vector<1x16x16xf32>
    %188 = vector.shape_cast %187 : vector<1x16x16xf32> to vector<16x16xf32>
    %cst_169 = arith.constant dense<0.000000e+00> : vector<32x16xf32>
    %189 = tpu.matmul %171, %188, %cst_169 {dimension_numbers = #tpu.dot_dimension_numbers<[1], [0], [0], [1], [0, 0, 1, 1], [], []>} : vector<32x16xf32>, vector<16x16xf32>, vector<32x16xf32> -> vector<32x16xf32>
    %c5_170 = arith.constant 5 : index
    %c0_171 = arith.constant 0 : index
    %c0_172 = arith.constant 0 : index
    %190 = vector.load %arg7[%c5_170, %c0_171, %c0_172] : memref<9x16x16xf32, #tpu.memory_space<vmem>>, vector<1x16x16xf32>
    %191 = vector.shape_cast %190 : vector<1x16x16xf32> to vector<16x16xf32>
    %cst_173 = arith.constant dense<0.000000e+00> : vector<32x16xf32>
    %192 = tpu.matmul %171, %191, %cst_173 {dimension_numbers = #tpu.dot_dimension_numbers<[1], [0], [0], [1], [0, 0, 1, 1], [], []>} : vector<32x16xf32>, vector<16x16xf32>, vector<32x16xf32> -> vector<32x16xf32>
    %c6_174 = arith.constant 6 : index
    %c0_175 = arith.constant 0 : index
    %c0_176 = arith.constant 0 : index
    %193 = vector.load %arg7[%c6_174, %c0_175, %c0_176] : memref<9x16x16xf32, #tpu.memory_space<vmem>>, vector<1x16x16xf32>
    %194 = vector.shape_cast %193 : vector<1x16x16xf32> to vector<16x16xf32>
    %cst_177 = arith.constant dense<0.000000e+00> : vector<32x16xf32>
    %195 = tpu.matmul %171, %194, %cst_177 {dimension_numbers = #tpu.dot_dimension_numbers<[1], [0], [0], [1], [0, 0, 1, 1], [], []>} : vector<32x16xf32>, vector<16x16xf32>, vector<32x16xf32> -> vector<32x16xf32>
    %c7_178 = arith.constant 7 : index
    %c0_179 = arith.constant 0 : index
    %c0_180 = arith.constant 0 : index
    %196 = vector.load %arg7[%c7_178, %c0_179, %c0_180] : memref<9x16x16xf32, #tpu.memory_space<vmem>>, vector<1x16x16xf32>
    %197 = vector.shape_cast %196 : vector<1x16x16xf32> to vector<16x16xf32>
    %cst_181 = arith.constant dense<0.000000e+00> : vector<32x16xf32>
    %198 = tpu.matmul %171, %197, %cst_181 {dimension_numbers = #tpu.dot_dimension_numbers<[1], [0], [0], [1], [0, 0, 1, 1], [], []>} : vector<32x16xf32>, vector<16x16xf32>, vector<32x16xf32> -> vector<32x16xf32>
    %c8_182 = arith.constant 8 : index
    %c0_183 = arith.constant 0 : index
    %c0_184 = arith.constant 0 : index
    %199 = vector.load %arg7[%c8_182, %c0_183, %c0_184] : memref<9x16x16xf32, #tpu.memory_space<vmem>>, vector<1x16x16xf32>
    %200 = vector.shape_cast %199 : vector<1x16x16xf32> to vector<16x16xf32>
    %cst_185 = arith.constant dense<0.000000e+00> : vector<32x16xf32>
    %201 = tpu.matmul %171, %200, %cst_185 {dimension_numbers = #tpu.dot_dimension_numbers<[1], [0], [0], [1], [0, 0, 1, 1], [], []>} : vector<32x16xf32>, vector<16x16xf32>, vector<32x16xf32> -> vector<32x16xf32>
    %202 = tpu.concatenate %177, %180, %183, %186, %189, %192, %195, %198, %201 in 0 : vector<32x16xf32>, vector<32x16xf32>, vector<32x16xf32>, vector<32x16xf32>, vector<32x16xf32>, vector<32x16xf32>, vector<32x16xf32>, vector<32x16xf32>, vector<32x16xf32> -> vector<288x16xf32>
    %c0_186 = arith.constant 0 : index
    %c0_187 = arith.constant 0 : index
    %203 = vector.load %arg8[%c0_186, %c0_187] : memref<32x288xf32, #tpu.memory_space<vmem>>, vector<32x288xf32>
    %cst_188 = arith.constant dense<0.000000e+00> : vector<32x16xf32>
    %204 = tpu.matmul %203, %202, %cst_188 {dimension_numbers = #tpu.dot_dimension_numbers<[1], [0], [0], [1], [0, 0, 1, 1], [], []>} : vector<32x288xf32>, vector<288x16xf32>, vector<32x16xf32> -> vector<32x16xf32>
    %cst_189 = arith.constant dense<0.000000e+00> : vector<32xf32>
    %205 = vector.multi_reduction <add>, %204, %cst_189 [1] : vector<32x16xf32> to vector<32xf32>
    %206 = vector.shape_cast %205 : vector<32xf32> to vector<32x1xf32>
    %207 = arith.mulf %204, %204 : vector<32x16xf32>
    %cst_190 = arith.constant dense<0.000000e+00> : vector<32xf32>
    %208 = vector.multi_reduction <add>, %207, %cst_190 [1] : vector<32x16xf32> to vector<32xf32>
    %209 = vector.shape_cast %208 : vector<32xf32> to vector<32x1xf32>
    %cst_191 = arith.constant 6.250000e-02 : f32
    %210 = vector.broadcast %cst_191 : f32 to vector<32x1xf32>
    %211 = arith.mulf %206, %210 : vector<32x1xf32>
    %cst_192 = arith.constant 6.250000e-02 : f32
    %212 = vector.broadcast %cst_192 : f32 to vector<32x1xf32>
    %213 = arith.mulf %209, %212 : vector<32x1xf32>
    %214 = arith.mulf %211, %211 : vector<32x1xf32>
    %215 = arith.subf %213, %214 : vector<32x1xf32>
    %216 = vector.broadcast %211 : vector<32x1xf32> to vector<32x16xf32>
    %217 = arith.subf %204, %216 : vector<32x16xf32>
    %cst_193 = arith.constant 9.99999974E-6 : f32
    %218 = vector.broadcast %cst_193 : f32 to vector<32x1xf32>
    %219 = arith.addf %215, %218 : vector<32x1xf32>
    %220 = math.rsqrt %219 : vector<32x1xf32>
    %221 = vector.broadcast %220 : vector<32x1xf32> to vector<32x16xf32>
    %222 = arith.mulf %217, %221 : vector<32x16xf32>
    %cst_194 = arith.constant 0.000000e+00 : f32
    %223 = vector.broadcast %cst_194 : f32 to vector<32x16xf32>
    %224 = arith.maximumf %222, %223 : vector<32x16xf32>
    %c0_195 = arith.constant 0 : index
    %c0_196 = arith.constant 0 : index
    %c0_197 = arith.constant 0 : index
    %225 = vector.load %arg7[%c0_195, %c0_196, %c0_197] : memref<9x16x16xf32, #tpu.memory_space<vmem>>, vector<1x16x16xf32>
    %226 = vector.shape_cast %225 : vector<1x16x16xf32> to vector<16x16xf32>
    %cst_198 = arith.constant dense<0.000000e+00> : vector<32x16xf32>
    %227 = tpu.matmul %224, %226, %cst_198 {dimension_numbers = #tpu.dot_dimension_numbers<[1], [0], [0], [1], [0, 0, 1, 1], [], []>} : vector<32x16xf32>, vector<16x16xf32>, vector<32x16xf32> -> vector<32x16xf32>
    %c1_199 = arith.constant 1 : index
    %c0_200 = arith.constant 0 : index
    %c0_201 = arith.constant 0 : index
    %228 = vector.load %arg7[%c1_199, %c0_200, %c0_201] : memref<9x16x16xf32, #tpu.memory_space<vmem>>, vector<1x16x16xf32>
    %229 = vector.shape_cast %228 : vector<1x16x16xf32> to vector<16x16xf32>
    %cst_202 = arith.constant dense<0.000000e+00> : vector<32x16xf32>
    %230 = tpu.matmul %224, %229, %cst_202 {dimension_numbers = #tpu.dot_dimension_numbers<[1], [0], [0], [1], [0, 0, 1, 1], [], []>} : vector<32x16xf32>, vector<16x16xf32>, vector<32x16xf32> -> vector<32x16xf32>
    %c2_203 = arith.constant 2 : index
    %c0_204 = arith.constant 0 : index
    %c0_205 = arith.constant 0 : index
    %231 = vector.load %arg7[%c2_203, %c0_204, %c0_205] : memref<9x16x16xf32, #tpu.memory_space<vmem>>, vector<1x16x16xf32>
    %232 = vector.shape_cast %231 : vector<1x16x16xf32> to vector<16x16xf32>
    %cst_206 = arith.constant dense<0.000000e+00> : vector<32x16xf32>
    %233 = tpu.matmul %224, %232, %cst_206 {dimension_numbers = #tpu.dot_dimension_numbers<[1], [0], [0], [1], [0, 0, 1, 1], [], []>} : vector<32x16xf32>, vector<16x16xf32>, vector<32x16xf32> -> vector<32x16xf32>
    %c3_207 = arith.constant 3 : index
    %c0_208 = arith.constant 0 : index
    %c0_209 = arith.constant 0 : index
    %234 = vector.load %arg7[%c3_207, %c0_208, %c0_209] : memref<9x16x16xf32, #tpu.memory_space<vmem>>, vector<1x16x16xf32>
    %235 = vector.shape_cast %234 : vector<1x16x16xf32> to vector<16x16xf32>
    %cst_210 = arith.constant dense<0.000000e+00> : vector<32x16xf32>
    %236 = tpu.matmul %224, %235, %cst_210 {dimension_numbers = #tpu.dot_dimension_numbers<[1], [0], [0], [1], [0, 0, 1, 1], [], []>} : vector<32x16xf32>, vector<16x16xf32>, vector<32x16xf32> -> vector<32x16xf32>
    %c4_211 = arith.constant 4 : index
    %c0_212 = arith.constant 0 : index
    %c0_213 = arith.constant 0 : index
    %237 = vector.load %arg7[%c4_211, %c0_212, %c0_213] : memref<9x16x16xf32, #tpu.memory_space<vmem>>, vector<1x16x16xf32>
    %238 = vector.shape_cast %237 : vector<1x16x16xf32> to vector<16x16xf32>
    %cst_214 = arith.constant dense<0.000000e+00> : vector<32x16xf32>
    %239 = tpu.matmul %224, %238, %cst_214 {dimension_numbers = #tpu.dot_dimension_numbers<[1], [0], [0], [1], [0, 0, 1, 1], [], []>} : vector<32x16xf32>, vector<16x16xf32>, vector<32x16xf32> -> vector<32x16xf32>
    %c5_215 = arith.constant 5 : index
    %c0_216 = arith.constant 0 : index
    %c0_217 = arith.constant 0 : index
    %240 = vector.load %arg7[%c5_215, %c0_216, %c0_217] : memref<9x16x16xf32, #tpu.memory_space<vmem>>, vector<1x16x16xf32>
    %241 = vector.shape_cast %240 : vector<1x16x16xf32> to vector<16x16xf32>
    %cst_218 = arith.constant dense<0.000000e+00> : vector<32x16xf32>
    %242 = tpu.matmul %224, %241, %cst_218 {dimension_numbers = #tpu.dot_dimension_numbers<[1], [0], [0], [1], [0, 0, 1, 1], [], []>} : vector<32x16xf32>, vector<16x16xf32>, vector<32x16xf32> -> vector<32x16xf32>
    %c6_219 = arith.constant 6 : index
    %c0_220 = arith.constant 0 : index
    %c0_221 = arith.constant 0 : index
    %243 = vector.load %arg7[%c6_219, %c0_220, %c0_221] : memref<9x16x16xf32, #tpu.memory_space<vmem>>, vector<1x16x16xf32>
    %244 = vector.shape_cast %243 : vector<1x16x16xf32> to vector<16x16xf32>
    %cst_222 = arith.constant dense<0.000000e+00> : vector<32x16xf32>
    %245 = tpu.matmul %224, %244, %cst_222 {dimension_numbers = #tpu.dot_dimension_numbers<[1], [0], [0], [1], [0, 0, 1, 1], [], []>} : vector<32x16xf32>, vector<16x16xf32>, vector<32x16xf32> -> vector<32x16xf32>
    %c7_223 = arith.constant 7 : index
    %c0_224 = arith.constant 0 : index
    %c0_225 = arith.constant 0 : index
    %246 = vector.load %arg7[%c7_223, %c0_224, %c0_225] : memref<9x16x16xf32, #tpu.memory_space<vmem>>, vector<1x16x16xf32>
    %247 = vector.shape_cast %246 : vector<1x16x16xf32> to vector<16x16xf32>
    %cst_226 = arith.constant dense<0.000000e+00> : vector<32x16xf32>
    %248 = tpu.matmul %224, %247, %cst_226 {dimension_numbers = #tpu.dot_dimension_numbers<[1], [0], [0], [1], [0, 0, 1, 1], [], []>} : vector<32x16xf32>, vector<16x16xf32>, vector<32x16xf32> -> vector<32x16xf32>
    %c8_227 = arith.constant 8 : index
    %c0_228 = arith.constant 0 : index
    %c0_229 = arith.constant 0 : index
    %249 = vector.load %arg7[%c8_227, %c0_228, %c0_229] : memref<9x16x16xf32, #tpu.memory_space<vmem>>, vector<1x16x16xf32>
    %250 = vector.shape_cast %249 : vector<1x16x16xf32> to vector<16x16xf32>
    %cst_230 = arith.constant dense<0.000000e+00> : vector<32x16xf32>
    %251 = tpu.matmul %224, %250, %cst_230 {dimension_numbers = #tpu.dot_dimension_numbers<[1], [0], [0], [1], [0, 0, 1, 1], [], []>} : vector<32x16xf32>, vector<16x16xf32>, vector<32x16xf32> -> vector<32x16xf32>
    %252 = tpu.concatenate %227, %230, %233, %236, %239, %242, %245, %248, %251 in 0 : vector<32x16xf32>, vector<32x16xf32>, vector<32x16xf32>, vector<32x16xf32>, vector<32x16xf32>, vector<32x16xf32>, vector<32x16xf32>, vector<32x16xf32>, vector<32x16xf32> -> vector<288x16xf32>
    %c0_231 = arith.constant 0 : index
    %c0_232 = arith.constant 0 : index
    %253 = vector.load %arg9[%c0_231, %c0_232] : memref<32x288xf32, #tpu.memory_space<vmem>>, vector<32x288xf32>
    %cst_233 = arith.constant dense<0.000000e+00> : vector<32x16xf32>
    %254 = tpu.matmul %253, %252, %cst_233 {dimension_numbers = #tpu.dot_dimension_numbers<[1], [0], [0], [1], [0, 0, 1, 1], [], []>} : vector<32x288xf32>, vector<288x16xf32>, vector<32x16xf32> -> vector<32x16xf32>
    %cst_234 = arith.constant dense<0.000000e+00> : vector<32xf32>
    %255 = vector.multi_reduction <add>, %254, %cst_234 [1] : vector<32x16xf32> to vector<32xf32>
    %256 = vector.shape_cast %255 : vector<32xf32> to vector<32x1xf32>
    %257 = arith.mulf %254, %254 : vector<32x16xf32>
    %cst_235 = arith.constant dense<0.000000e+00> : vector<32xf32>
    %258 = vector.multi_reduction <add>, %257, %cst_235 [1] : vector<32x16xf32> to vector<32xf32>
    %259 = vector.shape_cast %258 : vector<32xf32> to vector<32x1xf32>
    %cst_236 = arith.constant 6.250000e-02 : f32
    %260 = vector.broadcast %cst_236 : f32 to vector<32x1xf32>
    %261 = arith.mulf %256, %260 : vector<32x1xf32>
    %cst_237 = arith.constant 6.250000e-02 : f32
    %262 = vector.broadcast %cst_237 : f32 to vector<32x1xf32>
    %263 = arith.mulf %259, %262 : vector<32x1xf32>
    %264 = arith.mulf %261, %261 : vector<32x1xf32>
    %265 = arith.subf %263, %264 : vector<32x1xf32>
    %266 = vector.broadcast %261 : vector<32x1xf32> to vector<32x16xf32>
    %267 = arith.subf %254, %266 : vector<32x16xf32>
    %cst_238 = arith.constant 9.99999974E-6 : f32
    %268 = vector.broadcast %cst_238 : f32 to vector<32x1xf32>
    %269 = arith.addf %265, %268 : vector<32x1xf32>
    %270 = math.rsqrt %269 : vector<32x1xf32>
    %271 = vector.broadcast %270 : vector<32x1xf32> to vector<32x16xf32>
    %272 = arith.mulf %267, %271 : vector<32x16xf32>
    %273 = arith.addf %171, %272 : vector<32x16xf32>
    %c0_239 = arith.constant 0 : index
    %c0_240 = arith.constant 0 : index
    %c0_241 = arith.constant 0 : index
    %274 = vector.load %arg15[%c0_239, %c0_240, %c0_241] : memref<1x32x16xf32, #tpu.memory_space<vmem>>, vector<1x32x16xf32>
    %275 = vector.shape_cast %274 : vector<1x32x16xf32> to vector<32x16xf32>
    %276 = vector.shape_cast %273 : vector<32x16xf32> to vector<1x32x16xf32>
    tpu.vector_store %arg15[%c0_239, %c0_240, %c0_241], %276 {strides = array<i32>} : memref<1x32x16xf32, #tpu.memory_space<vmem>>, vector<1x32x16xf32>,
    %c0_242 = arith.constant 0 : index
    %c0_243 = arith.constant 0 : index
    %c0_244 = arith.constant 0 : index
    %277 = vector.load %arg7[%c0_242, %c0_243, %c0_244] : memref<9x16x16xf32, #tpu.memory_space<vmem>>, vector<1x16x16xf32>
    %278 = vector.shape_cast %277 : vector<1x16x16xf32> to vector<16x16xf32>
    %cst_245 = arith.constant dense<0.000000e+00> : vector<32x16xf32>
    %279 = tpu.matmul %273, %278, %cst_245 {dimension_numbers = #tpu.dot_dimension_numbers<[1], [0], [0], [1], [0, 0, 1, 1], [], []>} : vector<32x16xf32>, vector<16x16xf32>, vector<32x16xf32> -> vector<32x16xf32>
    %c1_246 = arith.constant 1 : index
    %c0_247 = arith.constant 0 : index
    %c0_248 = arith.constant 0 : index
    %280 = vector.load %arg7[%c1_246, %c0_247, %c0_248] : memref<9x16x16xf32, #tpu.memory_space<vmem>>, vector<1x16x16xf32>
    %281 = vector.shape_cast %280 : vector<1x16x16xf32> to vector<16x16xf32>
    %cst_249 = arith.constant dense<0.000000e+00> : vector<32x16xf32>
    %282 = tpu.matmul %273, %281, %cst_249 {dimension_numbers = #tpu.dot_dimension_numbers<[1], [0], [0], [1], [0, 0, 1, 1], [], []>} : vector<32x16xf32>, vector<16x16xf32>, vector<32x16xf32> -> vector<32x16xf32>
    %c2_250 = arith.constant 2 : index
    %c0_251 = arith.constant 0 : index
    %c0_252 = arith.constant 0 : index
    %283 = vector.load %arg7[%c2_250, %c0_251, %c0_252] : memref<9x16x16xf32, #tpu.memory_space<vmem>>, vector<1x16x16xf32>
    %284 = vector.shape_cast %283 : vector<1x16x16xf32> to vector<16x16xf32>
    %cst_253 = arith.constant dense<0.000000e+00> : vector<32x16xf32>
    %285 = tpu.matmul %273, %284, %cst_253 {dimension_numbers = #tpu.dot_dimension_numbers<[1], [0], [0], [1], [0, 0, 1, 1], [], []>} : vector<32x16xf32>, vector<16x16xf32>, vector<32x16xf32> -> vector<32x16xf32>
    %c3_254 = arith.constant 3 : index
    %c0_255 = arith.constant 0 : index
    %c0_256 = arith.constant 0 : index
    %286 = vector.load %arg7[%c3_254, %c0_255, %c0_256] : memref<9x16x16xf32, #tpu.memory_space<vmem>>, vector<1x16x16xf32>
    %287 = vector.shape_cast %286 : vector<1x16x16xf32> to vector<16x16xf32>
    %cst_257 = arith.constant dense<0.000000e+00> : vector<32x16xf32>
    %288 = tpu.matmul %273, %287, %cst_257 {dimension_numbers = #tpu.dot_dimension_numbers<[1], [0], [0], [1], [0, 0, 1, 1], [], []>} : vector<32x16xf32>, vector<16x16xf32>, vector<32x16xf32> -> vector<32x16xf32>
    %c4_258 = arith.constant 4 : index
    %c0_259 = arith.constant 0 : index
    %c0_260 = arith.constant 0 : index
    %289 = vector.load %arg7[%c4_258, %c0_259, %c0_260] : memref<9x16x16xf32, #tpu.memory_space<vmem>>, vector<1x16x16xf32>
    %290 = vector.shape_cast %289 : vector<1x16x16xf32> to vector<16x16xf32>
    %cst_261 = arith.constant dense<0.000000e+00> : vector<32x16xf32>
    %291 = tpu.matmul %273, %290, %cst_261 {dimension_numbers = #tpu.dot_dimension_numbers<[1], [0], [0], [1], [0, 0, 1, 1], [], []>} : vector<32x16xf32>, vector<16x16xf32>, vector<32x16xf32> -> vector<32x16xf32>
    %c5_262 = arith.constant 5 : index
    %c0_263 = arith.constant 0 : index
    %c0_264 = arith.constant 0 : index
    %292 = vector.load %arg7[%c5_262, %c0_263, %c0_264] : memref<9x16x16xf32, #tpu.memory_space<vmem>>, vector<1x16x16xf32>
    %293 = vector.shape_cast %292 : vector<1x16x16xf32> to vector<16x16xf32>
    %cst_265 = arith.constant dense<0.000000e+00> : vector<32x16xf32>
    %294 = tpu.matmul %273, %293, %cst_265 {dimension_numbers = #tpu.dot_dimension_numbers<[1], [0], [0], [1], [0, 0, 1, 1], [], []>} : vector<32x16xf32>, vector<16x16xf32>, vector<32x16xf32> -> vector<32x16xf32>
    %c6_266 = arith.constant 6 : index
    %c0_267 = arith.constant 0 : index
    %c0_268 = arith.constant 0 : index
    %295 = vector.load %arg7[%c6_266, %c0_267, %c0_268] : memref<9x16x16xf32, #tpu.memory_space<vmem>>, vector<1x16x16xf32>
    %296 = vector.shape_cast %295 : vector<1x16x16xf32> to vector<16x16xf32>
    %cst_269 = arith.constant dense<0.000000e+00> : vector<32x16xf32>
    %297 = tpu.matmul %273, %296, %cst_269 {dimension_numbers = #tpu.dot_dimension_numbers<[1], [0], [0], [1], [0, 0, 1, 1], [], []>} : vector<32x16xf32>, vector<16x16xf32>, vector<32x16xf32> -> vector<32x16xf32>
    %c7_270 = arith.constant 7 : index
    %c0_271 = arith.constant 0 : index
    %c0_272 = arith.constant 0 : index
    %298 = vector.load %arg7[%c7_270, %c0_271, %c0_272] : memref<9x16x16xf32, #tpu.memory_space<vmem>>, vector<1x16x16xf32>
    %299 = vector.shape_cast %298 : vector<1x16x16xf32> to vector<16x16xf32>
    %cst_273 = arith.constant dense<0.000000e+00> : vector<32x16xf32>
    %300 = tpu.matmul %273, %299, %cst_273 {dimension_numbers = #tpu.dot_dimension_numbers<[1], [0], [0], [1], [0, 0, 1, 1], [], []>} : vector<32x16xf32>, vector<16x16xf32>, vector<32x16xf32> -> vector<32x16xf32>
    %c8_274 = arith.constant 8 : index
    %c0_275 = arith.constant 0 : index
    %c0_276 = arith.constant 0 : index
    %301 = vector.load %arg7[%c8_274, %c0_275, %c0_276] : memref<9x16x16xf32, #tpu.memory_space<vmem>>, vector<1x16x16xf32>
    %302 = vector.shape_cast %301 : vector<1x16x16xf32> to vector<16x16xf32>
    %cst_277 = arith.constant dense<0.000000e+00> : vector<32x16xf32>
    %303 = tpu.matmul %273, %302, %cst_277 {dimension_numbers = #tpu.dot_dimension_numbers<[1], [0], [0], [1], [0, 0, 1, 1], [], []>} : vector<32x16xf32>, vector<16x16xf32>, vector<32x16xf32> -> vector<32x16xf32>
    %304 = tpu.concatenate %279, %282, %285, %288, %291, %294, %297, %300, %303 in 0 : vector<32x16xf32>, vector<32x16xf32>, vector<32x16xf32>, vector<32x16xf32>, vector<32x16xf32>, vector<32x16xf32>, vector<32x16xf32>, vector<32x16xf32>, vector<32x16xf32> -> vector<288x16xf32>
    %c0_278 = arith.constant 0 : index
    %c0_279 = arith.constant 0 : index
    %305 = vector.load %arg10[%c0_278, %c0_279] : memref<32x288xf32, #tpu.memory_space<vmem>>, vector<32x288xf32>
    %cst_280 = arith.constant dense<0.000000e+00> : vector<32x16xf32>
    %306 = tpu.matmul %305, %304, %cst_280 {dimension_numbers = #tpu.dot_dimension_numbers<[1], [0], [0], [1], [0, 0, 1, 1], [], []>} : vector<32x288xf32>, vector<288x16xf32>, vector<32x16xf32> -> vector<32x16xf32>
    %cst_281 = arith.constant dense<0.000000e+00> : vector<32xf32>
    %307 = vector.multi_reduction <add>, %306, %cst_281 [1] : vector<32x16xf32> to vector<32xf32>
    %308 = vector.shape_cast %307 : vector<32xf32> to vector<32x1xf32>
    %309 = arith.mulf %306, %306 : vector<32x16xf32>
    %cst_282 = arith.constant dense<0.000000e+00> : vector<32xf32>
    %310 = vector.multi_reduction <add>, %309, %cst_282 [1] : vector<32x16xf32> to vector<32xf32>
    %311 = vector.shape_cast %310 : vector<32xf32> to vector<32x1xf32>
    %cst_283 = arith.constant 6.250000e-02 : f32
    %312 = vector.broadcast %cst_283 : f32 to vector<32x1xf32>
    %313 = arith.mulf %308, %312 : vector<32x1xf32>
    %cst_284 = arith.constant 6.250000e-02 : f32
    %314 = vector.broadcast %cst_284 : f32 to vector<32x1xf32>
    %315 = arith.mulf %311, %314 : vector<32x1xf32>
    %316 = arith.mulf %313, %313 : vector<32x1xf32>
    %317 = arith.subf %315, %316 : vector<32x1xf32>
    %318 = vector.broadcast %313 : vector<32x1xf32> to vector<32x16xf32>
    %319 = arith.subf %306, %318 : vector<32x16xf32>
    %cst_285 = arith.constant 9.99999974E-6 : f32
    %320 = vector.broadcast %cst_285 : f32 to vector<32x1xf32>
    %321 = arith.addf %317, %320 : vector<32x1xf32>
    %322 = math.rsqrt %321 : vector<32x1xf32>
    %323 = vector.broadcast %322 : vector<32x1xf32> to vector<32x16xf32>
    %324 = arith.mulf %319, %323 : vector<32x16xf32>
    %cst_286 = arith.constant 0.000000e+00 : f32
    %325 = vector.broadcast %cst_286 : f32 to vector<32x16xf32>
    %326 = arith.maximumf %324, %325 : vector<32x16xf32>
    %c0_287 = arith.constant 0 : index
    %c0_288 = arith.constant 0 : index
    %c0_289 = arith.constant 0 : index
    %327 = vector.load %arg7[%c0_287, %c0_288, %c0_289] : memref<9x16x16xf32, #tpu.memory_space<vmem>>, vector<1x16x16xf32>
    %328 = vector.shape_cast %327 : vector<1x16x16xf32> to vector<16x16xf32>
    %cst_290 = arith.constant dense<0.000000e+00> : vector<32x16xf32>
    %329 = tpu.matmul %326, %328, %cst_290 {dimension_numbers = #tpu.dot_dimension_numbers<[1], [0], [0], [1], [0, 0, 1, 1], [], []>} : vector<32x16xf32>, vector<16x16xf32>, vector<32x16xf32> -> vector<32x16xf32>
    %c1_291 = arith.constant 1 : index
    %c0_292 = arith.constant 0 : index
    %c0_293 = arith.constant 0 : index
    %330 = vector.load %arg7[%c1_291, %c0_292, %c0_293] : memref<9x16x16xf32, #tpu.memory_space<vmem>>, vector<1x16x16xf32>
    %331 = vector.shape_cast %330 : vector<1x16x16xf32> to vector<16x16xf32>
    %cst_294 = arith.constant dense<0.000000e+00> : vector<32x16xf32>
    %332 = tpu.matmul %326, %331, %cst_294 {dimension_numbers = #tpu.dot_dimension_numbers<[1], [0], [0], [1], [0, 0, 1, 1], [], []>} : vector<32x16xf32>, vector<16x16xf32>, vector<32x16xf32> -> vector<32x16xf32>
    %c2_295 = arith.constant 2 : index
    %c0_296 = arith.constant 0 : index
    %c0_297 = arith.constant 0 : index
    %333 = vector.load %arg7[%c2_295, %c0_296, %c0_297] : memref<9x16x16xf32, #tpu.memory_space<vmem>>, vector<1x16x16xf32>
    %334 = vector.shape_cast %333 : vector<1x16x16xf32> to vector<16x16xf32>
    %cst_298 = arith.constant dense<0.000000e+00> : vector<32x16xf32>
    %335 = tpu.matmul %326, %334, %cst_298 {dimension_numbers = #tpu.dot_dimension_numbers<[1], [0], [0], [1], [0, 0, 1, 1], [], []>} : vector<32x16xf32>, vector<16x16xf32>, vector<32x16xf32> -> vector<32x16xf32>
    %c3_299 = arith.constant 3 : index
    %c0_300 = arith.constant 0 : index
    %c0_301 = arith.constant 0 : index
    %336 = vector.load %arg7[%c3_299, %c0_300, %c0_301] : memref<9x16x16xf32, #tpu.memory_space<vmem>>, vector<1x16x16xf32>
    %337 = vector.shape_cast %336 : vector<1x16x16xf32> to vector<16x16xf32>
    %cst_302 = arith.constant dense<0.000000e+00> : vector<32x16xf32>
    %338 = tpu.matmul %326, %337, %cst_302 {dimension_numbers = #tpu.dot_dimension_numbers<[1], [0], [0], [1], [0, 0, 1, 1], [], []>} : vector<32x16xf32>, vector<16x16xf32>, vector<32x16xf32> -> vector<32x16xf32>
    %c4_303 = arith.constant 4 : index
    %c0_304 = arith.constant 0 : index
    %c0_305 = arith.constant 0 : index
    %339 = vector.load %arg7[%c4_303, %c0_304, %c0_305] : memref<9x16x16xf32, #tpu.memory_space<vmem>>, vector<1x16x16xf32>
    %340 = vector.shape_cast %339 : vector<1x16x16xf32> to vector<16x16xf32>
    %cst_306 = arith.constant dense<0.000000e+00> : vector<32x16xf32>
    %341 = tpu.matmul %326, %340, %cst_306 {dimension_numbers = #tpu.dot_dimension_numbers<[1], [0], [0], [1], [0, 0, 1, 1], [], []>} : vector<32x16xf32>, vector<16x16xf32>, vector<32x16xf32> -> vector<32x16xf32>
    %c5_307 = arith.constant 5 : index
    %c0_308 = arith.constant 0 : index
    %c0_309 = arith.constant 0 : index
    %342 = vector.load %arg7[%c5_307, %c0_308, %c0_309] : memref<9x16x16xf32, #tpu.memory_space<vmem>>, vector<1x16x16xf32>
    %343 = vector.shape_cast %342 : vector<1x16x16xf32> to vector<16x16xf32>
    %cst_310 = arith.constant dense<0.000000e+00> : vector<32x16xf32>
    %344 = tpu.matmul %326, %343, %cst_310 {dimension_numbers = #tpu.dot_dimension_numbers<[1], [0], [0], [1], [0, 0, 1, 1], [], []>} : vector<32x16xf32>, vector<16x16xf32>, vector<32x16xf32> -> vector<32x16xf32>
    %c6_311 = arith.constant 6 : index
    %c0_312 = arith.constant 0 : index
    %c0_313 = arith.constant 0 : index
    %345 = vector.load %arg7[%c6_311, %c0_312, %c0_313] : memref<9x16x16xf32, #tpu.memory_space<vmem>>, vector<1x16x16xf32>
    %346 = vector.shape_cast %345 : vector<1x16x16xf32> to vector<16x16xf32>
    %cst_314 = arith.constant dense<0.000000e+00> : vector<32x16xf32>
    %347 = tpu.matmul %326, %346, %cst_314 {dimension_numbers = #tpu.dot_dimension_numbers<[1], [0], [0], [1], [0, 0, 1, 1], [], []>} : vector<32x16xf32>, vector<16x16xf32>, vector<32x16xf32> -> vector<32x16xf32>
    %c7_315 = arith.constant 7 : index
    %c0_316 = arith.constant 0 : index
    %c0_317 = arith.constant 0 : index
    %348 = vector.load %arg7[%c7_315, %c0_316, %c0_317] : memref<9x16x16xf32, #tpu.memory_space<vmem>>, vector<1x16x16xf32>
    %349 = vector.shape_cast %348 : vector<1x16x16xf32> to vector<16x16xf32>
    %cst_318 = arith.constant dense<0.000000e+00> : vector<32x16xf32>
    %350 = tpu.matmul %326, %349, %cst_318 {dimension_numbers = #tpu.dot_dimension_numbers<[1], [0], [0], [1], [0, 0, 1, 1], [], []>} : vector<32x16xf32>, vector<16x16xf32>, vector<32x16xf32> -> vector<32x16xf32>
    %c8_319 = arith.constant 8 : index
    %c0_320 = arith.constant 0 : index
    %c0_321 = arith.constant 0 : index
    %351 = vector.load %arg7[%c8_319, %c0_320, %c0_321] : memref<9x16x16xf32, #tpu.memory_space<vmem>>, vector<1x16x16xf32>
    %352 = vector.shape_cast %351 : vector<1x16x16xf32> to vector<16x16xf32>
    %cst_322 = arith.constant dense<0.000000e+00> : vector<32x16xf32>
    %353 = tpu.matmul %326, %352, %cst_322 {dimension_numbers = #tpu.dot_dimension_numbers<[1], [0], [0], [1], [0, 0, 1, 1], [], []>} : vector<32x16xf32>, vector<16x16xf32>, vector<32x16xf32> -> vector<32x16xf32>
    %354 = tpu.concatenate %329, %332, %335, %338, %341, %344, %347, %350, %353 in 0 : vector<32x16xf32>, vector<32x16xf32>, vector<32x16xf32>, vector<32x16xf32>, vector<32x16xf32>, vector<32x16xf32>, vector<32x16xf32>, vector<32x16xf32>, vector<32x16xf32> -> vector<288x16xf32>
    %c0_323 = arith.constant 0 : index
    %c0_324 = arith.constant 0 : index
    %355 = vector.load %arg11[%c0_323, %c0_324] : memref<32x288xf32, #tpu.memory_space<vmem>>, vector<32x288xf32>
    %cst_325 = arith.constant dense<0.000000e+00> : vector<32x16xf32>
    %356 = tpu.matmul %355, %354, %cst_325 {dimension_numbers = #tpu.dot_dimension_numbers<[1], [0], [0], [1], [0, 0, 1, 1], [], []>} : vector<32x288xf32>, vector<288x16xf32>, vector<32x16xf32> -> vector<32x16xf32>
    %cst_326 = arith.constant dense<0.000000e+00> : vector<32xf32>
    %357 = vector.multi_reduction <add>, %356, %cst_326 [1] : vector<32x16xf32> to vector<32xf32>
    %358 = vector.shape_cast %357 : vector<32xf32> to vector<32x1xf32>
    %359 = arith.mulf %356, %356 : vector<32x16xf32>
    %cst_327 = arith.constant dense<0.000000e+00> : vector<32xf32>
    %360 = vector.multi_reduction <add>, %359, %cst_327 [1] : vector<32x16xf32> to vector<32xf32>
    %361 = vector.shape_cast %360 : vector<32xf32> to vector<32x1xf32>
    %cst_328 = arith.constant 6.250000e-02 : f32
    %362 = vector.broadcast %cst_328 : f32 to vector<32x1xf32>
    %363 = arith.mulf %358, %362 : vector<32x1xf32>
    %cst_329 = arith.constant 6.250000e-02 : f32
    %364 = vector.broadcast %cst_329 : f32 to vector<32x1xf32>
    %365 = arith.mulf %361, %364 : vector<32x1xf32>
    %366 = arith.mulf %363, %363 : vector<32x1xf32>
    %367 = arith.subf %365, %366 : vector<32x1xf32>
    %368 = vector.broadcast %363 : vector<32x1xf32> to vector<32x16xf32>
    %369 = arith.subf %356, %368 : vector<32x16xf32>
    %cst_330 = arith.constant 9.99999974E-6 : f32
    %370 = vector.broadcast %cst_330 : f32 to vector<32x1xf32>
    %371 = arith.addf %367, %370 : vector<32x1xf32>
    %372 = math.rsqrt %371 : vector<32x1xf32>
    %373 = vector.broadcast %372 : vector<32x1xf32> to vector<32x16xf32>
    %374 = arith.mulf %369, %373 : vector<32x16xf32>
    %375 = arith.addf %273, %374 : vector<32x16xf32>
    %c0_331 = arith.constant 0 : index
    %c0_332 = arith.constant 0 : index
    %c0_333 = arith.constant 0 : index
    %376 = vector.load %arg16[%c0_331, %c0_332, %c0_333] : memref<1x32x16xf32, #tpu.memory_space<vmem>>, vector<1x32x16xf32>
    %377 = vector.shape_cast %376 : vector<1x32x16xf32> to vector<32x16xf32>
    %378 = vector.shape_cast %375 : vector<32x16xf32> to vector<1x32x16xf32>
    tpu.vector_store %arg16[%c0_331, %c0_332, %c0_333], %378 {strides = array<i32>} : memref<1x32x16xf32, #tpu.memory_space<vmem>>, vector<1x32x16xf32>,
    return
  }
  func.func @transform_0(%arg0: i32) -> (i32, i32, i32) {
    %c0_i32 = arith.constant 0 : i32
    %c0_i32_0 = arith.constant 0 : i32
    %c0_i32_1 = arith.constant 0 : i32
    return %arg0, %c0_i32, %c0_i32_0 : i32, i32, i32
  }
  func.func @transform_1(%arg0: i32) -> (i32, i32) {
    %c0_i32 = arith.constant 0 : i32
    %c0_i32_0 = arith.constant 0 : i32
    %c0_i32_1 = arith.constant 0 : i32
    return %c0_i32, %c0_i32_0 : i32, i32
  }
  func.func @transform_2(%arg0: i32) -> (i32, i32, i32) {
    %c0_i32 = arith.constant 0 : i32
    %c0_i32_0 = arith.constant 0 : i32
    %c0_i32_1 = arith.constant 0 : i32
    %c0_i32_2 = arith.constant 0 : i32
    return %c0_i32, %c0_i32_0, %c0_i32_1 : i32, i32, i32
  }
  func.func @transform_3(%arg0: i32) -> (i32, i32) {
    %c0_i32 = arith.constant 0 : i32
    %c0_i32_0 = arith.constant 0 : i32
    %c0_i32_1 = arith.constant 0 : i32
    return %c0_i32, %c0_i32_0 : i32, i32
  }
  func.func @transform_4(%arg0: i32) -> (i32, i32, i32) {
    %c0_i32 = arith.constant 0 : i32
    %c0_i32_0 = arith.constant 0 : i32
    %c0_i32_1 = arith.constant 0 : i32
    %c0_i32_2 = arith.constant 0 : i32
    return %c0_i32, %c0_i32_0, %c0_i32_1 : i32, i32, i32
  }
  func.func @transform_5(%arg0: i32) -> (i32, i32) {
    %c0_i32 = arith.constant 0 : i32
    %c0_i32_0 = arith.constant 0 : i32
    %c0_i32_1 = arith.constant 0 : i32
    return %c0_i32, %c0_i32_0 : i32, i32
  }
  func.func @transform_6(%arg0: i32) -> (i32, i32, i32) {
    %c0_i32 = arith.constant 0 : i32
    %c0_i32_0 = arith.constant 0 : i32
    %c0_i32_1 = arith.constant 0 : i32
    %c0_i32_2 = arith.constant 0 : i32
    return %c0_i32, %c0_i32_0, %c0_i32_1 : i32, i32, i32
  }
  func.func @transform_7(%arg0: i32) -> (i32, i32) {
    %c0_i32 = arith.constant 0 : i32
    %c0_i32_0 = arith.constant 0 : i32
    %c0_i32_1 = arith.constant 0 : i32
    return %c0_i32, %c0_i32_0 : i32, i32
  }
  func.func @transform_8(%arg0: i32) -> (i32, i32) {
    %c0_i32 = arith.constant 0 : i32
    %c0_i32_0 = arith.constant 0 : i32
    %c0_i32_1 = arith.constant 0 : i32
    return %c0_i32, %c0_i32_0 : i32, i32
  }
  func.func @transform_9(%arg0: i32) -> (i32, i32) {
    %c0_i32 = arith.constant 0 : i32
    %c0_i32_0 = arith.constant 0 : i32
    %c0_i32_1 = arith.constant 0 : i32
    return %c0_i32, %c0_i32_0 : i32, i32
  }
  func.func @transform_10(%arg0: i32) -> (i32, i32) {
    %c0_i32 = arith.constant 0 : i32
    %c0_i32_0 = arith.constant 0 : i32
    %c0_i32_1 = arith.constant 0 : i32
    return %c0_i32, %c0_i32_0 : i32, i32
  }
  func.func @transform_11(%arg0: i32) -> (i32, i32, i32) {
    %c0_i32 = arith.constant 0 : i32
    %c0_i32_0 = arith.constant 0 : i32
    %c0_i32_1 = arith.constant 0 : i32
    return %arg0, %c0_i32, %c0_i32_0 : i32, i32, i32
  }
  func.func @transform_12(%arg0: i32) -> (i32, i32, i32) {
    %c0_i32 = arith.constant 0 : i32
    %c0_i32_0 = arith.constant 0 : i32
    %c0_i32_1 = arith.constant 0 : i32
    return %arg0, %c0_i32, %c0_i32_0 : i32, i32, i32
  }
  func.func @transform_13(%arg0: i32) -> (i32, i32, i32) {
    %c0_i32 = arith.constant 0 : i32
    %c0_i32_0 = arith.constant 0 : i32
    %c0_i32_1 = arith.constant 0 : i32
    return %arg0, %c0_i32, %c0_i32_0 : i32, i32, i32
  }
  func.func @transform_14(%arg0: i32) -> (i32, i32, i32) {
    %c0_i32 = arith.constant 0 : i32
    %c0_i32_0 = arith.constant 0 : i32
    %c0_i32_1 = arith.constant 0 : i32
    return %arg0, %c0_i32, %c0_i32_0 : i32, i32, i32
  }
  func.func @transform_15(%arg0: i32) -> (i32, i32, i32) {
    %c0_i32 = arith.constant 0 : i32
    %c0_i32_0 = arith.constant 0 : i32
    %c0_i32_1 = arith.constant 0 : i32
    return %arg0, %c0_i32, %c0_i32_0 : i32, i32, i32
  }
}

</mosaic_0001>

<bundles_post_ra>
// kernel: tpu_custom_call.1
= control target key start
LH: loop header
LB: loop body
LE: loop exit
PB: predicated region body
PF: predicated region fallthrough
CT: control target
= control target key end

     0   :  { %s15677_s0 = inlined_call_operand.vmem [shape: f32[2,147,256], index: 0, kind: input, shape index: {}]   ;;  %s15678_s1 = inlined_call_operand.vmem [shape: f32[8,147], index: 1, kind: input, shape index: {}]   ;;  %s15679_s2 = inlined_call_operand.vmem [shape: f32[16,256,64], index: 2, kind: input, shape index: {}]   ;;  %s15680_s3 = inlined_call_operand.vmem [shape: f32[16,128], index: 3, kind: input, shape index: {}]   ;;  %s15681_s4 = inlined_call_operand.vmem [shape: f32[16,64,16], index: 4, kind: input, shape index: {}]   ;;  %s15682_s5 = inlined_call_operand.vmem [shape: f32[32,256], index: 5, kind: input, shape index: {}]   ;;  %s15683_s6 = inlined_call_operand.vmem [shape: f32[9,16,16], index: 6, kind: input, shape index: {}]   ;;  %s15684_s7 = inlined_call_operand.vmem [shape: f32[32,288], index: 7, kind: input, shape index: {}]   ;;  %s15685_s8 = inlined_call_operand.vmem [shape: f32[32,288], index: 8, kind: input, shape index: {}]   ;;  %s15686_s9 = inlined_call_operand.vmem [shape: f32[32,288], index: 9, kind: input, shape index: {}]   ;;  %s15687_s10 = inlined_call_operand.vmem [shape: f32[32,288], index: 10, kind: input, shape index: {}]   ;;  %s15688_s11 = inlined_call_operand.hbm [shape: f32[2,8,256], index: 11, kind: output, shape index: {0}]   ;;  %s15689_s12 = inlined_call_operand.hbm [shape: f32[2,16,64], index: 12, kind: output, shape index: {1}]   ;;  %s15690_s13 = inlined_call_operand.vmem [shape: f32[2,32,16], index: 13, kind: output, shape index: {2}]   ;;  %s15691_s14 = inlined_call_operand.vmem [shape: f32[2,32,16], index: 14, kind: output, shape index: {3}]   ;;  %s15692_s15 = inlined_call_operand.vmem [shape: f32[2,32,16], index: 15, kind: output, shape index: {4}]  }
   0x1   :  { %15701 = sst [smem:[#allocation15_spill]] %s15677_s0 }
   0x2   :  { %15702 = sst [smem:[#allocation16_spill]] %s15678_s1 }
   0x3   :  { %21 = vsyncpa [#allocation3], 0 }
   0x4   :  { %23 = vsyncpa [#allocation3 + $0x1], 0 }
   0x5   :  { %24 = vsyncpa [#allocation5], 0 }
   0x6   :  { %26 = vsyncpa [#allocation5 + $0x1], 0  ;;  %s12636_s18 = smov 0   ;;  %s12638_s19 = smov 0  }
   0x7   :  { %s12640_s20 = smov 0   ;;  %s12642_s21 = smov 0  }
   0x8 LB: > { %15703 = sst [smem:[#allocation8_spill]] %s12538_s18  ;;  %s12657_s22 = sadd.s32 4294967295, %s12550_s21   ;;  %s12550_s21 = sphi %s12642_s21, %s15718_s21   ;;  %s12546_s20 = sphi %s12640_s20, %s15721_s20   ;;  %s12542_s19 = sphi %s12638_s19, %s15720_s19   ;;  %s12538_s18 = sphi %s12636_s18, %s15719_s18  }
   0x9   : > { %15704 = sst [smem:[#allocation9_spill]] %s12542_s19  ;;  %s8373_s23 = sadd.s32 4294967294, %s12550_s21  }
   0xa   : > { %15705 = sst [smem:[#allocation10_spill]] %s12546_s20  ;;  %s12661_s24 = sadd.s32 1, %s12550_s21  }
   0xb   : > { %15706 = sst [smem:[#allocation11_spill]] %s12550_s21  ;;  %s275_s25 = sadd.s32 1, %s12546_s20 }
   0xc   : > { %15707 = sst [smem:[#allocation12_spill]] %s12661_s24  ;;  %s272_s26 = ssub.s32 %s12550_s21, %s12661_s24 }
   0xd   : > { %p285_p0 = scmp.ne.s32.totalorder %s12546_s20, %s12542_s19  ;;  %p273_p1 = scmp.eq.s32.totalorder %s272_s26, 0 }
   0xe   : > { %p286_p2 = scmp.eq.s32.totalorder %s12657_s22, 1  ;;  %p291_p3 = scmp.ne.s32.totalorder %s12542_s19, %s12538_s18 }
   0xf   : > { %p292_p4 = scmp.eq.s32.totalorder %s8373_s23, 1  ;;  %p8376_p7 = scmp.ge.s32.totalorder %s12550_s21, 1 }
  0x10   : > { %s12672_s27 = scalar_select %p273_p1, %s12546_s20, %s275_s25  }
  0x11   : > { %p12674_p5 = por %p286_p2, %p285_p0  ;;  %p12678_p6 = por %p292_p4, %p291_p3 }
  0x12   : > { %15708 = sst [smem:[#allocation13_spill]] %s12672_s27  ;;  %p452_p8 = scmp.lt.s32.totalorder %s12550_s21, 3 }
  0x13   : > { %s15710_s29 = scalar_select %p12678_p6, 1, 0 }
  0x14   : > { %p453_p9 = pnand %p8376_p7, %p452_p8 }
  0x15   : > { %15711 = sst [smem:[#allocation14_spill]] %s15710_s29  ;;  %p520_p10 = scmp.lt.s32.totalorder (!%p453_p9), %s12657_s22, 1  ;;  %vm580_vm0 = vcmask (!%p453_p9), 154624   ;;  %vm584_vm1 = vcmask (!%p453_p9), 1042432   ;;  %v700_v58 = vld [vmem:[%s15679_s2 + $0x80] sm:$0xff] (!%p453_p9)  ;;  %v701_v59 = vld [vmem:[%s15679_s2 + $0x88] sm:$0xff] (!%p453_p9) }
  0x16   : > { %456 = sbr.rel (%p453_p9) target bundleno = 4730 (0x127a), region = 64  ;;  %s15712_s1 = sld [smem:[#allocation16_spill]] (!%p453_p9)  ;;  %v8437_v60 = vld [vmem:[%s15679_s2 + $0x280] sm:$0xff] (!%p453_p9)  ;;  %v11223_v61 = vpack.c.bf16 (!%p453_p9), %v701_v59, %v700_v58  ;;  %v8438_v62 = vld [vmem:[%s15679_s2 + $0x288] sm:$0xff] (!%p453_p9)  ;;  %vm2408_vm2 = vcmask (!%p453_p9), 523264   ;;  %vm3885_vm3 = vcmask (!%p453_p9), 130048  }
  0x17   : > { %s15713_s0 = sld [smem:[#allocation15_spill]] (!%p453_p9)  ;;  %v684_v63 = vld [vmem:[%s15679_s2] sm:$0xff] (!%p453_p9)  ;;  %v8430_v58 = vld [vmem:[%s15679_s2 + $0x248] sm:$0xff] (!%p453_p9)  ;;  %s12953_s24 = sand.u32 (!%p453_p9), 1, %s12542_s19   ;;  %vm4769_vm4 = vcmask (!%p453_p9), 261120  }
  0x18   : > { %11224 = vmatprep.subr.bf16.mxu1 (!%p453_p9), %v11223_v61  ;;  %v711_v61 = vld [vmem:[%s15679_s2 + $0xd8] sm:$0xff] (!%p453_p9)  ;;  %s9224_s29 = sshll.u32 (!%p453_p9), %s12657_s22, 8 }
  0x1c   : > { %v541_v0 = vld [vmem:[%s15712_s1 + $0x8] sm:$0xff] (!%p453_p9)  ;;  %v540_v57 = vld [vmem:[%s15712_s1] sm:$0xff] (!%p453_p9) }
  0x1d   : > { %8388 = vmatprep.mubr.msk.f32.mxu0 %vm580_vm0, %v541_v0  ;;  %s12689_s17 = scalar_select %p520_p10, %s12657_s22, 1  ;;  %v685_v0 = vld [vmem:[%s15679_s2 + $0x8] sm:$0xff] }
  0x1f   : > { %s12361_s23 = smul.u32 304, %s12689_s17  ;;  %s14922_s1 = sshll.u32 %s12689_s17, 5 }
  0x20   : > { %s534_s21 = scalar_lea.vmem %s15691_s14, %s14922_s1  ;;  %s12552_s17 = smov [#allocation2]  }
  0x21   : > { %s12695_s27 = scalar_lea.vmem %s15713_s0, %s12361_s23  ;;  %s15714_s23 = sshll.u32 %s12953_s24, 4 }
  0x22   : > { %v543_v1 = vld [vmem:[%s12695_s27 + $0x8] sm:$0xff]  ;;  %v545_v2 = vld [vmem:[%s12695_s27 + $0x18] sm:$0xff]  ;;  %v542_v3 = vld [vmem:[%s12695_s27] sm:$0xff]  ;;  %s14453_s19 = scalar_lea.vmem [#allocation4], %s15714_s23  ;;  %s529_s23 = scalar_lea.vmem %s15690_s13, %s14922_s1 }
  0x23   : > { %v11187_v4 = vpack.c.bf16 %v545_v2, %v543_v1  ;;  %v544_v5 = vld [vmem:[%s12695_s27 + $0x10] sm:$0xff]  ;;  %v547_v6 = vld [vmem:[%s12695_s27 + $0x28] sm:$0xff]  ;;  %v549_v7 = vld [vmem:[%s12695_s27 + $0x38] sm:$0xff]  ;;  %v11287_v1 = vpack.c.bf16 %v8438_v62, %v8437_v60  ;;  %v11225_v2 = vpack.c.bf16 %v685_v0, %v684_v63  ;;  %s8148_s0 = scalar_lea.sflag [#allocation3], %s12953_s24  ;;  %s12460_s18 = sshll.u32 %s12552_s17, 4  ;;  %s12461_s18 = int_to_ptr.vmem [resolvable:$false] %s12460_s18 }
  0x24   : > { %v11189_v8 = vpack.c.bf16 %v544_v5, %v542_v3  ;;  %v11191_v9 = vpack.c.bf16 %v549_v7, %v547_v6  ;;  %v546_v10 = vld [vmem:[%s12695_s27 + $0x20] sm:$0xff]  ;;  %v548_v11 = vld [vmem:[%s12695_s27 + $0x30] sm:$0xff]  ;;  %v551_v12 = vld [vmem:[%s12695_s27 + $0x48] sm:$0xff] }
  0x25   : > { %11188 = vmatprep.subr.bf16.mxu0 %v11187_v4  ;;  %v553_v13 = vld [vmem:[%s12695_s27 + $0x58] sm:$0xff]  ;;  %v11193_v14 = vpack.c.bf16 %v548_v11, %v546_v10  ;;  %v550_v16 = vld [vmem:[%s12695_s27 + $0x40] sm:$0xff]  ;;  %v552_v17 = vld [vmem:[%s12695_s27 + $0x50] sm:$0xff]  ;;  %11226 = vmatpush3.bf16.msra.mxu1 %v11225_v2 }
  0x26   : > { %11190 = vmatpush1.bf16.msra.mxu0 %v11189_v8  ;;  %v11195_v15 = vpack.c.bf16 %v553_v13, %v551_v12  ;;  %v555_v18 = vld [vmem:[%s12695_s27 + $0x68] sm:$0xff]  ;;  %v557_v19 = vld [vmem:[%s12695_s27 + $0x78] sm:$0xff]  ;;  %v11197_v20 = vpack.c.bf16 %v552_v17, %v550_v16  ;;  %v554_v22 = vld [vmem:[%s12695_s27 + $0x60] sm:$0xff] }
  0x27   : > { %11192 = vmatprep.subr.bf16.mxu0 %v11191_v9  ;;  %v11199_v21 = vpack.c.bf16 %v557_v19, %v555_v18  ;;  %v556_v23 = vld [vmem:[%s12695_s27 + $0x70] sm:$0xff]  ;;  %v559_v24 = vld [vmem:[%s12695_s27 + $0x88] sm:$0xff]  ;;  %v561_v25 = vld [vmem:[%s12695_s27 + $0x98] sm:$0xff] }
  0x28   : > { %v11201_v26 = vpack.c.bf16 %v556_v23, %v554_v22  ;;  %v11203_v27 = vpack.c.bf16 %v561_v25, %v559_v24  ;;  %v558_v28 = vld [vmem:[%s12695_s27 + $0x80] sm:$0xff]  ;;  %v560_v29 = vld [vmem:[%s12695_s27 + $0x90] sm:$0xff]  ;;  %v563_v30 = vld [vmem:[%s12695_s27 + $0xa8] sm:$0xff] }
  0x29   : > { %v565_v31 = vld [vmem:[%s12695_s27 + $0xb8] sm:$0xff]  ;;  %v11205_v32 = vpack.c.bf16 %v560_v29, %v558_v28  ;;  %v562_v34 = vld [vmem:[%s12695_s27 + $0xa0] sm:$0xff]  ;;  %v564_v35 = vld [vmem:[%s12695_s27 + $0xb0] sm:$0xff] }
  0x2a   : > { %11194 = vmatpush1.bf16.msra.mxu0 %v11193_v14  ;;  %v11207_v33 = vpack.c.bf16 %v565_v31, %v563_v30  ;;  %v567_v36 = vld [vmem:[%s12695_s27 + $0xc8] sm:$0xff]  ;;  %v569_v37 = vld [vmem:[%s12695_s27 + $0xd8] sm:$0xff]  ;;  %v11209_v38 = vpack.c.bf16 %v564_v35, %v562_v34  ;;  %v566_v40 = vld [vmem:[%s12695_s27 + $0xc0] sm:$0xff] }
  0x2b   : > { %11196 = vmatprep.subr.bf16.mxu0 %v11195_v15  ;;  %v11211_v39 = vpack.c.bf16 %v569_v37, %v567_v36  ;;  %v568_v41 = vld [vmem:[%s12695_s27 + $0xd0] sm:$0xff]  ;;  %v571_v42 = vld [vmem:[%s12695_s27 + $0xe8] sm:$0xff]  ;;  %v573_v43 = vld [vmem:[%s12695_s27 + $0xf8] sm:$0xff] }
  0x2c   : > { %v11213_v44 = vpack.c.bf16 %v568_v41, %v566_v40  ;;  %v11215_v45 = vpack.c.bf16 %v573_v43, %v571_v42  ;;  %v570_v46 = vld [vmem:[%s12695_s27 + $0xe0] sm:$0xff]  ;;  %v572_v47 = vld [vmem:[%s12695_s27 + $0xf0] sm:$0xff]  ;;  %v575_v48 = vld [vmem:[%s12695_s27 + $0x108] sm:$0xff] }
  0x2d   : > { %v577_v49 = vld [vmem:[%s12695_s27 + $0x118] sm:$0xff]  ;;  %v11217_v50 = vpack.c.bf16 %v572_v47, %v570_v46  ;;  %v574_v52 = vld [vmem:[%s12695_s27 + $0x100] sm:$0xff]  ;;  %v576_v53 = vld [vmem:[%s12695_s27 + $0x110] sm:$0xff] }
  0x2e   : > { %11198 = vmatpush1.bf16.msra.mxu0 %v11197_v20  ;;  %v11219_v51 = vpack.c.bf16 %v577_v49, %v575_v48  ;;  %v11221_v54 = vpack.c.bf16 %v576_v53, %v574_v52  ;;  %v579_v55 = vld [vmem:[%s12695_s27 + $0x128] sm:$0x7]  ;;  %v578_v56 = vld [vmem:[%s12695_s27 + $0x120] sm:$0x7]  ;;  %v702_v5 = vld [vmem:[%s15679_s2 + $0x90] sm:$0xff]  ;;  %s15698_s27 = sshll.u32 %s12953_s24, 4 }
  0x2f   : > { %11200 = vmatprep.subr.bf16.mxu0 %v11199_v21  ;;  %v8421_v3 = vld [vmem:[%s15679_s2 + $0x200] sm:$0xff]  ;;  %v8422_v4 = vld [vmem:[%s15679_s2 + $0x208] sm:$0xff]  ;;  %v703_v7 = vld [vmem:[%s15679_s2 + $0x98] sm:$0xff]  ;;  %s13014_s30 = scalar_lea.vmem [#allocation2], %s15698_s27 }
  0x30   : > { %v11289_v6 = vpack.c.bf16 %v8422_v4, %v8421_v3  ;;  %v8439_v8 = vld [vmem:[%s15679_s2 + $0x290] sm:$0xff]  ;;  %v8440_v9 = vld [vmem:[%s15679_s2 + $0x298] sm:$0xff]  ;;  %v11227_v10 = vpack.c.bf16 %v703_v7, %v702_v5  ;;  %v704_v24 = vld [vmem:[%s15679_s2 + $0xa0] sm:$0xff]  ;;  %s8182_s26 = sshll.u32 %s13014_s30, 4  ;;  %s8183_s26 = int_to_ptr.vmem [resolvable:$true] %s8182_s26 }
  0x31   : > { %v11291_v11 = vpack.c.bf16 %v8440_v9, %v8439_v8  ;;  %v686_v12 = vld [vmem:[%s15679_s2 + $0x10] sm:$0xff]  ;;  %v687_v13 = vld [vmem:[%s15679_s2 + $0x18] sm:$0xff]  ;;  %v705_v25 = vld [vmem:[%s15679_s2 + $0xa8] sm:$0xff]  ;;  %s12456_s25 = scalar_lea.vmem %s8183_s26, 256  ;;  %p12463_p0 = scmp.lt.s32.totalorder %s8183_s26, %s12461_s18 }
  0x32   : > { %11202 = vmatpush1.bf16.msra.mxu0 %v11201_v26  ;;  %v8423_v14 = vld [vmem:[%s15679_s2 + $0x210] sm:$0xff]  ;;  %v11229_v15 = vpack.c.bf16 %v687_v13, %v686_v12  ;;  %v8424_v16 = vld [vmem:[%s15679_s2 + $0x218] sm:$0xff]  ;;  %11228 = vmatprep.subr.bf16.mxu1 %v11227_v10  ;;  %v8441_v26 = vld [vmem:[%s15679_s2 + $0x2a0] sm:$0xff]  ;;  %p12457_p11 = scmp.ne.s32.totalorder %s8183_s26, %s12456_s25 }
  0x33   : > { %11204 = vmatprep.subr.bf16.mxu0 %v11203_v27  ;;  %v11293_v17 = vpack.c.bf16 %v8424_v16, %v8423_v14  ;;  %v11231_v27 = vpack.c.bf16 %v705_v25, %v704_v24  ;;  %v8442_v28 = vld [vmem:[%s15679_s2 + $0x2a8] sm:$0xff]  ;;  %v688_v29 = vld [vmem:[%s15679_s2 + $0x20] sm:$0xff]  ;;  %v706_v36 = vld [vmem:[%s15679_s2 + $0xb0] sm:$0xff] }
  0x34   : > { %11230 = vmatpush3.bf16.msra.mxu1 %v11229_v15  ;;  %v689_v30 = vld [vmem:[%s15679_s2 + $0x28] sm:$0xff]  ;;  %v11295_v31 = vpack.c.bf16 %v8442_v28, %v8441_v26  ;;  %v707_v37 = vld [vmem:[%s15679_s2 + $0xb8] sm:$0xff]  ;;  %v690_v41 = vld [vmem:[%s15679_s2 + $0x30] sm:$0xff]  ;;  %p12458_p12 = pnand %p12457_p11, %p12674_p5 }
  0x35   : > { %v8426_v34 = vld [vmem:[%s15679_s2 + $0x228] sm:$0xff]  ;;  %11232 = vmatprep.subr.bf16.mxu1 %v11231_v27  ;;  %v8444_v40 = vld [vmem:[%s15679_s2 + $0x2b8] sm:$0xff]  ;;  %v708_v48 = vld [vmem:[%s15679_s2 + $0xc0] sm:$0xff] }
  0x36   : > { %11206 = vmatpush1.bf16.msra.mxu0 %v11205_v32  ;;  %v11233_v32 = vpack.c.bf16 %v689_v30, %v688_v29  ;;  %v691_v42 = vld [vmem:[%s15679_s2 + $0x38] sm:$0xff]  ;;  %v709_v49 = vld [vmem:[%s15679_s2 + $0xc8] sm:$0xff]  ;;  %v692_v53 = vld [vmem:[%s15679_s2 + $0x40] sm:$0xff]  ;;  %p12459_p13 = pneg %p12458_p12 }
  0x37   : > { %11208 = vmatprep.subr.bf16.mxu0 %v11207_v33  ;;  %v8425_v33 = vld [vmem:[%s15679_s2 + $0x220] sm:$0xff]  ;;  %v8428_v46 = vld [vmem:[%s15679_s2 + $0x238] sm:$0xff]  ;;  %v8446_v52 = vld [vmem:[%s15679_s2 + $0x2c8] sm:$0xff] }
  0x38   : > { %v11297_v35 = vpack.c.bf16 %v8426_v34, %v8425_v33  ;;  %11234 = vmatpush3.bf16.msra.mxu1 %v11233_v32  ;;  %v710_v60 = vld [vmem:[%s15679_s2 + $0xd0] sm:$0xff]  ;;  %v8448_v0 = vld [vmem:[%s15679_s2 + $0x2d8] sm:$0xff]  ;;  %v712_v8 = vld [vmem:[%s15679_s2 + $0xe0] sm:$0xff] }
  0x39   : > { %v8447_v62 = vld [vmem:[%s15679_s2 + $0x2d0] sm:$0xff]  ;;  %v11243_v63 = vpack.c.bf16 %v711_v61, %v710_v60  ;;  %v695_v2 = vld [vmem:[%s15679_s2 + $0x58] sm:$0xff]  ;;  %v713_v9 = vld [vmem:[%s15679_s2 + $0xe8] sm:$0xff] }
  0x3a   : > { %11210 = vmatpush1.bf16.msra.mxu0 %v11209_v38  ;;  %v8443_v38 = vld [vmem:[%s15679_s2 + $0x2b0] sm:$0xff]  ;;  %v11307_v3 = vpack.c.bf16 %v8448_v0, %v8447_v62  ;;  %v8449_v10 = vld [vmem:[%s15679_s2 + $0x2e0] sm:$0xff]  ;;  %v8450_v12 = vld [vmem:[%s15679_s2 + $0x2e8] sm:$0xff] }
  0x3b   : > { %11212 = vmatprep.subr.bf16.mxu0 %v11211_v39  ;;  %v11235_v39 = vpack.c.bf16 %v707_v37, %v706_v36  ;;  %v11299_v43 = vpack.c.bf16 %v8444_v40, %v8443_v38  ;;  %v8431_v5 = vld [vmem:[%s15679_s2 + $0x250] sm:$0xff]  ;;  %v696_v13 = vld [vmem:[%s15679_s2 + $0x60] sm:$0xff]  ;;  %v697_v14 = vld [vmem:[%s15679_s2 + $0x68] sm:$0xff]  ;;  %v11311_v15 = vpack.c.bf16 %v8450_v12, %v8449_v10 }
  0x3c   : > { %v11249_v16 = vpack.c.bf16 %v697_v14, %v696_v13  ;;  %v8451_v24 = vld [vmem:[%s15679_s2 + $0x2f0] sm:$0xff]  ;;  %v8452_v26 = vld [vmem:[%s15679_s2 + $0x2f8] sm:$0xff]  ;;  %v8405_v34 = vld [vmem:[%s15679_s2 + $0x180] sm:$0xff] }
  0x3d   : > { %11236 = vmatprep.subr.bf16.mxu1 %v11235_v39  ;;  %v698_v27 = vld [vmem:[%s15679_s2 + $0x70] sm:$0xff]  ;;  %v699_v28 = vld [vmem:[%s15679_s2 + $0x78] sm:$0xff]  ;;  %v11315_v29 = vpack.c.bf16 %v8452_v26, %v8451_v24  ;;  %v8501_v36 = vld [vmem:[%s15679_s2 + $0x480] sm:$0xff] }
  0x3e   : > { %11214 = vmatpush1.bf16.msra.mxu0 %v11213_v44  ;;  %v11237_v44 = vpack.c.bf16 %v691_v42, %v690_v41  ;;  %v11253_v30 = vpack.c.bf16 %v699_v28, %v698_v27  ;;  %v8436_v32 = vld [vmem:[%s15679_s2 + $0x278] sm:$0xff]  ;;  %v8502_v38 = vld [vmem:[%s15679_s2 + $0x488] sm:$0xff]  ;;  %v8391_v62 = vld [vmem:[%s15679_s2 + $0x110] sm:$0xff] }
  0x3f   : > { %11216 = vmatprep.subr.bf16.mxu0 %v11215_v45  ;;  %v8427_v45 = vld [vmem:[%s15679_s2 + $0x230] sm:$0xff]  ;;  %v11351_v39 = vpack.c.bf16 %v8502_v38, %v8501_v36  ;;  %v8393_v10 = vld [vmem:[%s15679_s2 + $0x120] sm:$0xff] }
  0x40   : > { %v11301_v47 = vpack.c.bf16 %v8428_v46, %v8427_v45  ;;  %11238 = vmatpush3.bf16.msra.mxu1 %v11237_v44  ;;  %v8487_v0 = vld [vmem:[%s15679_s2 + $0x410] sm:$0xff]  ;;  %v8489_v14 = vld [vmem:[%s15679_s2 + $0x420] sm:$0xff] }
  0x41   : > { %v8395_v24 = vld [vmem:[%s15679_s2 + $0x130] sm:$0xff]  ;;  %v8397_v36 = vld [vmem:[%s15679_s2 + $0x140] sm:$0xff] }
  0x42   : > { %11218 = vmatpush1.bf16.msra.mxu0 %v11217_v50  ;;  %v8445_v50 = vld [vmem:[%s15679_s2 + $0x2c0] sm:$0xff]  ;;  %v8491_v28 = vld [vmem:[%s15679_s2 + $0x430] sm:$0xff] }
  0x43   : > { %11220 = vmatprep.subr.bf16.mxu0 %v11219_v51  ;;  %v11239_v51 = vpack.c.bf16 %v709_v49, %v708_v48  ;;  %v8389_v49 = vld [vmem:[%s15679_s2 + $0x100] sm:$0xff] }
  0x45   : > { %11240 = vmatprep.subr.bf16.mxu1 %v11239_v51  ;;  %v8390_v51 = vld [vmem:[%s15679_s2 + $0x108] sm:$0xff] }
  0x46   : > { %11222 = vmatpush1.bf16.msra.mxu0 %v11221_v54  ;;  %v693_v54 = vld [vmem:[%s15679_s2 + $0x48] sm:$0xff]  ;;  %v11257_v60 = vpack.c.bf16 %v8390_v51, %v8389_v49  ;;  %v8400_v49 = vld [vmem:[%s15679_s2 + $0x158] sm:$0xff] }
  0x47   : > { %8386 = vmatprep.subr.msk.mxu0 %vm584_vm1, %v579_v55  ;;  %v11303_v55 = vpack.c.bf16 %v8446_v52, %v8445_v50  ;;  %v8485_v52 = vld [vmem:[%s15679_s2 + $0x400] sm:$0xff] }
  0x4a   : > { %8387 = vmatpush1.msk.msra.mxu0 %vm584_vm1, %v578_v56  ;;  %v11241_v56 = vpack.c.bf16 %v693_v54, %v692_v53  ;;  %v8407_v54 = vld [vmem:[%s15679_s2 + $0x190] sm:$0xff] }
  0x4b   : > { %656 = vmatmul.mubr.f32.vlgmr.msra.gmra.mrb[0].mxu0 %v540_v57  ;;  %11288 = vmatprep.subr.bf16.mxu0 %v11287_v1  ;;  %v8429_v57 = vld [vmem:[%s15679_s2 + $0x240] sm:$0xff]  ;;  %v694_v1 = vld [vmem:[%s15679_s2 + $0x50] sm:$0xff] }
  0x4c   : > { %11290 = vmatpush3.bf16.msra.mxu0 %v11289_v6  ;;  %v11305_v59 = vpack.c.bf16 %v8430_v58, %v8429_v57  ;;  %11242 = vmatpush3.bf16.msra.mxu1 %v11241_v56  ;;  %v11245_v4 = vpack.c.bf16 %v695_v2, %v694_v1  ;;  %v8432_v6 = vld [vmem:[%s15679_s2 + $0x258] sm:$0xff]  ;;  %v8503_v56 = vld [vmem:[%s15679_s2 + $0x490] sm:$0xff]  ;;  %v8409_v2 = vld [vmem:[%s15679_s2 + $0x1a0] sm:$0xff] }
  0x4d   : > { %11292 = vmatprep.subr.bf16.mxu0 %v11291_v11  ;;  %11244 = vmatprep.subr.bf16.mxu1 %v11243_v63  ;;  %v11309_v7 = vpack.c.bf16 %v8432_v6, %v8431_v5  ;;  %v11247_v11 = vpack.c.bf16 %v713_v9, %v712_v8  ;;  %v8504_v57 = vld [vmem:[%s15679_s2 + $0x498] sm:$0xff]  ;;  %v8410_v5 = vld [vmem:[%s15679_s2 + $0x1a8] sm:$0xff]  ;;  %v8505_v6 = vld [vmem:[%s15679_s2 + $0x4a0] sm:$0xff] }
  0x4e   : > { %v8392_v63 = vld [vmem:[%s15679_s2 + $0x118] sm:$0xff]  ;;  %v11263_v12 = vpack.c.bf16 %v8410_v5, %v8409_v2  ;;  %v8419_v2 = vld [vmem:[%s15679_s2 + $0x1f0] sm:$0xff] }
  0x4f   : > { %v8488_v1 = vld [vmem:[%s15679_s2 + $0x418] sm:$0xff]  ;;  %v11261_v8 = vpack.c.bf16 %v8392_v63, %v8391_v62 }
  0x50   : > { %11294 = vmatpush3.bf16.msra.mxu0 %v11293_v17  ;;  %11246 = vmatpush3.bf16.msra.mxu1 %v11245_v4  ;;  %v8433_v17 = vld [vmem:[%s15679_s2 + $0x260] sm:$0xff]  ;;  %v11355_v4 = vpack.c.bf16 %v8504_v57, %v8503_v56  ;;  %v11357_v9 = vpack.c.bf16 %v8488_v1, %v8487_v0  ;;  %v8498_v1 = vld [vmem:[%s15679_s2 + $0x468] sm:$0xff]  ;;  %v8516_v5 = vld [vmem:[%s15679_s2 + $0x4f8] sm:$0xff] }
  0x51   : > { %11296 = vmatprep.subr.bf16.mxu0 %v11295_v31  ;;  %11248 = vmatprep.subr.bf16.mxu1 %v11247_v11  ;;  %v8435_v31 = vld [vmem:[%s15679_s2 + $0x270] sm:$0xff]  ;;  %v8394_v11 = vld [vmem:[%s15679_s2 + $0x128] sm:$0xff]  ;;  %v8497_v0 = vld [vmem:[%s15679_s2 + $0x460] sm:$0xff] }
  0x52   : > { %v11317_v33 = vpack.c.bf16 %v8436_v32, %v8435_v31  ;;  %v8414_v31 = vld [vmem:[%s15679_s2 + $0x1c8] sm:$0xff]  ;;  %v8509_v32 = vld [vmem:[%s15679_s2 + $0x4c0] sm:$0xff] }
  0x54   : > { %11298 = vmatpush3.bf16.msra.mxu0 %v11297_v35  ;;  %11250 = vmatpush3.bf16.msra.mxu1 %v11249_v16  ;;  %v8406_v35 = vld [vmem:[%s15679_s2 + $0x188] sm:$0xff]  ;;  %v8411_v16 = vld [vmem:[%s15679_s2 + $0x1b0] sm:$0xff] }
  0x55   : > { %11300 = vmatprep.subr.bf16.mxu0 %v11299_v43  ;;  %v11255_v37 = vpack.c.bf16 %v8406_v35, %v8405_v34 }
  0x58   : > { %11302 = vmatpush3.bf16.msra.mxu0 %v11301_v47 }
  0x59   : > { %11304 = vmatprep.subr.bf16.mxu0 %v11303_v55  ;;  %v8408_v55 = vld [vmem:[%s15679_s2 + $0x198] sm:$0xff] }
  0x5c   : > { %11306 = vmatpush3.bf16.msra.mxu0 %v11305_v59 }
  0x5d   : > { %11308 = vmatprep.subr.bf16.mxu0 %v11307_v3  ;;  %v11259_v3 = vpack.c.bf16 %v8408_v55, %v8407_v54  ;;  %v8513_v54 = vld [vmem:[%s15679_s2 + $0x4e0] sm:$0xff]  ;;  %v8514_v55 = vld [vmem:[%s15679_s2 + $0x4e8] sm:$0xff] }
  0x5e   : > { %v11375_v63 = vpack.c.bf16 %v8514_v55, %v8513_v54 }
  0x60   : > { %11310 = vmatpush3.bf16.msra.mxu0 %v11309_v7  ;;  %v8506_v7 = vld [vmem:[%s15679_s2 + $0x4a8] sm:$0xff] }
  0x61   : > { %11312 = vmatprep.subr.bf16.mxu0 %v11311_v15  ;;  %v11359_v13 = vpack.c.bf16 %v8506_v7, %v8505_v6  ;;  %v8490_v15 = vld [vmem:[%s15679_s2 + $0x428] sm:$0xff]  ;;  %v11377_v7 = vpack.c.bf16 %v8498_v1, %v8497_v0  ;;  %v8477_v0 = vld [vmem:[%s15679_s2 + $0x3c0] sm:$0xff] }
  0x62   : > { %v8478_v1 = vld [vmem:[%s15679_s2 + $0x3c8] sm:$0xff] }
 0x11e   : > { %v12786_v18 = vpop.f32.mrb[0].mxu0 }
 0x11f   : > { %v12788_v19 = vpop.f32.mrb[1].mxu0  ;;  %v665_v20 = vmul.f32 %v12786_v18, %v12786_v18 }
 0x120   : > { %v662_v21 = vadd.f32 %v12788_v19, %v12786_v18  ;;  %v666_v22 = vmul.f32 %v12788_v19, %v12788_v19 }
 0x122   : > { %663 = vadd.xlane.f32.xlu0 %v662_v21  ;;  %v667_v23 = vadd.f32 %v666_v22, %v665_v20  ;;  %v8434_v20 = vld [vmem:[%s15679_s2 + $0x268] sm:$0xff]  ;;  %v714_v22 = vld [vmem:[%s15679_s2 + $0xf0] sm:$0xff] }
 0x123   : > { %v11313_v21 = vpack.c.bf16 %v8434_v20, %v8433_v17  ;;  %v8412_v17 = vld [vmem:[%s15679_s2 + $0x1b8] sm:$0xff]  ;;  %v8507_v20 = vld [vmem:[%s15679_s2 + $0x4b0] sm:$0xff] }
 0x124   : > { %v11267_v26 = vpack.c.bf16 %v8412_v17, %v8411_v16  ;;  %v8565_v16 = vld [vmem:[%s15679_s2 + $0x680] sm:$0xff]  ;;  %v8566_v17 = vld [vmem:[%s15679_s2 + $0x688] sm:$0xff] }
 0x125   : > { %11314 = vmatpush3.bf16.msra.mxu0 %v11313_v21  ;;  %v8508_v21 = vld [vmem:[%s15679_s2 + $0x4b8] sm:$0xff] }
 0x126   : > { %668 = vadd.xlane.f32.xlu0 %v667_v23  ;;  %v715_v23 = vld [vmem:[%s15679_s2 + $0xf8] sm:$0xff]  ;;  %11316 = vmatprep.subr.bf16.mxu0 %v11315_v29  ;;  %v11363_v27 = vpack.c.bf16 %v8508_v21, %v8507_v20 }
 0x127   : > { %v11251_v25 = vpack.c.bf16 %v715_v23, %v714_v22  ;;  %v11265_v22 = vpack.c.bf16 %v8394_v11, %v8393_v10  ;;  %v11361_v23 = vpack.c.bf16 %v8490_v15, %v8489_v14  ;;  %v8492_v29 = vld [vmem:[%s15679_s2 + $0x438] sm:$0xff]  ;;  %v8469_v14 = vld [vmem:[%s15679_s2 + $0x380] sm:$0xff]  ;;  %v8470_v15 = vld [vmem:[%s15679_s2 + $0x388] sm:$0xff] }
 0x128   : > { %v11365_v35 = vpack.c.bf16 %v8492_v29, %v8491_v28  ;;  %v8471_v28 = vld [vmem:[%s15679_s2 + $0x390] sm:$0xff]  ;;  %v8472_v29 = vld [vmem:[%s15679_s2 + $0x398] sm:$0xff] }
 0x129   : > { %11252 = vmatprep.subr.bf16.mxu1 %v11251_v25  ;;  %11318 = vmatpush3.bf16.msra.mxu0 %v11317_v33  ;;  %v8396_v25 = vld [vmem:[%s15679_s2 + $0x138] sm:$0xff]  ;;  %v8510_v33 = vld [vmem:[%s15679_s2 + $0x4c8] sm:$0xff] }
 0x12a   : > { %11254 = vmatpush3.bf16.msra.mxu1 %v11253_v30  ;;  %11352 = vmatprep.subr.bf16.mxu0 %v11351_v39  ;;  %v8413_v30 = vld [vmem:[%s15679_s2 + $0x1c0] sm:$0xff]  ;;  %v11269_v34 = vpack.c.bf16 %v8396_v25, %v8395_v24  ;;  %v11367_v39 = vpack.c.bf16 %v8510_v33, %v8509_v32  ;;  %v8454_v25 = vld [vmem:[%s15679_s2 + $0x308] sm:$0xff] }
 0x12b   : > { %11256 = vmatprep.subr.bf16.mxu1 %v11255_v37  ;;  %v8398_v37 = vld [vmem:[%s15679_s2 + $0x148] sm:$0xff]  ;;  %v11271_v38 = vpack.c.bf16 %v8414_v31, %v8413_v30  ;;  %v8453_v24 = vld [vmem:[%s15679_s2 + $0x300] sm:$0xff]  ;;  %v8567_v30 = vld [vmem:[%s15679_s2 + $0x690] sm:$0xff] }
 0x12c   : > { %v8568_v31 = vld [vmem:[%s15679_s2 + $0x698] sm:$0xff]  ;;  %v11321_v32 = vpack.c.bf16 %v8454_v25, %v8453_v24 }
 0x12d   : > { %v8560_v25 = vld [vmem:[%s15679_s2 + $0x658] sm:$0xff] }
 0x1af   : > { %v664_v40 = vpop.xlane.xlu0 %663 }
 0x1b0   : > { %v670_v41 = vmul.f32 0.00390625, %v664_v40  ;;  %v8493_v40 = vld [vmem:[%s15679_s2 + $0x440] sm:$0xff] }
 0x1b2   : > { %v672_v43 = vmul.f32 %v670_v41, %v670_v41  ;;  %v674_v47 = vsub.f32 %v12786_v18, %v670_v41  ;;  %v675_v48 = vsub.f32 %v12788_v19, %v670_v41  ;;  %v8486_v18 = vld [vmem:[%s15679_s2 + $0x408] sm:$0xff] }
 0x1b3   : > { %v669_v42 = vpop.xlane.xlu0 %668  ;;  %v11353_v61 = vpack.c.bf16 %v8486_v18, %v8485_v52  ;;  %v8494_v41 = vld [vmem:[%s15679_s2 + $0x448] sm:$0xff]  ;;  %v8495_v52 = vld [vmem:[%s15679_s2 + $0x450] sm:$0xff]  ;;  %v8496_v18 = vld [vmem:[%s15679_s2 + $0x458] sm:$0xff] }
 0x1b4   : > { %v671_v44 = vmul.f32 0.00390625, %v669_v42  ;;  %v8415_v42 = vld [vmem:[%s15679_s2 + $0x1d0] sm:$0xff]  ;;  %v11373_v57 = vpack.c.bf16 %v8496_v18, %v8495_v52  ;;  %v8476_v18 = vld [vmem:[%s15679_s2 + $0x3b8] sm:$0xff] }
 0x1b5   : > { %v8475_v52 = vld [vmem:[%s15679_s2 + $0x3b0] sm:$0xff] }
 0x1b6   : > { %v673_v45 = vsub.f32 %v671_v44, %v672_v43  ;;  %v8416_v43 = vld [vmem:[%s15679_s2 + $0x1d8] sm:$0xff]  ;;  %v8511_v44 = vld [vmem:[%s15679_s2 + $0x4d0] sm:$0xff] }
 0x1b8   : > { %v676_v46 = vadd.f32 1e-05, %v673_v45  ;;  %v8512_v45 = vld [vmem:[%s15679_s2 + $0x4d8] sm:$0xff] }
 0x1b9   : > { %v11371_v51 = vpack.c.bf16 %v8512_v45, %v8511_v44 }
 0x1ba   : > { %12408 = vrsqrt.f32 %v676_v46  ;;  %v11273_v46 = vpack.c.bf16 %v8398_v37, %v8397_v36  ;;  %v8551_v36 = vld [vmem:[%s15679_s2 + $0x610] sm:$0xff]  ;;  %v11323_v37 = vpack.c.bf16 %v8472_v29, %v8471_v28  ;;  %v8577_v28 = vld [vmem:[%s15679_s2 + $0x6e0] sm:$0xff]  ;;  %v8578_v29 = vld [vmem:[%s15679_s2 + $0x6e8] sm:$0xff] }
 0x1c4   : > { %v12409_v50 = vpop.eup %12408 }
 0x1c5   : > { %v678_v53 = vmul.f32 %v12409_v50, %v674_v47  ;;  %v679_v19 = vmul.f32 %v12409_v50, %v675_v48  ;;  %v11369_v47 = vpack.c.bf16 %v8494_v41, %v8493_v40  ;;  %v8399_v48 = vld [vmem:[%s15679_s2 + $0x150] sm:$0xff]  ;;  %v11275_v50 = vpack.c.bf16 %v8416_v43, %v8415_v42  ;;  %v8473_v40 = vld [vmem:[%s15679_s2 + $0x3a0] sm:$0xff]  ;;  %v8474_v41 = vld [vmem:[%s15679_s2 + $0x3a8] sm:$0xff] }
 0x1c6   : > { %v11277_v56 = vpack.c.bf16 %v8400_v49, %v8399_v48  ;;  %v8569_v42 = vld [vmem:[%s15679_s2 + $0x6a0] sm:$0xff]  ;;  %v8570_v43 = vld [vmem:[%s15679_s2 + $0x6a8] sm:$0xff] }
 0x1c7   : > { %v12982_v58 = vmax.f32 %v678_v53, 0.0  ;;  %v12984_v59 = vmax.f32 %v679_v19, 0.0  ;;  %v8417_v53 = vld [vmem:[%s15679_s2 + $0x1e0] sm:$0xff]  ;;  %v8418_v19 = vld [vmem:[%s15679_s2 + $0x1e8] sm:$0xff] }
 0x1c8   : > { %v11279_v62 = vpack.c.bf16 %v8418_v19, %v8417_v53  ;;  %v8458_v48 = vld [vmem:[%s15679_s2 + $0x328] sm:$0xff]  ;;  %v8553_v49 = vld [vmem:[%s15679_s2 + $0x620] sm:$0xff]  ;;  %v8571_v53 = vld [vmem:[%s15679_s2 + $0x6b0] sm:$0xff] }
 0x1c9   : > { %780 = vmatprep.mubr.f32.mxu1 %v12984_v59  ;;  %986 = vmatprep.mubr.f32.mxu0 %v12984_v59  ;;  %682 = vst [vmem:[%s13014_s30] sm:$0xff] %v12982_v58  ;;  %683 = vst [vmem:[%s13014_s30 + $0x8] sm:$0xff] %v12984_v59  ;;  %v8572_v19 = vld [vmem:[%s15679_s2 + $0x6b8] sm:$0xff] }
 0x1ca   : > { %781 = vmatmul.mubr.f32.vlgmr.msra.gmra.mrb[0].mxu1 %v12982_v58  ;;  %987 = vmatmul.mubr.f32.vlgmr.msra.gmra.mrb[2].mxu0 %v12982_v58 }
 0x1cb   : > { %11258 = vmatpush3.bf16.msra.mxu1 %v11257_v60  ;;  %11354 = vmatpush3.bf16.msra.mxu0 %v11353_v61  ;;  %v8401_v60 = vld [vmem:[%s15679_s2 + $0x160] sm:$0xff]  ;;  %v8402_v61 = vld [vmem:[%s15679_s2 + $0x168] sm:$0xff] }
 0x1cc   : > { %883 = vmatprep.mubr.f32.mxu1 %v12984_v59  ;;  %1192 = vmatprep.mubr.f32.mxu0 %v12984_v59  ;;  %v11281_v6 = vpack.c.bf16 %v8402_v61, %v8401_v60  ;;  %v8460_v60 = vld [vmem:[%s15679_s2 + $0x338] sm:$0xff]  ;;  %v8555_v61 = vld [vmem:[%s15679_s2 + $0x630] sm:$0xff] }
 0x1cd   : > { %11260 = vmatprep.subr.bf16.mxu1 %v11259_v3  ;;  %11356 = vmatprep.subr.bf16.mxu0 %v11355_v4  ;;  %v8420_v3 = vld [vmem:[%s15679_s2 + $0x1f8] sm:$0xff]  ;;  %v8515_v4 = vld [vmem:[%s15679_s2 + $0x4f0] sm:$0xff] }
 0x1ce   : > { %v11283_v10 = vpack.c.bf16 %v8420_v3, %v8419_v2  ;;  %v11379_v11 = vpack.c.bf16 %v8516_v5, %v8515_v4  ;;  %v8573_v2 = vld [vmem:[%s15679_s2 + $0x6c0] sm:$0xff]  ;;  %v8574_v3 = vld [vmem:[%s15679_s2 + $0x6c8] sm:$0xff] }
 0x1cf   : > { %11262 = vmatpush3.bf16.msra.mxu1 %v11261_v8  ;;  %11358 = vmatpush3.bf16.msra.mxu0 %v11357_v9  ;;  %v8403_v8 = vld [vmem:[%s15679_s2 + $0x170] sm:$0xff]  ;;  %v8404_v9 = vld [vmem:[%s15679_s2 + $0x178] sm:$0xff] }
 0x1d0   : > { %11264 = vmatprep.subr.bf16.mxu1 %v11263_v12  ;;  %11360 = vmatprep.subr.bf16.mxu0 %v11359_v13  ;;  %v8499_v12 = vld [vmem:[%s15679_s2 + $0x470] sm:$0xff]  ;;  %v8500_v13 = vld [vmem:[%s15679_s2 + $0x478] sm:$0xff]  ;;  %v11285_v20 = vpack.c.bf16 %v8404_v9, %v8403_v8  ;;  %v8462_v8 = vld [vmem:[%s15679_s2 + $0x348] sm:$0xff] }
 0x1d1   : > { %v11381_v21 = vpack.c.bf16 %v8500_v13, %v8499_v12  ;;  %v8557_v9 = vld [vmem:[%s15679_s2 + $0x640] sm:$0xff]  ;;  %v8479_v12 = vld [vmem:[%s15679_s2 + $0x3d0] sm:$0xff]  ;;  %v8480_v13 = vld [vmem:[%s15679_s2 + $0x3d8] sm:$0xff] }
 0x1d3   : > { %11266 = vmatpush3.bf16.msra.mxu1 %v11265_v22  ;;  %11362 = vmatpush3.bf16.msra.mxu0 %v11361_v23  ;;  %v11319_v22 = vpack.c.bf16 %v8470_v15, %v8469_v14  ;;  %v11415_v23 = vpack.c.bf16 %v8566_v17, %v8565_v16  ;;  %v8575_v14 = vld [vmem:[%s15679_s2 + $0x6d0] sm:$0xff]  ;;  %v8576_v15 = vld [vmem:[%s15679_s2 + $0x6d8] sm:$0xff] }
 0x1d4   : > { %11268 = vmatprep.subr.bf16.mxu1 %v11267_v26  ;;  %11364 = vmatprep.subr.bf16.mxu0 %v11363_v27  ;;  %v8549_v26 = vld [vmem:[%s15679_s2 + $0x600] sm:$0xff]  ;;  %v8550_v27 = vld [vmem:[%s15679_s2 + $0x608] sm:$0xff]  ;;  %v11435_v24 = vpack.c.bf16 %v8576_v15, %v8575_v14 }
 0x1d5   : > { %v11417_v33 = vpack.c.bf16 %v8550_v27, %v8549_v26  ;;  %v8481_v26 = vld [vmem:[%s15679_s2 + $0x3e0] sm:$0xff]  ;;  %v8482_v27 = vld [vmem:[%s15679_s2 + $0x3e8] sm:$0xff] }
 0x1d7   : > { %11270 = vmatpush3.bf16.msra.mxu1 %v11269_v34  ;;  %11366 = vmatpush3.bf16.msra.mxu0 %v11365_v35  ;;  %v8455_v34 = vld [vmem:[%s15679_s2 + $0x310] sm:$0xff]  ;;  %v8456_v35 = vld [vmem:[%s15679_s2 + $0x318] sm:$0xff] }
 0x1d8   : > { %11272 = vmatprep.subr.bf16.mxu1 %v11271_v38  ;;  %11368 = vmatprep.subr.bf16.mxu0 %v11367_v39  ;;  %v11419_v38 = vpack.c.bf16 %v8568_v31, %v8567_v30  ;;  %v8552_v39 = vld [vmem:[%s15679_s2 + $0x618] sm:$0xff]  ;;  %v11325_v44 = vpack.c.bf16 %v8456_v35, %v8455_v34  ;;  %v8466_v34 = vld [vmem:[%s15679_s2 + $0x368] sm:$0xff]  ;;  %v8561_v35 = vld [vmem:[%s15679_s2 + $0x660] sm:$0xff] }
 0x1d9   : > { %v11421_v45 = vpack.c.bf16 %v8552_v39, %v8551_v36  ;;  %v11439_v36 = vpack.c.bf16 %v8578_v29, %v8577_v28  ;;  %v8484_v39 = vld [vmem:[%s15679_s2 + $0x3f8] sm:$0xff] }
 0x1db   : > { %11274 = vmatpush3.bf16.msra.mxu1 %v11273_v46  ;;  %11370 = vmatpush3.bf16.msra.mxu0 %v11369_v47  ;;  %v11327_v46 = vpack.c.bf16 %v8474_v41, %v8473_v40  ;;  %v8457_v47 = vld [vmem:[%s15679_s2 + $0x320] sm:$0xff]  ;;  %v8579_v40 = vld [vmem:[%s15679_s2 + $0x6f0] sm:$0xff]  ;;  %v8580_v41 = vld [vmem:[%s15679_s2 + $0x6f8] sm:$0xff] }
 0x1dc   : > { %11276 = vmatprep.subr.bf16.mxu1 %v11275_v50  ;;  %11372 = vmatprep.subr.bf16.mxu0 %v11371_v51  ;;  %v11423_v50 = vpack.c.bf16 %v8570_v43, %v8569_v42  ;;  %v8554_v51 = vld [vmem:[%s15679_s2 + $0x628] sm:$0xff]  ;;  %v11329_v54 = vpack.c.bf16 %v8458_v48, %v8457_v47  ;;  %v8563_v47 = vld [vmem:[%s15679_s2 + $0x670] sm:$0xff]  ;;  %v11443_v48 = vpack.c.bf16 %v8580_v41, %v8579_v40 }
 0x1dd   : > { %v11425_v55 = vpack.c.bf16 %v8554_v51, %v8553_v49  ;;  %v8564_v49 = vld [vmem:[%s15679_s2 + $0x678] sm:$0xff]  ;;  %v8534_v51 = vld [vmem:[%s15679_s2 + $0x588] sm:$0xff] }
 0x1df   : > { %11278 = vmatpush3.bf16.msra.mxu1 %v11277_v56  ;;  %11374 = vmatpush3.bf16.msra.mxu0 %v11373_v57  ;;  %v11331_v56 = vpack.c.bf16 %v8476_v18, %v8475_v52  ;;  %v8459_v57 = vld [vmem:[%s15679_s2 + $0x330] sm:$0xff]  ;;  %v8629_v52 = vld [vmem:[%s15679_s2 + $0x880] sm:$0xff]  ;;  %v8630_v18 = vld [vmem:[%s15679_s2 + $0x888] sm:$0xff] }
 0x1e0   : > { %11280 = vmatprep.subr.bf16.mxu1 %v11279_v62  ;;  %11376 = vmatprep.subr.bf16.mxu0 %v11375_v63  ;;  %v11427_v62 = vpack.c.bf16 %v8572_v19, %v8571_v53  ;;  %v8556_v63 = vld [vmem:[%s15679_s2 + $0x638] sm:$0xff]  ;;  %v11333_v4 = vpack.c.bf16 %v8460_v60, %v8459_v57  ;;  %v11445_v19 = vpack.c.bf16 %v8564_v49, %v8563_v47  ;;  %v8613_v60 = vld [vmem:[%s15679_s2 + $0x800] sm:$0xff]  ;;  %v8622_v47 = vld [vmem:[%s15679_s2 + $0x848] sm:$0xff] }
 0x1e1   : > { %v11429_v5 = vpack.c.bf16 %v8556_v63, %v8555_v61  ;;  %v11479_v57 = vpack.c.bf16 %v8630_v18, %v8629_v52  ;;  %v8614_v61 = vld [vmem:[%s15679_s2 + $0x808] sm:$0xff]  ;;  %v8536_v63 = vld [vmem:[%s15679_s2 + $0x598] sm:$0xff] }
 0x1e2   : > { %v8544_v49 = vld [vmem:[%s15679_s2 + $0x5d8] sm:$0xff] }
 0x1e3   : > { %11282 = vmatpush3.bf16.msra.mxu1 %v11281_v6  ;;  %11378 = vmatpush3.bf16.msra.mxu0 %v11377_v7  ;;  %v11335_v6 = vpack.c.bf16 %v8478_v1, %v8477_v0  ;;  %v8461_v7 = vld [vmem:[%s15679_s2 + $0x340] sm:$0xff]  ;;  %v8631_v1 = vld [vmem:[%s15679_s2 + $0x890] sm:$0xff] }
 0x1e4   : > { %11284 = vmatprep.subr.bf16.mxu1 %v11283_v10  ;;  %11380 = vmatprep.subr.bf16.mxu0 %v11379_v11  ;;  %v11431_v10 = vpack.c.bf16 %v8574_v3, %v8573_v2  ;;  %v8558_v11 = vld [vmem:[%s15679_s2 + $0x648] sm:$0xff]  ;;  %v11337_v16 = vpack.c.bf16 %v8462_v8, %v8461_v7  ;;  %v8632_v2 = vld [vmem:[%s15679_s2 + $0x898] sm:$0xff]  ;;  %v11481_v3 = vpack.c.bf16 %v8614_v61, %v8613_v60  ;;  %v8545_v60 = vld [vmem:[%s15679_s2 + $0x5e0] sm:$0xff] }
 0x1e5   : > { %v11433_v17 = vpack.c.bf16 %v8558_v11, %v8557_v9  ;;  %v8616_v8 = vld [vmem:[%s15679_s2 + $0x818] sm:$0xff]  ;;  %v8537_v9 = vld [vmem:[%s15679_s2 + $0x5a0] sm:$0xff]  ;;  %v11483_v11 = vpack.c.bf16 %v8632_v2, %v8631_v1  ;;  %v8546_v61 = vld [vmem:[%s15679_s2 + $0x5e8] sm:$0xff] }
 0x1e6   : > { %v11407_v2 = vpack.c.bf16 %v8546_v61, %v8545_v60 }
 0x1e7   : > { %11286 = vmatpush3.bf16.msra.mxu1 %v11285_v20  ;;  %11382 = vmatpush3.bf16.msra.mxu0 %v11381_v21  ;;  %v11339_v20 = vpack.c.bf16 %v8480_v13, %v8479_v12  ;;  %v8463_v21 = vld [vmem:[%s15679_s2 + $0x350] sm:$0xff]  ;;  %v8633_v12 = vld [vmem:[%s15679_s2 + $0x8a0] sm:$0xff]  ;;  %v8634_v13 = vld [vmem:[%s15679_s2 + $0x8a8] sm:$0xff] }
 0x1e8   : > { %11320 = vmatprep.subr.bf16.mxu1 %v11319_v22  ;;  %11416 = vmatprep.subr.bf16.mxu0 %v11415_v23  ;;  %v8464_v22 = vld [vmem:[%s15679_s2 + $0x358] sm:$0xff]  ;;  %v8559_v23 = vld [vmem:[%s15679_s2 + $0x650] sm:$0xff] }
 0x1e9   : > { %v11341_v30 = vpack.c.bf16 %v8464_v22, %v8463_v21  ;;  %v11437_v31 = vpack.c.bf16 %v8560_v25, %v8559_v23  ;;  %v8617_v21 = vld [vmem:[%s15679_s2 + $0x820] sm:$0xff]  ;;  %v11487_v22 = vpack.c.bf16 %v8634_v13, %v8633_v12  ;;  %v8618_v23 = vld [vmem:[%s15679_s2 + $0x828] sm:$0xff]  ;;  %v8540_v25 = vld [vmem:[%s15679_s2 + $0x5b8] sm:$0xff] }
 0x1ea   : > { %884 = vmatmul.mubr.f32.vlgmr.msra.gmra.mrb[2].mxu1 %v12982_v58  ;;  %1193 = vmatmul.mubr.f32.vlgmr.msra.gmra.mrb[4].mxu0 %v12982_v58  ;;  %v11489_v29 = vpack.c.bf16 %v8618_v23, %v8617_v21  ;;  %v8628_v21 = vld [vmem:[%s15679_s2 + $0x878] sm:$0xff]  ;;  %v8598_v23 = vld [vmem:[%s15679_s2 + $0x788] sm:$0xff] }
 0x1eb   : > { %11322 = vmatpush3.bf16.msra.mxu1 %v11321_v32  ;;  %1089 = vmatprep.mubr.f32.mxu1 %v12984_v59  ;;  %v11343_v32 = vpack.c.bf16 %v8482_v27, %v8481_v26  ;;  %v8635_v26 = vld [vmem:[%s15679_s2 + $0x8b0] sm:$0xff]  ;;  %v8636_v27 = vld [vmem:[%s15679_s2 + $0x8b8] sm:$0xff] }
 0x1ec   : > { %11418 = vmatpush3.bf16.msra.mxu0 %v11417_v33  ;;  %1398 = vmatprep.mubr.f32.mxu0 %v12984_v59  ;;  %v8465_v33 = vld [vmem:[%s15679_s2 + $0x360] sm:$0xff] }
 0x1ed   : > { %11324 = vmatprep.subr.bf16.mxu1 %v11323_v37  ;;  %11420 = vmatprep.subr.bf16.mxu0 %v11419_v38  ;;  %v8562_v37 = vld [vmem:[%s15679_s2 + $0x668] sm:$0xff]  ;;  %v8483_v38 = vld [vmem:[%s15679_s2 + $0x3f0] sm:$0xff]  ;;  %v11345_v42 = vpack.c.bf16 %v8466_v34, %v8465_v33  ;;  %v11491_v34 = vpack.c.bf16 %v8636_v27, %v8635_v26 }
 0x1ee   : > { %v11441_v43 = vpack.c.bf16 %v8562_v37, %v8561_v35  ;;  %v8619_v33 = vld [vmem:[%s15679_s2 + $0x830] sm:$0xff]  ;;  %v8620_v35 = vld [vmem:[%s15679_s2 + $0x838] sm:$0xff]  ;;  %v8542_v37 = vld [vmem:[%s15679_s2 + $0x5c8] sm:$0xff] }
 0x1ef   : > { %11326 = vmatpush3.bf16.msra.mxu1 %v11325_v44  ;;  %v11347_v44 = vpack.c.bf16 %v8484_v39, %v8483_v38  ;;  %v8637_v38 = vld [vmem:[%s15679_s2 + $0x8c0] sm:$0xff]  ;;  %v8638_v39 = vld [vmem:[%s15679_s2 + $0x8c8] sm:$0xff]  ;;  %v11493_v41 = vpack.c.bf16 %v8620_v35, %v8619_v33  ;;  %v8600_v35 = vld [vmem:[%s15679_s2 + $0x798] sm:$0xff] }
 0x1f0   : > { %11422 = vmatpush3.bf16.msra.mxu0 %v11421_v45  ;;  %11328 = vmatprep.subr.bf16.mxu1 %v11327_v46  ;;  %v8467_v45 = vld [vmem:[%s15679_s2 + $0x370] sm:$0xff]  ;;  %v8468_v46 = vld [vmem:[%s15679_s2 + $0x378] sm:$0xff]  ;;  %v8678_v33 = vld [vmem:[%s15679_s2 + $0xa08] sm:$0xff] }
 0x1f1   : > { %11424 = vmatprep.subr.bf16.mxu0 %v11423_v50  ;;  %v8533_v50 = vld [vmem:[%s15679_s2 + $0x580] sm:$0xff]  ;;  %v11349_v53 = vpack.c.bf16 %v8468_v46, %v8467_v45  ;;  %v11495_v46 = vpack.c.bf16 %v8638_v39, %v8637_v38  ;;  %v8696_v38 = vld [vmem:[%s15679_s2 + $0xa98] sm:$0xff] }
 0x1f2   : > { %v8621_v45 = vld [vmem:[%s15679_s2 + $0x840] sm:$0xff] }
 0x1f3   : > { %11330 = vmatpush3.bf16.msra.mxu1 %v11329_v54  ;;  %v11383_v54 = vpack.c.bf16 %v8534_v51, %v8533_v50  ;;  %v8639_v50 = vld [vmem:[%s15679_s2 + $0x8d0] sm:$0xff]  ;;  %v8640_v51 = vld [vmem:[%s15679_s2 + $0x8d8] sm:$0xff]  ;;  %v11497_v18 = vpack.c.bf16 %v8622_v47, %v8621_v45  ;;  %v8601_v45 = vld [vmem:[%s15679_s2 + $0x7a0] sm:$0xff] }
 0x1f4   : > { %11426 = vmatpush3.bf16.msra.mxu0 %v11425_v55  ;;  %11332 = vmatprep.subr.bf16.mxu1 %v11331_v56  ;;  %v8517_v55 = vld [vmem:[%s15679_s2 + $0x500] sm:$0xff]  ;;  %v8518_v56 = vld [vmem:[%s15679_s2 + $0x508] sm:$0xff] }
 0x1f5   : > { %11428 = vmatprep.subr.bf16.mxu0 %v11427_v62  ;;  %v8535_v62 = vld [vmem:[%s15679_s2 + $0x590] sm:$0xff]  ;;  %v11385_v0 = vpack.c.bf16 %v8518_v56, %v8517_v55  ;;  %v11499_v56 = vpack.c.bf16 %v8640_v51, %v8639_v50 }
 0x1f6   : > { %v11387_v7 = vpack.c.bf16 %v8536_v63, %v8535_v62  ;;  %v8623_v55 = vld [vmem:[%s15679_s2 + $0x850] sm:$0xff]  ;;  %v8641_v62 = vld [vmem:[%s15679_s2 + $0x8e0] sm:$0xff]  ;;  %v8642_v63 = vld [vmem:[%s15679_s2 + $0x8e8] sm:$0xff] }
 0x1f7   : > { %11334 = vmatpush3.bf16.msra.mxu1 %v11333_v4  ;;  %v8519_v4 = vld [vmem:[%s15679_s2 + $0x510] sm:$0xff] }
 0x1f8   : > { %11430 = vmatpush3.bf16.msra.mxu0 %v11429_v5  ;;  %11336 = vmatprep.subr.bf16.mxu1 %v11335_v6  ;;  %v8520_v5 = vld [vmem:[%s15679_s2 + $0x518] sm:$0xff]  ;;  %v8615_v6 = vld [vmem:[%s15679_s2 + $0x810] sm:$0xff] }
 0x1f9   : > { %11432 = vmatprep.subr.bf16.mxu0 %v11431_v10  ;;  %v8538_v10 = vld [vmem:[%s15679_s2 + $0x5a8] sm:$0xff]  ;;  %v11389_v14 = vpack.c.bf16 %v8520_v5, %v8519_v4  ;;  %v11485_v15 = vpack.c.bf16 %v8616_v8, %v8615_v6  ;;  %v8625_v5 = vld [vmem:[%s15679_s2 + $0x860] sm:$0xff]  ;;  %v11503_v6 = vpack.c.bf16 %v8642_v63, %v8641_v62  ;;  %v8547_v8 = vld [vmem:[%s15679_s2 + $0x5f0] sm:$0xff] }
 0x1fa   : > { %v8530_v4 = vld [vmem:[%s15679_s2 + $0x568] sm:$0xff]  ;;  %v8587_v63 = vld [vmem:[%s15679_s2 + $0x730] sm:$0xff] }
 0x1fb   : > { %11338 = vmatpush3.bf16.msra.mxu1 %v11337_v16  ;;  %v11391_v16 = vpack.c.bf16 %v8538_v10, %v8537_v9  ;;  %v8548_v9 = vld [vmem:[%s15679_s2 + $0x5f8] sm:$0xff]  ;;  %v8643_v10 = vld [vmem:[%s15679_s2 + $0x8f0] sm:$0xff] }
 0x1fc   : > { %11434 = vmatpush3.bf16.msra.mxu0 %v11433_v17  ;;  %11340 = vmatprep.subr.bf16.mxu1 %v11339_v20  ;;  %v8521_v17 = vld [vmem:[%s15679_s2 + $0x520] sm:$0xff]  ;;  %v8522_v20 = vld [vmem:[%s15679_s2 + $0x528] sm:$0xff] }
 0x1fd   : > { %11436 = vmatprep.subr.bf16.mxu0 %v11435_v24  ;;  %v8539_v24 = vld [vmem:[%s15679_s2 + $0x5b0] sm:$0xff]  ;;  %v11393_v28 = vpack.c.bf16 %v8522_v20, %v8521_v17 }
 0x1fe   : > { %v8627_v17 = vld [vmem:[%s15679_s2 + $0x870] sm:$0xff] }
 0x1ff   : > { %11342 = vmatpush3.bf16.msra.mxu1 %v11341_v30  ;;  %v11395_v30 = vpack.c.bf16 %v8540_v25, %v8539_v24  ;;  %v8693_v24 = vld [vmem:[%s15679_s2 + $0xa80] sm:$0xff]  ;;  %v8694_v25 = vld [vmem:[%s15679_s2 + $0xa88] sm:$0xff]  ;;  %v11509_v27 = vpack.c.bf16 %v8628_v21, %v8627_v17  ;;  %v8608_v17 = vld [vmem:[%s15679_s2 + $0x7d8] sm:$0xff] }
 0x200   : > { %11438 = vmatpush3.bf16.msra.mxu0 %v11437_v31  ;;  %11344 = vmatprep.subr.bf16.mxu1 %v11343_v32  ;;  %v8523_v31 = vld [vmem:[%s15679_s2 + $0x530] sm:$0xff]  ;;  %v8524_v32 = vld [vmem:[%s15679_s2 + $0x538] sm:$0xff] }
 0x201   : > { %11440 = vmatprep.subr.bf16.mxu0 %v11439_v36  ;;  %v8541_v36 = vld [vmem:[%s15679_s2 + $0x5c0] sm:$0xff]  ;;  %v11397_v40 = vpack.c.bf16 %v8524_v32, %v8523_v31  ;;  %v11543_v31 = vpack.c.bf16 %v8694_v25, %v8693_v24  ;;  %v8704_v21 = vld [vmem:[%s15679_s2 + $0xad8] sm:$0xff]  ;;  %v8591_v25 = vld [vmem:[%s15679_s2 + $0x750] sm:$0xff] }
 0x202   : > { %v8677_v32 = vld [vmem:[%s15679_s2 + $0xa00] sm:$0xff] }
 0x203   : > { %11346 = vmatpush3.bf16.msra.mxu1 %v11345_v42  ;;  %v11399_v42 = vpack.c.bf16 %v8542_v37, %v8541_v36  ;;  %v8695_v37 = vld [vmem:[%s15679_s2 + $0xa90] sm:$0xff]  ;;  %v11545_v39 = vpack.c.bf16 %v8678_v33, %v8677_v32  ;;  %v8705_v32 = vld [vmem:[%s15679_s2 + $0xae0] sm:$0xff]  ;;  %v8706_v33 = vld [vmem:[%s15679_s2 + $0xae8] sm:$0xff] }
 0x204   : > { %11442 = vmatpush3.bf16.msra.mxu0 %v11441_v43  ;;  %11348 = vmatprep.subr.bf16.mxu1 %v11347_v44  ;;  %v8525_v43 = vld [vmem:[%s15679_s2 + $0x540] sm:$0xff]  ;;  %v8526_v44 = vld [vmem:[%s15679_s2 + $0x548] sm:$0xff]  ;;  %v11547_v47 = vpack.c.bf16 %v8696_v38, %v8695_v37 }
 0x205   : > { %11444 = vmatprep.subr.bf16.mxu0 %v11443_v48  ;;  %v8543_v48 = vld [vmem:[%s15679_s2 + $0x5d0] sm:$0xff]  ;;  %v11401_v52 = vpack.c.bf16 %v8526_v44, %v8525_v43  ;;  %v8680_v44 = vld [vmem:[%s15679_s2 + $0xa18] sm:$0xff]  ;;  %v8593_v37 = vld [vmem:[%s15679_s2 + $0x760] sm:$0xff] }
 0x206   : > { %v8594_v38 = vld [vmem:[%s15679_s2 + $0x768] sm:$0xff] }
 0x207   : > { %11350 = vmatpush3.bf16.msra.mxu1 %v11349_v53  ;;  %v11403_v53 = vpack.c.bf16 %v8544_v49, %v8543_v48  ;;  %v8697_v48 = vld [vmem:[%s15679_s2 + $0xaa0] sm:$0xff]  ;;  %v8698_v49 = vld [vmem:[%s15679_s2 + $0xaa8] sm:$0xff] }
 0x208   : > { %11446 = vmatpush3.bf16.msra.mxu0 %v11445_v19  ;;  %11384 = vmatprep.subr.bf16.mxu1 %v11383_v54  ;;  %v8527_v19 = vld [vmem:[%s15679_s2 + $0x550] sm:$0xff]  ;;  %v8528_v54 = vld [vmem:[%s15679_s2 + $0x558] sm:$0xff] }
 0x209   : > { %11480 = vmatprep.subr.bf16.mxu0 %v11479_v57  ;;  %v8624_v57 = vld [vmem:[%s15679_s2 + $0x858] sm:$0xff] }
 0x20a   : > { %1090 = vmatmul.mubr.f32.vlgmr.msra.gmra.mrb[4].mxu1 %v12982_v58  ;;  %v11501_v1 = vpack.c.bf16 %v8624_v57, %v8623_v55  ;;  %v8603_v55 = vld [vmem:[%s15679_s2 + $0x7b0] sm:$0xff] }
 0x20b   : > { %1399 = vmatmul.mubr.f32.vlgmr.msra.gmra.mrb[6].mxu0 %v12982_v58  ;;  %11386 = vmatpush3.bf16.msra.mxu1 %v11385_v0  ;;  %v11405_v0 = vpack.c.bf16 %v8528_v54, %v8527_v19  ;;  %v8681_v19 = vld [vmem:[%s15679_s2 + $0xa20] sm:$0xff]  ;;  %v8682_v54 = vld [vmem:[%s15679_s2 + $0xa28] sm:$0xff]  ;;  %v8699_v57 = vld [vmem:[%s15679_s2 + $0xab0] sm:$0xff] }
 0x20c   : > { %1295 = vmatprep.mubr.f32.mxu1 %v12984_v59  ;;  %11482 = vmatpush3.bf16.msra.mxu0 %v11481_v3  ;;  %v8529_v3 = vld [vmem:[%s15679_s2 + $0x560] sm:$0xff]  ;;  %v11553_v61 = vpack.c.bf16 %v8682_v54, %v8681_v19  ;;  %v8662_v19 = vld [vmem:[%s15679_s2 + $0x988] sm:$0xff] }
 0x20d   : > { %1604 = vmatprep.mubr.f32.mxu0 %v12984_v59  ;;  %11388 = vmatprep.subr.bf16.mxu1 %v11387_v7  ;;  %v8626_v7 = vld [vmem:[%s15679_s2 + $0x868] sm:$0xff]  ;;  %v11409_v12 = vpack.c.bf16 %v8530_v4, %v8529_v3  ;;  %v8684_v3 = vld [vmem:[%s15679_s2 + $0xa38] sm:$0xff]  ;;  %v8605_v4 = vld [vmem:[%s15679_s2 + $0x7c0] sm:$0xff] }
 0x20e   : > { %11484 = vmatprep.subr.bf16.mxu0 %v11483_v11  ;;  %v8644_v11 = vld [vmem:[%s15679_s2 + $0x8f8] sm:$0xff]  ;;  %v11505_v13 = vpack.c.bf16 %v8626_v7, %v8625_v5  ;;  %v8606_v5 = vld [vmem:[%s15679_s2 + $0x7c8] sm:$0xff] }
 0x20f   : > { %11390 = vmatpush3.bf16.msra.mxu1 %v11389_v14  ;;  %v11411_v14 = vpack.c.bf16 %v8548_v9, %v8547_v8  ;;  %v11507_v20 = vpack.c.bf16 %v8644_v11, %v8643_v10  ;;  %v8702_v7 = vld [vmem:[%s15679_s2 + $0xac8] sm:$0xff]  ;;  %v11463_v10 = vpack.c.bf16 %v8606_v5, %v8605_v4  ;;  %v8589_v11 = vld [vmem:[%s15679_s2 + $0x740] sm:$0xff]  ;;  %v8760_v4 = vld [vmem:[%s15679_s2 + $0xc98] sm:$0xff] }
 0x210   : > { %11486 = vmatpush3.bf16.msra.mxu0 %v11485_v15  ;;  %11392 = vmatprep.subr.bf16.mxu1 %v11391_v16  ;;  %v8531_v15 = vld [vmem:[%s15679_s2 + $0x570] sm:$0xff]  ;;  %v8532_v16 = vld [vmem:[%s15679_s2 + $0x578] sm:$0xff]  ;;  %v8758_v54 = vld [vmem:[%s15679_s2 + $0xc88] sm:$0xff] }
 0x211   : > { %11488 = vmatprep.subr.bf16.mxu0 %v11487_v22  ;;  %v8597_v22 = vld [vmem:[%s15679_s2 + $0x780] sm:$0xff]  ;;  %v11413_v26 = vpack.c.bf16 %v8532_v16, %v8531_v15  ;;  %v8686_v15 = vld [vmem:[%s15679_s2 + $0xa48] sm:$0xff]  ;;  %v8607_v16 = vld [vmem:[%s15679_s2 + $0x7d0] sm:$0xff] }
 0x212   : > { %v11467_v24 = vpack.c.bf16 %v8608_v17, %v8607_v16  ;;  %v8762_v16 = vld [vmem:[%s15679_s2 + $0xca8] sm:$0xff] }
 0x213   : > { %11394 = vmatpush3.bf16.msra.mxu1 %v11393_v28  ;;  %v11447_v28 = vpack.c.bf16 %v8598_v23, %v8597_v22 }
 0x214   : > { %11490 = vmatpush3.bf16.msra.mxu0 %v11489_v29  ;;  %11396 = vmatprep.subr.bf16.mxu1 %v11395_v30  ;;  %v8581_v29 = vld [vmem:[%s15679_s2 + $0x700] sm:$0xff]  ;;  %v8582_v30 = vld [vmem:[%s15679_s2 + $0x708] sm:$0xff] }
 0x215   : > { %11492 = vmatprep.subr.bf16.mxu0 %v11491_v34  ;;  %v8599_v34 = vld [vmem:[%s15679_s2 + $0x790] sm:$0xff]  ;;  %v11449_v36 = vpack.c.bf16 %v8582_v30, %v8581_v29  ;;  %v8688_v29 = vld [vmem:[%s15679_s2 + $0xa58] sm:$0xff]  ;;  %v8609_v30 = vld [vmem:[%s15679_s2 + $0x7e0] sm:$0xff] }
 0x216   : > { %v11451_v43 = vpack.c.bf16 %v8600_v35, %v8599_v34 }
 0x217   : > { %11398 = vmatpush3.bf16.msra.mxu1 %v11397_v40  ;;  %v8583_v40 = vld [vmem:[%s15679_s2 + $0x710] sm:$0xff] }
 0x218   : > { %11494 = vmatpush3.bf16.msra.mxu0 %v11493_v41  ;;  %11400 = vmatprep.subr.bf16.mxu1 %v11399_v42  ;;  %v8584_v41 = vld [vmem:[%s15679_s2 + $0x718] sm:$0xff]  ;;  %v8679_v42 = vld [vmem:[%s15679_s2 + $0xa10] sm:$0xff] }
 0x219   : > { %11496 = vmatprep.subr.bf16.mxu0 %v11495_v46  ;;  %v8602_v46 = vld [vmem:[%s15679_s2 + $0x7a8] sm:$0xff]  ;;  %v11453_v50 = vpack.c.bf16 %v8584_v41, %v8583_v40  ;;  %v11549_v51 = vpack.c.bf16 %v8680_v44, %v8679_v42  ;;  %v11567_v40 = vpack.c.bf16 %v8706_v33, %v8705_v32  ;;  %v8611_v42 = vld [vmem:[%s15679_s2 + $0x7f0] sm:$0xff] }
 0x21a   : > { %v8690_v41 = vld [vmem:[%s15679_s2 + $0xa68] sm:$0xff]  ;;  %v8707_v44 = vld [vmem:[%s15679_s2 + $0xaf0] sm:$0xff] }
 0x21b   : > { %11402 = vmatpush3.bf16.msra.mxu1 %v11401_v52  ;;  %v11455_v52 = vpack.c.bf16 %v8602_v46, %v8601_v45  ;;  %v8708_v45 = vld [vmem:[%s15679_s2 + $0xaf8] sm:$0xff]  ;;  %v11473_v46 = vpack.c.bf16 %v8594_v38, %v8593_v37  ;;  %v8747_v37 = vld [vmem:[%s15679_s2 + $0xc30] sm:$0xff] }
 0x21c   : > { %11498 = vmatpush3.bf16.msra.mxu0 %v11497_v18  ;;  %11404 = vmatprep.subr.bf16.mxu1 %v11403_v53  ;;  %v8585_v18 = vld [vmem:[%s15679_s2 + $0x720] sm:$0xff]  ;;  %v8586_v53 = vld [vmem:[%s15679_s2 + $0x728] sm:$0xff] }
 0x21d   : > { %11500 = vmatprep.subr.bf16.mxu0 %v11499_v56  ;;  %v8604_v56 = vld [vmem:[%s15679_s2 + $0x7b8] sm:$0xff]  ;;  %v11457_v60 = vpack.c.bf16 %v8586_v53, %v8585_v18  ;;  %v8661_v53 = vld [vmem:[%s15679_s2 + $0x980] sm:$0xff] }
 0x21e   : > { %v11459_v62 = vpack.c.bf16 %v8604_v56, %v8603_v55  ;;  %v8692_v18 = vld [vmem:[%s15679_s2 + $0xa78] sm:$0xff] }
 0x21f   : > { %11406 = vmatpush3.bf16.msra.mxu1 %v11405_v0  ;;  %v8588_v0 = vld [vmem:[%s15679_s2 + $0x738] sm:$0xff] }
 0x220   : > { %11502 = vmatpush3.bf16.msra.mxu0 %v11501_v1  ;;  %11408 = vmatprep.subr.bf16.mxu1 %v11407_v2  ;;  %v8683_v1 = vld [vmem:[%s15679_s2 + $0xa30] sm:$0xff]  ;;  %v11461_v8 = vpack.c.bf16 %v8588_v0, %v8587_v63  ;;  %v8742_v63 = vld [vmem:[%s15679_s2 + $0xc08] sm:$0xff] }
 0x221   : > { %11504 = vmatprep.subr.bf16.mxu0 %v11503_v6  ;;  %v8701_v6 = vld [vmem:[%s15679_s2 + $0xac0] sm:$0xff]  ;;  %v11557_v9 = vpack.c.bf16 %v8684_v3, %v8683_v1  ;;  %v8663_v0 = vld [vmem:[%s15679_s2 + $0x990] sm:$0xff]  ;;  %v8664_v1 = vld [vmem:[%s15679_s2 + $0x998] sm:$0xff] }
 0x222   : > { %v8759_v3 = vld [vmem:[%s15679_s2 + $0xc90] sm:$0xff] }
 0x223   : > { %11410 = vmatpush3.bf16.msra.mxu1 %v11409_v12  ;;  %v8590_v12 = vld [vmem:[%s15679_s2 + $0x748] sm:$0xff] }
 0x224   : > { %11506 = vmatpush3.bf16.msra.mxu0 %v11505_v13  ;;  %11412 = vmatprep.subr.bf16.mxu1 %v11411_v14  ;;  %v8685_v13 = vld [vmem:[%s15679_s2 + $0xa40] sm:$0xff]  ;;  %v11559_v14 = vpack.c.bf16 %v8702_v7, %v8701_v6  ;;  %v11465_v22 = vpack.c.bf16 %v8590_v12, %v8589_v11  ;;  %v8647_v6 = vld [vmem:[%s15679_s2 + $0x910] sm:$0xff]  ;;  %v8648_v7 = vld [vmem:[%s15679_s2 + $0x918] sm:$0xff] }
 0x225   : > { %11508 = vmatprep.subr.bf16.mxu0 %v11507_v20  ;;  %v8703_v20 = vld [vmem:[%s15679_s2 + $0xad0] sm:$0xff]  ;;  %v11561_v23 = vpack.c.bf16 %v8686_v15, %v8685_v13  ;;  %v8665_v11 = vld [vmem:[%s15679_s2 + $0x9a0] sm:$0xff]  ;;  %v8666_v12 = vld [vmem:[%s15679_s2 + $0x9a8] sm:$0xff]  ;;  %v11517_v17 = vpack.c.bf16 %v8648_v7, %v8647_v6 }
 0x226   : > { %v13799_v13 = vld [vmem:[%s13014_s30] sm:$0xff]  ;;  %v8658_v6 = vld [vmem:[%s15679_s2 + $0x968] sm:$0xff] }
 0x227   : > { %11414 = vmatpush3.bf16.msra.mxu1 %v11413_v26  ;;  %v8592_v26 = vld [vmem:[%s15679_s2 + $0x758] sm:$0xff]  ;;  %v8761_v15 = vld [vmem:[%s15679_s2 + $0xca0] sm:$0xff] }
 0x228   : > { %11510 = vmatpush3.bf16.msra.mxu0 %v11509_v27  ;;  %11448 = vmatprep.subr.bf16.mxu1 %v11447_v28  ;;  %v8687_v27 = vld [vmem:[%s15679_s2 + $0xa50] sm:$0xff]  ;;  %v11563_v28 = vpack.c.bf16 %v8704_v21, %v8703_v20  ;;  %v11469_v34 = vpack.c.bf16 %v8592_v26, %v8591_v25  ;;  %v13810_v20 = vld [vmem:[%s13014_s30 + $0x8] sm:$0xff]  ;;  %v8745_v25 = vld [vmem:[%s15679_s2 + $0xc20] sm:$0xff]  ;;  %v11615_v26 = vpack.c.bf16 %v8762_v16, %v8761_v15 }
 0x229   : > { %11544 = vmatprep.subr.bf16.mxu0 %v11543_v31  ;;  %v8610_v31 = vld [vmem:[%s15679_s2 + $0x7e8] sm:$0xff]  ;;  %v11565_v35 = vpack.c.bf16 %v8688_v29, %v8687_v27  ;;  %v8668_v29 = vld [vmem:[%s15679_s2 + $0x9b8] sm:$0xff]  ;;  %v8753_v7 = vld [vmem:[%s15679_s2 + $0xc60] sm:$0xff] }
 0x22a   : > { %1296 = vmatmul.mubr.f32.vlgmr.msra.gmra.mrb[6].mxu1 %v12982_v58  ;;  %v8746_v27 = vld [vmem:[%s15679_s2 + $0xc28] sm:$0xff] }
 0x22b   : > { %1605 = vmatmul.mubr.f32.vlgmr.msra.gmra.mrb[8].mxu0 %v12982_v58  ;;  %11450 = vmatpush3.bf16.msra.mxu1 %v11449_v36  ;;  %v11551_v58 = vpack.c.bf16 %v8698_v49, %v8697_v48  ;;  %v11471_v36 = vpack.c.bf16 %v8610_v31, %v8609_v30  ;;  %v8595_v49 = vld [vmem:[%s15679_s2 + $0x770] sm:$0xff]  ;;  %v8764_v31 = vld [vmem:[%s15679_s2 + $0xcb8] sm:$0xff]  ;;  %v11617_v33 = vpack.c.bf16 %v8746_v27, %v8745_v25  ;;  %v8726_v27 = vld [vmem:[%s15679_s2 + $0xb88] sm:$0xff] }
 0x22c   : > { %1501 = vmatprep.mubr.f32.mxu1 %v12984_v59  ;;  %11546 = vmatpush3.bf16.msra.mxu0 %v11545_v39  ;;  %v8689_v39 = vld [vmem:[%s15679_s2 + $0xa60] sm:$0xff]  ;;  %v8763_v30 = vld [vmem:[%s15679_s2 + $0xcb0] sm:$0xff]  ;;  %v8756_v25 = vld [vmem:[%s15679_s2 + $0xc78] sm:$0xff] }
 0x22d   : > { %1810 = vmatprep.mubr.f32.mxu0 %v12984_v59  ;;  %11452 = vmatprep.subr.bf16.mxu1 %v11451_v43  ;;  %v8700_v59 = vld [vmem:[%s15679_s2 + $0xab8] sm:$0xff]  ;;  %v11619_v38 = vpack.c.bf16 %v8764_v31, %v8763_v30 }
 0x22e   : > { %11548 = vmatprep.subr.bf16.mxu0 %v11547_v47  ;;  %v11555_v2 = vpack.c.bf16 %v8700_v59, %v8699_v57  ;;  %v8612_v43 = vld [vmem:[%s15679_s2 + $0x7f8] sm:$0xff]  ;;  %v11569_v47 = vpack.c.bf16 %v8690_v41, %v8689_v39  ;;  %v11511_v57 = vpack.c.bf16 %v8662_v19, %v8661_v53  ;;  %v8645_v59 = vld [vmem:[%s15679_s2 + $0x900] sm:$0xff]  ;;  %v8670_v41 = vld [vmem:[%s15679_s2 + $0x9c8] sm:$0xff] }
 0x22f   : > { %11454 = vmatpush3.bf16.msra.mxu1 %v11453_v50  ;;  %v11475_v48 = vpack.c.bf16 %v8612_v43, %v8611_v42  ;;  %v8596_v50 = vld [vmem:[%s15679_s2 + $0x778] sm:$0xff]  ;;  %v8765_v42 = vld [vmem:[%s15679_s2 + $0xcc0] sm:$0xff]  ;;  %v8766_v43 = vld [vmem:[%s15679_s2 + $0xcc8] sm:$0xff] }
 0x230   : > { %11550 = vmatpush3.bf16.msra.mxu0 %v11549_v51  ;;  %11456 = vmatprep.subr.bf16.mxu1 %v11455_v52  ;;  %v8691_v51 = vld [vmem:[%s15679_s2 + $0xa70] sm:$0xff]  ;;  %v11571_v52 = vpack.c.bf16 %v8708_v45, %v8707_v44  ;;  %v11477_v55 = vpack.c.bf16 %v8596_v50, %v8595_v49  ;;  %v8748_v39 = vld [vmem:[%s15679_s2 + $0xc38] sm:$0xff]  ;;  %v8749_v49 = vld [vmem:[%s15679_s2 + $0xc40] sm:$0xff]  ;;  %v11623_v50 = vpack.c.bf16 %v8766_v43, %v8765_v42 }
 0x231   : > { %11552 = vmatprep.subr.bf16.mxu0 %v11551_v58  ;;  %v8757_v58 = vld [vmem:[%s15679_s2 + $0xc80] sm:$0xff]  ;;  %v11573_v56 = vpack.c.bf16 %v8692_v18, %v8691_v51  ;;  %v11621_v45 = vpack.c.bf16 %v8748_v39, %v8747_v37  ;;  %v8750_v51 = vld [vmem:[%s15679_s2 + $0xc48] sm:$0xff]  ;;  %v8672_v18 = vld [vmem:[%s15679_s2 + $0x9d8] sm:$0xff] }
 0x232   : > { %v8767_v53 = vld [vmem:[%s15679_s2 + $0xcd0] sm:$0xff]  ;;  %v8768_v19 = vld [vmem:[%s15679_s2 + $0xcd8] sm:$0xff]  ;;  %v8806_v37 = vld [vmem:[%s15679_s2 + $0xe08] sm:$0xff] }
 0x233   : > { %11458 = vmatpush3.bf16.msra.mxu1 %v11457_v60  ;;  %v8646_v60 = vld [vmem:[%s15679_s2 + $0x908] sm:$0xff]  ;;  %v8728_v39 = vld [vmem:[%s15679_s2 + $0xb98] sm:$0xff] }
 0x234   : > { %11554 = vmatpush3.bf16.msra.mxu0 %v11553_v61  ;;  %11460 = vmatprep.subr.bf16.mxu1 %v11459_v62  ;;  %v11607_v61 = vpack.c.bf16 %v8758_v54, %v8757_v58  ;;  %v8741_v62 = vld [vmem:[%s15679_s2 + $0xc00] sm:$0xff]  ;;  %v11625_v54 = vpack.c.bf16 %v8750_v51, %v8749_v49  ;;  %v8824_v42 = vld [vmem:[%s15679_s2 + $0xe98] sm:$0xff] }
 0x235   : > { %11556 = vmatprep.subr.bf16.mxu0 %v11555_v2  ;;  %v11513_v2 = vpack.c.bf16 %v8646_v60, %v8645_v59  ;;  %v11609_v5 = vpack.c.bf16 %v8742_v63, %v8741_v62  ;;  %v8751_v59 = vld [vmem:[%s15679_s2 + $0xc50] sm:$0xff]  ;;  %v11627_v60 = vpack.c.bf16 %v8768_v19, %v8767_v53  ;;  %v8673_v62 = vld [vmem:[%s15679_s2 + $0x9e0] sm:$0xff]  ;;  %v8674_v63 = vld [vmem:[%s15679_s2 + $0x9e8] sm:$0xff] }
 0x236   : > { %v8729_v49 = vld [vmem:[%s15679_s2 + $0xba0] sm:$0xff] }
 0x237   : > { %11462 = vmatpush3.bf16.msra.mxu1 %v11461_v8  ;;  %v8743_v8 = vld [vmem:[%s15679_s2 + $0xc10] sm:$0xff] }
 0x238   : > { %11558 = vmatpush3.bf16.msra.mxu0 %v11557_v9  ;;  %11464 = vmatprep.subr.bf16.mxu1 %v11463_v10  ;;  %v11515_v9 = vpack.c.bf16 %v8664_v1, %v8663_v0  ;;  %v8744_v10 = vld [vmem:[%s15679_s2 + $0xc18] sm:$0xff]  ;;  %v8769_v0 = vld [vmem:[%s15679_s2 + $0xce0] sm:$0xff]  ;;  %v8770_v1 = vld [vmem:[%s15679_s2 + $0xce8] sm:$0xff] }
 0x239   : > { %11560 = vmatprep.subr.bf16.mxu0 %v11559_v14  ;;  %v11611_v14 = vpack.c.bf16 %v8760_v4, %v8759_v3  ;;  %v11613_v21 = vpack.c.bf16 %v8744_v10, %v8743_v8  ;;  %v11535_v4 = vpack.c.bf16 %v8674_v63, %v8673_v62  ;;  %v11631_v8 = vpack.c.bf16 %v8770_v1, %v8769_v0  ;;  %v8675_v10 = vld [vmem:[%s15679_s2 + $0x9f0] sm:$0xff]  ;;  %v8828_v63 = vld [vmem:[%s15679_s2 + $0xeb8] sm:$0xff] }
 0x23a   : > { %v8827_v62 = vld [vmem:[%s15679_s2 + $0xeb0] sm:$0xff] }
 0x23b   : > { %11466 = vmatpush3.bf16.msra.mxu1 %v11465_v22  ;;  %v11519_v22 = vpack.c.bf16 %v8666_v12, %v8665_v11  ;;  %v8676_v11 = vld [vmem:[%s15679_s2 + $0x9f8] sm:$0xff]  ;;  %v8771_v12 = vld [vmem:[%s15679_s2 + $0xcf0] sm:$0xff] }
 0x23c   : > { %11562 = vmatpush3.bf16.msra.mxu0 %v11561_v23  ;;  %11468 = vmatprep.subr.bf16.mxu1 %v11467_v24  ;;  %v8649_v23 = vld [vmem:[%s15679_s2 + $0x920] sm:$0xff]  ;;  %v8650_v24 = vld [vmem:[%s15679_s2 + $0x928] sm:$0xff] }
 0x23d   : > { %11564 = vmatprep.subr.bf16.mxu0 %v11563_v28  ;;  %v8667_v28 = vld [vmem:[%s15679_s2 + $0x9b0] sm:$0xff]  ;;  %v11521_v32 = vpack.c.bf16 %v8650_v24, %v8649_v23 }
 0x23e   : > { %v8755_v23 = vld [vmem:[%s15679_s2 + $0xc70] sm:$0xff] }
 0x23f   : > { %11470 = vmatpush3.bf16.msra.mxu1 %v11469_v34  ;;  %v11523_v34 = vpack.c.bf16 %v8668_v29, %v8667_v28  ;;  %v8821_v28 = vld [vmem:[%s15679_s2 + $0xe80] sm:$0xff]  ;;  %v8822_v29 = vld [vmem:[%s15679_s2 + $0xe88] sm:$0xff]  ;;  %v11637_v31 = vpack.c.bf16 %v8756_v25, %v8755_v23  ;;  %v8736_v25 = vld [vmem:[%s15679_s2 + $0xbd8] sm:$0xff] }
 0x240   : > { %11566 = vmatpush3.bf16.msra.mxu0 %v11565_v35  ;;  %11472 = vmatprep.subr.bf16.mxu1 %v11471_v36  ;;  %v8651_v35 = vld [vmem:[%s15679_s2 + $0x930] sm:$0xff]  ;;  %v8652_v36 = vld [vmem:[%s15679_s2 + $0x938] sm:$0xff]  ;;  %v8814_v23 = vld [vmem:[%s15679_s2 + $0xe48] sm:$0xff] }
 0x241   : > { %11568 = vmatprep.subr.bf16.mxu0 %v11567_v40  ;;  %v8669_v40 = vld [vmem:[%s15679_s2 + $0x9c0] sm:$0xff]  ;;  %v11525_v44 = vpack.c.bf16 %v8652_v36, %v8651_v35  ;;  %v11671_v35 = vpack.c.bf16 %v8822_v29, %v8821_v28 }
 0x242   : > { %v8805_v36 = vld [vmem:[%s15679_s2 + $0xe00] sm:$0xff] }
 0x243   : > { %11474 = vmatpush3.bf16.msra.mxu1 %v11473_v46  ;;  %v11527_v46 = vpack.c.bf16 %v8670_v41, %v8669_v40  ;;  %v8823_v41 = vld [vmem:[%s15679_s2 + $0xe90] sm:$0xff]  ;;  %v11673_v43 = vpack.c.bf16 %v8806_v37, %v8805_v36  ;;  %v8737_v36 = vld [vmem:[%s15679_s2 + $0xbe0] sm:$0xff]  ;;  %v8738_v37 = vld [vmem:[%s15679_s2 + $0xbe8] sm:$0xff] }
 0x244   : > { %11570 = vmatpush3.bf16.msra.mxu0 %v11569_v47  ;;  %11476 = vmatprep.subr.bf16.mxu1 %v11475_v48  ;;  %v8653_v47 = vld [vmem:[%s15679_s2 + $0x940] sm:$0xff]  ;;  %v8654_v48 = vld [vmem:[%s15679_s2 + $0x948] sm:$0xff]  ;;  %v11675_v51 = vpack.c.bf16 %v8824_v42, %v8823_v41  ;;  %v11599_v42 = vpack.c.bf16 %v8738_v37, %v8737_v36 }
 0x245   : > { %11572 = vmatprep.subr.bf16.mxu0 %v11571_v52  ;;  %v8671_v52 = vld [vmem:[%s15679_s2 + $0x9d0] sm:$0xff]  ;;  %v11529_v58 = vpack.c.bf16 %v8654_v48, %v8653_v47  ;;  %v8808_v48 = vld [vmem:[%s15679_s2 + $0xe18] sm:$0xff]  ;;  %v8802_v36 = vld [vmem:[%s15679_s2 + $0xde8] sm:$0xff] }
 0x247   : > { %11478 = vmatpush3.bf16.msra.mxu1 %v11477_v55  ;;  %v11531_v55 = vpack.c.bf16 %v8672_v18, %v8671_v52  ;;  %v8825_v52 = vld [vmem:[%s15679_s2 + $0xea0] sm:$0xff]  ;;  %v8826_v18 = vld [vmem:[%s15679_s2 + $0xea8] sm:$0xff] }
 0x248   : > { %11574 = vmatpush3.bf16.msra.mxu0 %v11573_v56  ;;  %11512 = vmatprep.subr.bf16.mxu1 %v11511_v57  ;;  %v8655_v56 = vld [vmem:[%s15679_s2 + $0x950] sm:$0xff]  ;;  %v8656_v57 = vld [vmem:[%s15679_s2 + $0x958] sm:$0xff] }
 0x249   : > { %11608 = vmatprep.subr.bf16.mxu0 %v11607_v61  ;;  %v8752_v61 = vld [vmem:[%s15679_s2 + $0xc58] sm:$0xff] }
 0x24a   : > { %1502 = vmatmul.mubr.f32.vlgmr.msra.gmra.mrb[8].mxu1 %v13799_v13  ;;  %v11629_v3 = vpack.c.bf16 %v8752_v61, %v8751_v59  ;;  %v8810_v59 = vld [vmem:[%s15679_s2 + $0xe28] sm:$0xff]  ;;  %v8732_v61 = vld [vmem:[%s15679_s2 + $0xbb8] sm:$0xff] }
 0x24b   : > { %1811 = vmatmul.mubr.f32.vlgmr.msra.gmra.mrb[10].mxu0 %v13799_v13  ;;  %11514 = vmatpush3.bf16.msra.mxu1 %v11513_v2  ;;  %v11533_v2 = vpack.c.bf16 %v8656_v57, %v8655_v56  ;;  %v8809_v56 = vld [vmem:[%s15679_s2 + $0xe20] sm:$0xff]  ;;  %v11679_v57 = vpack.c.bf16 %v8826_v18, %v8825_v52 }
 0x24c   : > { %1707 = vmatprep.mubr.f32.mxu1 %v13810_v20  ;;  %11610 = vmatpush3.bf16.msra.mxu0 %v11609_v5  ;;  %v8657_v5 = vld [vmem:[%s15679_s2 + $0x960] sm:$0xff]  ;;  %v11681_v1 = vpack.c.bf16 %v8810_v59, %v8809_v56  ;;  %v8820_v56 = vld [vmem:[%s15679_s2 + $0xe78] sm:$0xff]  ;;  %v8790_v59 = vld [vmem:[%s15679_s2 + $0xd88] sm:$0xff] }
 0x24d   : > { %2016 = vmatprep.mubr.f32.mxu0 %v13810_v20  ;;  %11516 = vmatprep.subr.bf16.mxu1 %v11515_v9  ;;  %v8754_v9 = vld [vmem:[%s15679_s2 + $0xc68] sm:$0xff]  ;;  %v11537_v15 = vpack.c.bf16 %v8658_v6, %v8657_v5  ;;  %v8811_v5 = vld [vmem:[%s15679_s2 + $0xe30] sm:$0xff]  ;;  %v11683_v6 = vpack.c.bf16 %v8828_v63, %v8827_v62  ;;  %v8773_v63 = vld [vmem:[%s15679_s2 + $0xd00] sm:$0xff] }
 0x24e   : > { %11612 = vmatprep.subr.bf16.mxu0 %v11611_v14  ;;  %v8772_v14 = vld [vmem:[%s15679_s2 + $0xcf8] sm:$0xff]  ;;  %v11633_v16 = vpack.c.bf16 %v8754_v9, %v8753_v7  ;;  %v8734_v9 = vld [vmem:[%s15679_s2 + $0xbc8] sm:$0xff] }
 0x24f   : > { %11518 = vmatpush3.bf16.msra.mxu1 %v11517_v17  ;;  %v11539_v17 = vpack.c.bf16 %v8676_v11, %v8675_v10  ;;  %v11635_v24 = vpack.c.bf16 %v8772_v14, %v8771_v12  ;;  %v8812_v7 = vld [vmem:[%s15679_s2 + $0xe38] sm:$0xff]  ;;  %v8829_v10 = vld [vmem:[%s15679_s2 + $0xec0] sm:$0xff]  ;;  %v8830_v11 = vld [vmem:[%s15679_s2 + $0xec8] sm:$0xff] }
 0x250   : > { %11614 = vmatpush3.bf16.msra.mxu0 %v11613_v21  ;;  %11520 = vmatprep.subr.bf16.mxu1 %v11519_v22  ;;  %v8659_v21 = vld [vmem:[%s15679_s2 + $0x970] sm:$0xff]  ;;  %v8660_v22 = vld [vmem:[%s15679_s2 + $0x978] sm:$0xff]  ;;  %v11685_v14 = vpack.c.bf16 %v8812_v7, %v8811_v5  ;;  %v8793_v7 = vld [vmem:[%s15679_s2 + $0xda0] sm:$0xff] }
 0x251   : > { %11616 = vmatprep.subr.bf16.mxu0 %v11615_v26  ;;  %v8725_v26 = vld [vmem:[%s15679_s2 + $0xb80] sm:$0xff]  ;;  %v11541_v30 = vpack.c.bf16 %v8660_v22, %v8659_v21  ;;  %v11687_v22 = vpack.c.bf16 %v8830_v11, %v8829_v10  ;;  %v8775_v5 = vld [vmem:[%s15679_s2 + $0xd10] sm:$0xff] }
 0x252   : > { %v8813_v21 = vld [vmem:[%s15679_s2 + $0xe40] sm:$0xff] }
 0x253   : > { %11522 = vmatpush3.bf16.msra.mxu1 %v11521_v32  ;;  %v11575_v32 = vpack.c.bf16 %v8726_v27, %v8725_v26  ;;  %v8831_v26 = vld [vmem:[%s15679_s2 + $0xed0] sm:$0xff]  ;;  %v8832_v27 = vld [vmem:[%s15679_s2 + $0xed8] sm:$0xff]  ;;  %v11689_v29 = vpack.c.bf16 %v8814_v23, %v8813_v21  ;;  %v8777_v11 = vld [vmem:[%s15679_s2 + $0xd20] sm:$0xff] }
 0x254   : > { %11618 = vmatpush3.bf16.msra.mxu0 %v11617_v33  ;;  %11524 = vmatprep.subr.bf16.mxu1 %v11523_v34  ;;  %v8709_v33 = vld [vmem:[%s15679_s2 + $0xb00] sm:$0xff]  ;;  %v8710_v34 = vld [vmem:[%s15679_s2 + $0xb08] sm:$0xff]  ;;  %v8779_v21 = vld [vmem:[%s15679_s2 + $0xd30] sm:$0xff] }
 0x255   : > { %11620 = vmatprep.subr.bf16.mxu0 %v11619_v38  ;;  %v8727_v38 = vld [vmem:[%s15679_s2 + $0xb90] sm:$0xff]  ;;  %v11577_v40 = vpack.c.bf16 %v8710_v34, %v8709_v33  ;;  %v11691_v34 = vpack.c.bf16 %v8832_v27, %v8831_v26  ;;  %v8797_v23 = vld [vmem:[%s15679_s2 + $0xdc0] sm:$0xff] }
 0x256   : > { %v11579_v47 = vpack.c.bf16 %v8728_v39, %v8727_v38  ;;  %v8815_v33 = vld [vmem:[%s15679_s2 + $0xe50] sm:$0xff]  ;;  %v8833_v38 = vld [vmem:[%s15679_s2 + $0xee0] sm:$0xff]  ;;  %v8834_v39 = vld [vmem:[%s15679_s2 + $0xee8] sm:$0xff] }
 0x257   : > { %11526 = vmatpush3.bf16.msra.mxu1 %v11525_v44  ;;  %v8711_v44 = vld [vmem:[%s15679_s2 + $0xb10] sm:$0xff]  ;;  %v8781_v27 = vld [vmem:[%s15679_s2 + $0xd40] sm:$0xff] }
 0x258   : > { %11622 = vmatpush3.bf16.msra.mxu0 %v11621_v45  ;;  %11528 = vmatprep.subr.bf16.mxu1 %v11527_v46  ;;  %v8712_v45 = vld [vmem:[%s15679_s2 + $0xb18] sm:$0xff]  ;;  %v8807_v46 = vld [vmem:[%s15679_s2 + $0xe10] sm:$0xff] }
 0x259   : > { %11624 = vmatprep.subr.bf16.mxu0 %v11623_v50  ;;  %v8730_v50 = vld [vmem:[%s15679_s2 + $0xba8] sm:$0xff]  ;;  %v11581_v53 = vpack.c.bf16 %v8712_v45, %v8711_v44  ;;  %v11677_v19 = vpack.c.bf16 %v8808_v48, %v8807_v46  ;;  %v8817_v45 = vld [vmem:[%s15679_s2 + $0xe60] sm:$0xff]  ;;  %v11695_v46 = vpack.c.bf16 %v8834_v39, %v8833_v38  ;;  %v8739_v48 = vld [vmem:[%s15679_s2 + $0xbf0] sm:$0xff] }
 0x25a   : > { %v8722_v44 = vld [vmem:[%s15679_s2 + $0xb68] sm:$0xff]  ;;  %v8785_v39 = vld [vmem:[%s15679_s2 + $0xd60] sm:$0xff] }
 0x25b   : > { %11530 = vmatpush3.bf16.msra.mxu1 %v11529_v58  ;;  %v11583_v58 = vpack.c.bf16 %v8730_v50, %v8729_v49  ;;  %v8740_v49 = vld [vmem:[%s15679_s2 + $0xbf8] sm:$0xff]  ;;  %v8835_v50 = vld [vmem:[%s15679_s2 + $0xef0] sm:$0xff] }
 0x25c   : > { %11626 = vmatpush3.bf16.msra.mxu0 %v11625_v54  ;;  %11532 = vmatprep.subr.bf16.mxu1 %v11531_v55  ;;  %v8713_v54 = vld [vmem:[%s15679_s2 + $0xb20] sm:$0xff]  ;;  %v8714_v55 = vld [vmem:[%s15679_s2 + $0xb28] sm:$0xff] }
 0x25d   : > { %11628 = vmatprep.subr.bf16.mxu0 %v11627_v60  ;;  %v8731_v60 = vld [vmem:[%s15679_s2 + $0xbb0] sm:$0xff]  ;;  %v11585_v0 = vpack.c.bf16 %v8714_v55, %v8713_v54 }
 0x25e   : > { %v8819_v54 = vld [vmem:[%s15679_s2 + $0xe70] sm:$0xff] }
 0x25f   : > { %11534 = vmatpush3.bf16.msra.mxu1 %v11533_v2  ;;  %v11587_v2 = vpack.c.bf16 %v8732_v61, %v8731_v60  ;;  %v11701_v61 = vpack.c.bf16 %v8820_v56, %v8819_v54  ;;  %v8837_v54 = vld [vmem:[%s15679_s2 + $0xf00] sm:$0xff]  ;;  %v8855_v56 = vld [vmem:[%s15679_s2 + $0xf90] sm:$0xff] }
 0x260   : > { %11630 = vmatpush3.bf16.msra.mxu0 %v11629_v3  ;;  %11536 = vmatprep.subr.bf16.mxu1 %v11535_v4  ;;  %v8715_v3 = vld [vmem:[%s15679_s2 + $0xb30] sm:$0xff]  ;;  %v8716_v4 = vld [vmem:[%s15679_s2 + $0xb38] sm:$0xff] }
 0x261   : > { %11632 = vmatprep.subr.bf16.mxu0 %v11631_v8  ;;  %v8733_v8 = vld [vmem:[%s15679_s2 + $0xbc0] sm:$0xff]  ;;  %v11589_v12 = vpack.c.bf16 %v8716_v4, %v8715_v3 }
 0x263   : > { %11538 = vmatpush3.bf16.msra.mxu1 %v11537_v15  ;;  %v11591_v15 = vpack.c.bf16 %v8734_v9, %v8733_v8  ;;  %v8794_v8 = vld [vmem:[%s15679_s2 + $0xda8] sm:$0xff] }
 0x264   : > { %11634 = vmatpush3.bf16.msra.mxu0 %v11633_v16  ;;  %11540 = vmatprep.subr.bf16.mxu1 %v11539_v17  ;;  %v8717_v16 = vld [vmem:[%s15679_s2 + $0xb40] sm:$0xff]  ;;  %v8718_v17 = vld [vmem:[%s15679_s2 + $0xb48] sm:$0xff]  ;;  %v11647_v10 = vpack.c.bf16 %v8794_v8, %v8793_v7  ;;  %v8843_v8 = vld [vmem:[%s15679_s2 + $0xf30] sm:$0xff] }
 0x265   : > { %11636 = vmatprep.subr.bf16.mxu0 %v11635_v24  ;;  %v8735_v24 = vld [vmem:[%s15679_s2 + $0xbd0] sm:$0xff]  ;;  %v11593_v28 = vpack.c.bf16 %v8718_v17, %v8717_v16 }
 0x267   : > { %11542 = vmatpush3.bf16.msra.mxu1 %v11541_v30  ;;  %v11595_v30 = vpack.c.bf16 %v8736_v25, %v8735_v24  ;;  %v8798_v24 = vld [vmem:[%s15679_s2 + $0xdc8] sm:$0xff] }
 0x268   : > { %11638 = vmatpush3.bf16.msra.mxu0 %v11637_v31  ;;  %11576 = vmatprep.subr.bf16.mxu1 %v11575_v32  ;;  %v8719_v31 = vld [vmem:[%s15679_s2 + $0xb50] sm:$0xff]  ;;  %v8720_v32 = vld [vmem:[%s15679_s2 + $0xb58] sm:$0xff]  ;;  %v11655_v26 = vpack.c.bf16 %v8798_v24, %v8797_v23 }
 0x269   : > { %11672 = vmatprep.subr.bf16.mxu0 %v11671_v35  ;;  %v8816_v35 = vld [vmem:[%s15679_s2 + $0xe58] sm:$0xff]  ;;  %v8847_v24 = vld [vmem:[%s15679_s2 + $0xf50] sm:$0xff] }
 0x26a   : > { %1708 = vmatmul.mubr.f32.vlgmr.msra.gmra.mrb[10].mxu1 %v13799_v13  ;;  %v11693_v41 = vpack.c.bf16 %v8816_v35, %v8815_v33  ;;  %v8783_v33 = vld [vmem:[%s15679_s2 + $0xd50] sm:$0xff]  ;;  %v8801_v35 = vld [vmem:[%s15679_s2 + $0xde0] sm:$0xff] }
 0x26b   : > { %2017 = vmatmul.mubr.f32.vlgmr.msra.gmra.mrb[12].mxu0 %v13799_v13  ;;  %11578 = vmatpush3.bf16.msra.mxu1 %v11577_v40  ;;  %v11597_v40 = vpack.c.bf16 %v8720_v32, %v8719_v31  ;;  %v11663_v38 = vpack.c.bf16 %v8802_v36, %v8801_v35  ;;  %v8868_v35 = vld [vmem:[%s15679_s2 + $0xff8] sm:$0xff] }
 0x26c   : > { %1913 = vmatprep.mubr.f32.mxu1 %v13810_v20  ;;  %11674 = vmatpush3.bf16.msra.mxu0 %v11673_v43  ;;  %v8721_v43 = vld [vmem:[%s15679_s2 + $0xb60] sm:$0xff] }
 0x26d   : > { %2222 = vmatprep.mubr.f32.mxu0 %v13810_v20  ;;  %11580 = vmatprep.subr.bf16.mxu1 %v11579_v47  ;;  %v8818_v47 = vld [vmem:[%s15679_s2 + $0xe68] sm:$0xff]  ;;  %v11601_v52 = vpack.c.bf16 %v8722_v44, %v8721_v43  ;;  %v8803_v43 = vld [vmem:[%s15679_s2 + $0xdf0] sm:$0xff]  ;;  %v8804_v44 = vld [vmem:[%s15679_s2 + $0xdf8] sm:$0xff] }
 0x26e   : > { %11676 = vmatprep.subr.bf16.mxu0 %v11675_v51  ;;  %v8836_v51 = vld [vmem:[%s15679_s2 + $0xef8] sm:$0xff]  ;;  %v11697_v18 = vpack.c.bf16 %v8818_v47, %v8817_v45 }
 0x26f   : > { %11582 = vmatpush3.bf16.msra.mxu1 %v11581_v53  ;;  %v11603_v53 = vpack.c.bf16 %v8740_v49, %v8739_v48  ;;  %v11699_v55 = vpack.c.bf16 %v8836_v51, %v8835_v50  ;;  %v11667_v50 = vpack.c.bf16 %v8804_v44, %v8803_v43  ;;  %v8787_v51 = vld [vmem:[%s15679_s2 + $0xd70] sm:$0xff]  ;;  %v8852_v43 = vld [vmem:[%s15679_s2 + $0xf78] sm:$0xff] }
 0x270   : > { %11678 = vmatpush3.bf16.msra.mxu0 %v11677_v19  ;;  %11584 = vmatprep.subr.bf16.mxu1 %v11583_v58  ;;  %v8723_v19 = vld [vmem:[%s15679_s2 + $0xb70] sm:$0xff]  ;;  %v8724_v58 = vld [vmem:[%s15679_s2 + $0xb78] sm:$0xff] }
 0x271   : > { %11680 = vmatprep.subr.bf16.mxu0 %v11679_v57  ;;  %v8789_v57 = vld [vmem:[%s15679_s2 + $0xd80] sm:$0xff]  ;;  %v11605_v60 = vpack.c.bf16 %v8724_v58, %v8723_v19 }
 0x272   : > { %v11639_v62 = vpack.c.bf16 %v8790_v59, %v8789_v57  ;;  %v8856_v57 = vld [vmem:[%s15679_s2 + $0xf98] sm:$0xff] }
 0x273   : > { %11586 = vmatpush3.bf16.msra.mxu1 %v11585_v0  ;;  %v8774_v0 = vld [vmem:[%s15679_s2 + $0xd08] sm:$0xff] }
 0x274   : > { %11682 = vmatpush3.bf16.msra.mxu0 %v11681_v1  ;;  %11588 = vmatprep.subr.bf16.mxu1 %v11587_v2  ;;  %v8791_v1 = vld [vmem:[%s15679_s2 + $0xd90] sm:$0xff]  ;;  %v8792_v2 = vld [vmem:[%s15679_s2 + $0xd98] sm:$0xff]  ;;  %v11641_v3 = vpack.c.bf16 %v8774_v0, %v8773_v63  ;;  %v8857_v63 = vld [vmem:[%s15679_s2 + $0xfa0] sm:$0xff] }
 0x275   : > { %11684 = vmatprep.subr.bf16.mxu0 %v11683_v6  ;;  %v11643_v4 = vpack.c.bf16 %v8792_v2, %v8791_v1  ;;  %v8776_v6 = vld [vmem:[%s15679_s2 + $0xd18] sm:$0xff]  ;;  %v8858_v0 = vld [vmem:[%s15679_s2 + $0xfa8] sm:$0xff] }
 0x276   : > { %v11645_v9 = vpack.c.bf16 %v8776_v6, %v8775_v5  ;;  %v11711_v2 = vpack.c.bf16 %v8858_v0, %v8857_v63  ;;  %v8859_v5 = vld [vmem:[%s15679_s2 + $0xfb0] sm:$0xff]  ;;  %v8860_v6 = vld [vmem:[%s15679_s2 + $0xfb8] sm:$0xff] }
 0x277   : > { %11590 = vmatpush3.bf16.msra.mxu1 %v11589_v12  ;;  %v8778_v12 = vld [vmem:[%s15679_s2 + $0xd28] sm:$0xff]  ;;  %v11715_v7 = vpack.c.bf16 %v8860_v6, %v8859_v5 }
 0x278   : > { %11686 = vmatpush3.bf16.msra.mxu0 %v11685_v14  ;;  %11592 = vmatprep.subr.bf16.mxu1 %v11591_v15  ;;  %v8795_v14 = vld [vmem:[%s15679_s2 + $0xdb0] sm:$0xff]  ;;  %v8796_v15 = vld [vmem:[%s15679_s2 + $0xdb8] sm:$0xff]  ;;  %v11649_v16 = vpack.c.bf16 %v8778_v12, %v8777_v11  ;;  %v8862_v11 = vld [vmem:[%s15679_s2 + $0xfc8] sm:$0xff] }
 0x279   : > { %11688 = vmatprep.subr.bf16.mxu0 %v11687_v22  ;;  %v11651_v17 = vpack.c.bf16 %v8796_v15, %v8795_v14  ;;  %v8780_v22 = vld [vmem:[%s15679_s2 + $0xd38] sm:$0xff]  ;;  %v8845_v15 = vld [vmem:[%s15679_s2 + $0xf40] sm:$0xff] }
 0x27a   : > { %v11653_v25 = vpack.c.bf16 %v8780_v22, %v8779_v21  ;;  %v8864_v21 = vld [vmem:[%s15679_s2 + $0xfd8] sm:$0xff] }
 0x27b   : > { %11594 = vmatpush3.bf16.msra.mxu1 %v11593_v28  ;;  %v8782_v28 = vld [vmem:[%s15679_s2 + $0xd48] sm:$0xff] }
 0x27c   : > { %11690 = vmatpush3.bf16.msra.mxu0 %v11689_v29  ;;  %11596 = vmatprep.subr.bf16.mxu1 %v11595_v30  ;;  %v8799_v29 = vld [vmem:[%s15679_s2 + $0xdd0] sm:$0xff]  ;;  %v8800_v30 = vld [vmem:[%s15679_s2 + $0xdd8] sm:$0xff]  ;;  %v11657_v31 = vpack.c.bf16 %v8782_v28, %v8781_v27  ;;  %v8866_v27 = vld [vmem:[%s15679_s2 + $0xfe8] sm:$0xff] }
 0x27d   : > { %11692 = vmatprep.subr.bf16.mxu0 %v11691_v34  ;;  %v11659_v32 = vpack.c.bf16 %v8800_v30, %v8799_v29  ;;  %v8784_v34 = vld [vmem:[%s15679_s2 + $0xd58] sm:$0xff]  ;;  %v8849_v30 = vld [vmem:[%s15679_s2 + $0xf60] sm:$0xff] }
 0x27e   : > { %v11661_v37 = vpack.c.bf16 %v8784_v34, %v8783_v33  ;;  %v8867_v34 = vld [vmem:[%s15679_s2 + $0xff0] sm:$0xff] }
 0x27f   : > { %11598 = vmatpush3.bf16.msra.mxu1 %v11597_v40  ;;  %v8786_v40 = vld [vmem:[%s15679_s2 + $0xd68] sm:$0xff] }
 0x280   : > { %11694 = vmatpush3.bf16.msra.mxu0 %v11693_v41  ;;  %11600 = vmatprep.subr.bf16.mxu1 %v11599_v42  ;;  %v11665_v49 = vpack.c.bf16 %v8786_v40, %v8785_v39 }
 0x281   : > { %11696 = vmatprep.subr.bf16.mxu0 %v11695_v46 }
 0x283   : > { %11602 = vmatpush3.bf16.msra.mxu1 %v11601_v52  ;;  %v8788_v52 = vld [vmem:[%s15679_s2 + $0xd78] sm:$0xff] }
 0x284   : > { %11698 = vmatpush3.bf16.msra.mxu0 %v11697_v18  ;;  %11604 = vmatprep.subr.bf16.mxu1 %v11603_v53  ;;  %v8853_v18 = vld [vmem:[%s15679_s2 + $0xf80] sm:$0xff]  ;;  %v8854_v53 = vld [vmem:[%s15679_s2 + $0xf88] sm:$0xff]  ;;  %v11669_v19 = vpack.c.bf16 %v8788_v52, %v8787_v51 }
 0x285   : > { %11700 = vmatprep.subr.bf16.mxu0 %v11699_v55  ;;  %v11703_v58 = vpack.c.bf16 %v8854_v53, %v8853_v18  ;;  %v8838_v55 = vld [vmem:[%s15679_s2 + $0xf08] sm:$0xff] }
 0x286   : > { %v11705_v59 = vpack.c.bf16 %v8838_v55, %v8837_v54 }
 0x287   : > { %11606 = vmatpush3.bf16.msra.mxu1 %v11605_v60  ;;  %v11707_v60 = vpack.c.bf16 %v8856_v57, %v8855_v56 }
 0x288   : > { %11702 = vmatpush3.bf16.msra.mxu0 %v11701_v61  ;;  %11640 = vmatprep.subr.bf16.mxu1 %v11639_v62  ;;  %v8839_v61 = vld [vmem:[%s15679_s2 + $0xf10] sm:$0xff]  ;;  %v8840_v62 = vld [vmem:[%s15679_s2 + $0xf18] sm:$0xff] }
 0x289   : > { %v11709_v1 = vpack.c.bf16 %v8840_v62, %v8839_v61 }
 0x28a   : > { %1914 = vmatmul.mubr.f32.vlgmr.msra.gmra.mrb[12].mxu1 %v13799_v13 }
 0x28b   : > { %2223 = vmatmul.mubr.f32.vlgmr.msra.gmra.mrb[14].mxu0 %v13799_v13  ;;  %11642 = vmatpush3.bf16.msra.mxu1 %v11641_v3  ;;  %v8841_v3 = vld [vmem:[%s15679_s2 + $0xf20] sm:$0xff] }
 0x28c   : > { %2119 = vmatprep.mubr.f32.mxu1 %v13810_v20  ;;  %11644 = vmatprep.subr.bf16.mxu1 %v11643_v4  ;;  %v8842_v4 = vld [vmem:[%s15679_s2 + $0xf28] sm:$0xff] }
 0x28f   : > { %11646 = vmatpush3.bf16.msra.mxu1 %v11645_v9  ;;  %v8844_v9 = vld [vmem:[%s15679_s2 + $0xf38] sm:$0xff] }
 0x290   : > { %11648 = vmatprep.subr.bf16.mxu1 %v11647_v10  ;;  %v8861_v10 = vld [vmem:[%s15679_s2 + $0xfc0] sm:$0xff]  ;;  %v11717_v12 = vpack.c.bf16 %v8844_v9, %v8843_v8 }
 0x291   : > { %v11719_v14 = vpack.c.bf16 %v8862_v11, %v8861_v10 }
 0x293   : > { %11650 = vmatpush3.bf16.msra.mxu1 %v11649_v16  ;;  %v8846_v16 = vld [vmem:[%s15679_s2 + $0xf48] sm:$0xff] }
 0x294   : > { %11652 = vmatprep.subr.bf16.mxu1 %v11651_v17  ;;  %v8863_v17 = vld [vmem:[%s15679_s2 + $0xfd0] sm:$0xff]  ;;  %v11721_v22 = vpack.c.bf16 %v8846_v16, %v8845_v15 }
 0x295   : > { %v11723_v23 = vpack.c.bf16 %v8864_v21, %v8863_v17 }
 0x297   : > { %11654 = vmatpush3.bf16.msra.mxu1 %v11653_v25  ;;  %v8848_v25 = vld [vmem:[%s15679_s2 + $0xf58] sm:$0xff] }
 0x298   : > { %11656 = vmatprep.subr.bf16.mxu1 %v11655_v26  ;;  %v8865_v26 = vld [vmem:[%s15679_s2 + $0xfe0] sm:$0xff]  ;;  %v11725_v28 = vpack.c.bf16 %v8848_v25, %v8847_v24 }
 0x299   : > { %v11727_v29 = vpack.c.bf16 %v8866_v27, %v8865_v26  ;;  %v2332_v26 = vld [vmem:[%s15680_s3 + $0x8] sm:$0xff] }
 0x29b   : > { %11658 = vmatpush3.bf16.msra.mxu1 %v11657_v31  ;;  %v8850_v31 = vld [vmem:[%s15679_s2 + $0xf68] sm:$0xff] }
 0x29c   : > { %11660 = vmatprep.subr.bf16.mxu1 %v11659_v32  ;;  %v11729_v40 = vpack.c.bf16 %v8850_v31, %v8849_v30 }
 0x29d   : > { %v9258_v41 = vpop.f32.mrb[0].mxu1  ;;  %v9328_v42 = vpop.f32.mrb[2].mxu0 }
 0x29e   : > { %v9259_v45 = vpop.f32.mrb[1].mxu1  ;;  %v9329_v46 = vpop.f32.mrb[3].mxu0 }
 0x29f   : > { %v14235_v47 = vadd.f32 %v9259_v45, %v9258_v41  ;;  %v14237_v48 = vadd.f32 %v9329_v46, %v9328_v42  ;;  %11662 = vmatpush3.bf16.msra.mxu1 %v11661_v37  ;;  %v11731_v41 = vpack.c.bf16 %v8868_v35, %v8867_v34  ;;  %v8851_v42 = vld [vmem:[%s15679_s2 + $0xf70] sm:$0xff]  ;;  %v2443_v35 = vld [vmem:[%s15681_s4] sm:$0xff] }
 0x2a0   : > { %11664 = vmatprep.subr.bf16.mxu1 %v11663_v38  ;;  %v11733_v45 = vpack.c.bf16 %v8852_v43, %v8851_v42  ;;  %v2446_v42 = vld [vmem:[%s15681_s4 + $0x18] sm:$0xff]  ;;  %v8893_v43 = vld [vmem:[%s15681_s4 + $0xd0] sm:$0xff] }
 0x2a3   : > { %11666 = vmatpush3.bf16.msra.mxu1 %v11665_v49 }
 0x2a4   : > { %11668 = vmatprep.subr.bf16.mxu1 %v11667_v50 }
 0x2a7   : > { %11670 = vmatpush3.bf16.msra.mxu1 %v11669_v19 }
 0x2a8   : > { %11704 = vmatprep.subr.bf16.mxu1 %v11703_v58 }
 0x2aa   : > { %2120 = vmatmul.mubr.f32.vlgmr.msra.gmra.mrb[14].mxu1 %v13799_v13 }
 0x2ab   : > { %11706 = vmatpush3.bf16.msra.mxu1 %v11705_v59  ;;  %2325 = vmatprep.mubr.f32.mxu1 %v13810_v20  ;;  %v11713_v20 = vpack.c.bf16 %v8842_v4, %v8841_v3 }
 0x2ac   : > { %11708 = vmatprep.subr.bf16.mxu1 %v11707_v60 }
 0x2af   : > { %11710 = vmatpush3.bf16.msra.mxu1 %v11709_v1 }
 0x2b0   : > { %11712 = vmatprep.subr.bf16.mxu1 %v11711_v2 }
 0x2b3   : > { %11714 = vmatpush3.bf16.msra.mxu1 %v11713_v20 }
 0x2b4   : > { %11716 = vmatprep.subr.bf16.mxu1 %v11715_v7 }
 0x2b7   : > { %11718 = vmatpush3.bf16.msra.mxu1 %v11717_v12 }
 0x2b8   : > { %11720 = vmatprep.subr.bf16.mxu1 %v11719_v14 }
 0x2bb   : > { %11722 = vmatpush3.bf16.msra.mxu1 %v11721_v22 }
 0x2bc   : > { %11724 = vmatprep.subr.bf16.mxu1 %v11723_v23 }
 0x2bd   : > { %v9293_v32 = vpop.f32.mrb[2].mxu1  ;;  %v9398_v33 = vpop.f32.mrb[4].mxu0 }
 0x2be   : > { %v9294_v36 = vpop.f32.mrb[3].mxu1  ;;  %v9399_v37 = vpop.f32.mrb[5].mxu0 }
 0x2bf   : > { %v9295_v38 = vadd.f32 %v9294_v36, %v9293_v32  ;;  %v9400_v39 = vadd.f32 %v9399_v37, %v9398_v33  ;;  %11726 = vmatpush3.bf16.msra.mxu1 %v11725_v28  ;;  %v2444_v36 = vld [vmem:[%s15681_s4 + $0x8] sm:$0xff]  ;;  %v8891_v37 = vld [vmem:[%s15681_s4 + $0xc0] sm:$0xff] }
 0x2c0   : > { %11728 = vmatprep.subr.bf16.mxu1 %v11727_v29 }
 0x2c1   : > { %v11735_v44 = vpack.c.bf16 %v9295_v38, %v14235_v47  ;;  %v11767_v38 = vpack.c.bf16 %v2444_v36, %v2443_v35  ;;  %v8877_v35 = vld [vmem:[%s15681_s4 + $0x70] sm:$0xff]  ;;  %v8878_v36 = vld [vmem:[%s15681_s4 + $0x78] sm:$0xff] }
 0x2c3   : > { %11730 = vmatpush3.bf16.msra.mxu1 %v11729_v40  ;;  %11736 = vmatprep.subr.bf16.mxu0 %v11735_v44 }
 0x2c4   : > { %11738 = vmatpush3.bf16.msra.mxu0 %v11735_v44  ;;  %11732 = vmatprep.subr.bf16.mxu1 %v11731_v41  ;;  %v2445_v41 = vld [vmem:[%s15681_s4 + $0x10] sm:$0xff] }
 0x2c5   : > { %v11771_v44 = vpack.c.bf16 %v2446_v42, %v2445_v41  ;;  %v8881_v41 = vld [vmem:[%s15681_s4 + $0x80] sm:$0xff]  ;;  %v8882_v42 = vld [vmem:[%s15681_s4 + $0x88] sm:$0xff] }
 0x2c7   : > { %11734 = vmatpush3.bf16.msra.mxu1 %v11733_v45  ;;  %v8894_v45 = vld [vmem:[%s15681_s4 + $0xd8] sm:$0xff] }
 0x2c8   : > { %11768 = vmatprep.subr.bf16.mxu1 %v11767_v38 }
 0x2ca   : > { %2326 = vmatmul.mubr.f32.vlgmr.msra.gmra.mrb[16].mxu1 %v13799_v13 }
 0x2cb   : > { %11770 = vmatpush3.bf16.msra.mxu1 %v11767_v38  ;;  %v8918_v38 = vld [vmem:[%s15681_s4 + $0x178] sm:$0xff] }
 0x2cc   : > { %11772 = vmatprep.subr.bf16.mxu1 %v11771_v44 }
 0x2cf   : > { %11774 = vmatpush3.bf16.msra.mxu1 %v11771_v44  ;;  %v8932_v44 = vld [vmem:[%s15681_s4 + $0x1c8] sm:$0xff] }
 0x2dd   : > { %v9363_v46 = vpop.f32.mrb[4].mxu1 }
 0x2de   : > { %v9468_v49 = vpop.f32.mrb[6].mxu0  ;;  %v9364_v50 = vpop.f32.mrb[5].mxu1 }
 0x2df   : > { %v9365_v51 = vadd.f32 %v9364_v50, %v9363_v46  ;;  %v9469_v52 = vpop.f32.mrb[7].mxu0  ;;  %v11819_v46 = vpack.c.bf16 %v8894_v45, %v8893_v43  ;;  %v2448_v50 = vld [vmem:[%s15681_s4 + $0x28] sm:$0xff]  ;;  %v8931_v43 = vld [vmem:[%s15681_s4 + $0x1c0] sm:$0xff]  ;;  %v11799_v45 = vpack.c.bf16 %v8882_v42, %v8881_v41 }
 0x2e0   : > { %v9470_v18 = vadd.f32 %v9469_v52, %v9468_v49  ;;  %v2447_v49 = vld [vmem:[%s15681_s4 + $0x20] sm:$0xff]  ;;  %v8976_v42 = vld [vmem:[%s15681_s4 + $0x2e8] sm:$0xff] }
 0x2e1   : > { %v11739_v53 = vpack.c.bf16 %v9365_v51, %v14237_v48  ;;  %v2331_v48 = vld [vmem:[%s15680_s3] sm:$0xff]  ;;  %v11775_v52 = vpack.c.bf16 %v2448_v50, %v2447_v49  ;;  %v8883_v49 = vld [vmem:[%s15681_s4 + $0x90] sm:$0xff]  ;;  %v8884_v50 = vld [vmem:[%s15681_s4 + $0x98] sm:$0xff] }
 0x2e2   : > { %10464 = vmatprep.mubr.f32.mxu0 %v2331_v48  ;;  %v8895_v51 = vld [vmem:[%s15681_s4 + $0xe0] sm:$0xff] }
 0x2e3   : > { %11740 = vmatprep.subr.bf16.mxu0 %v11739_v53  ;;  %11776 = vmatprep.subr.bf16.mxu1 %v11775_v52  ;;  %v8975_v41 = vld [vmem:[%s15681_s4 + $0x2e0] sm:$0xff] }
 0x2e4   : > { %11742 = vmatpush3.bf16.msra.mxu0 %v11739_v53  ;;  %11778 = vmatpush3.bf16.msra.mxu1 %v11775_v52  ;;  %v8934_v52 = vld [vmem:[%s15681_s4 + $0x1d8] sm:$0xff] }
 0x2fd   : > { %v9433_v19 = vpop.f32.mrb[6].mxu1 }
 0x2fe   : > { %v9538_v47 = vpop.f32.mrb[8].mxu0  ;;  %v9434_v58 = vpop.f32.mrb[7].mxu1 }
 0x2ff   : > { %v9435_v54 = vadd.f32 %v9434_v58, %v9433_v19  ;;  %v9539_v55 = vpop.f32.mrb[9].mxu0  ;;  %v2449_v19 = vld [vmem:[%s15681_s4 + $0x30] sm:$0xff] }
 0x300   : > { %v9540_v56 = vadd.f32 %v9539_v55, %v9538_v47  ;;  %v2450_v47 = vld [vmem:[%s15681_s4 + $0x38] sm:$0xff]  ;;  %v8897_v58 = vld [vmem:[%s15681_s4 + $0xf0] sm:$0xff] }
 0x301   : > { %v11743_v57 = vpack.c.bf16 %v9435_v54, %v9400_v39  ;;  %v8892_v39 = vld [vmem:[%s15681_s4 + $0xc8] sm:$0xff]  ;;  %v11779_v54 = vpack.c.bf16 %v2450_v47, %v2449_v19  ;;  %v8898_v55 = vld [vmem:[%s15681_s4 + $0xf8] sm:$0xff]  ;;  %v8885_v19 = vld [vmem:[%s15681_s4 + $0xa0] sm:$0xff] }
 0x302   : > { %v11815_v40 = vpack.c.bf16 %v8892_v39, %v8891_v37  ;;  %v8917_v37 = vld [vmem:[%s15681_s4 + $0x170] sm:$0xff]  ;;  %v11795_v39 = vpack.c.bf16 %v8878_v36, %v8877_v35  ;;  %v8886_v47 = vld [vmem:[%s15681_s4 + $0xa8] sm:$0xff]  ;;  %v8974_v36 = vld [vmem:[%s15681_s4 + $0x2d8] sm:$0xff] }
 0x303   : > { %11744 = vmatprep.subr.bf16.mxu0 %v11743_v57  ;;  %11780 = vmatprep.subr.bf16.mxu1 %v11779_v54  ;;  %v8973_v35 = vld [vmem:[%s15681_s4 + $0x2d0] sm:$0xff] }
 0x304   : > { %11746 = vmatpush3.bf16.msra.mxu0 %v11743_v57  ;;  %11782 = vmatpush3.bf16.msra.mxu1 %v11779_v54  ;;  %v8871_v57 = vld [vmem:[%s15681_s4 + $0x40] sm:$0xff]  ;;  %v8936_v54 = vld [vmem:[%s15681_s4 + $0x1e8] sm:$0xff] }
 0x31d   : > { %v9503_v13 = vpop.f32.mrb[8].mxu1 }
 0x31e   : > { %v9608_v59 = vpop.f32.mrb[10].mxu0  ;;  %v9504_v60 = vpop.f32.mrb[9].mxu1 }
 0x31f   : > { %v9505_v61 = vadd.f32 %v9504_v60, %v9503_v13  ;;  %v9609_v62 = vpop.f32.mrb[11].mxu0  ;;  %v8872_v13 = vld [vmem:[%s15681_s4 + $0x48] sm:$0xff] }
 0x320   : > { %v9610_v63 = vadd.f32 %v9609_v62, %v9608_v59  ;;  %v8911_v59 = vld [vmem:[%s15681_s4 + $0x140] sm:$0xff]  ;;  %v11783_v60 = vpack.c.bf16 %v8872_v13, %v8871_v57  ;;  %v8887_v57 = vld [vmem:[%s15681_s4 + $0xb0] sm:$0xff]  ;;  %v8888_v13 = vld [vmem:[%s15681_s4 + $0xb8] sm:$0xff] }
 0x321   : > { %v11747_v0 = vpack.c.bf16 %v9505_v61, %v9470_v18  ;;  %v8896_v18 = vld [vmem:[%s15681_s4 + $0xe8] sm:$0xff] }
 0x322   : > { %v11823_v53 = vpack.c.bf16 %v8896_v18, %v8895_v51  ;;  %v8912_v61 = vld [vmem:[%s15681_s4 + $0x148] sm:$0xff]  ;;  %11784 = vmatprep.subr.bf16.mxu1 %v11783_v60  ;;  %v8933_v51 = vld [vmem:[%s15681_s4 + $0x1d0] sm:$0xff]  ;;  %v11803_v18 = vpack.c.bf16 %v8884_v50, %v8883_v49  ;;  %v8978_v50 = vld [vmem:[%s15681_s4 + $0x2f8] sm:$0xff] }
 0x323   : > { %11748 = vmatprep.subr.bf16.mxu0 %v11747_v0  ;;  %v11847_v62 = vpack.c.bf16 %v8912_v61, %v8911_v59  ;;  %v8937_v59 = vld [vmem:[%s15681_s4 + $0x1f0] sm:$0xff]  ;;  %v11811_v61 = vpack.c.bf16 %v8888_v13, %v8887_v57  ;;  %v8994_v13 = vld [vmem:[%s15681_s4 + $0x358] sm:$0xff] }
 0x324   : > { %11750 = vmatpush3.bf16.msra.mxu0 %v11747_v0  ;;  %v8977_v49 = vld [vmem:[%s15681_s4 + $0x2f0] sm:$0xff] }
 0x325   : > { %v8993_v57 = vld [vmem:[%s15681_s4 + $0x350] sm:$0xff] }
 0x33d   : > { %v9573_v1 = vpop.f32.mrb[10].mxu1 }
 0x33e   : > { %v9678_v2 = vpop.f32.mrb[12].mxu0  ;;  %v9574_v3 = vpop.f32.mrb[11].mxu1 }
 0x33f   : > { %v9575_v4 = vadd.f32 %v9574_v3, %v9573_v1  ;;  %v9679_v5 = vpop.f32.mrb[13].mxu0 }
 0x340   : > { %v9680_v6 = vadd.f32 %v9679_v5, %v9678_v2 }
 0x341   : > { %v11751_v20 = vpack.c.bf16 %v9575_v4, %v9540_v56  ;;  %v11827_v56 = vpack.c.bf16 %v8898_v55, %v8897_v58  ;;  %v8935_v58 = vld [vmem:[%s15681_s4 + $0x1e0] sm:$0xff]  ;;  %v11807_v55 = vpack.c.bf16 %v8886_v47, %v8885_v19  ;;  %v8992_v47 = vld [vmem:[%s15681_s4 + $0x348] sm:$0xff] }
 0x342   : > { %v8991_v19 = vld [vmem:[%s15681_s4 + $0x340] sm:$0xff] }
 0x343   : > { %11752 = vmatprep.subr.bf16.mxu0 %v11751_v20 }
 0x344   : > { %11754 = vmatpush3.bf16.msra.mxu0 %v11751_v20 }
 0x35d   : > { %v9643_v7 = vpop.f32.mrb[12].mxu1 }
 0x35e   : > { %v9748_v8 = vpop.f32.mrb[14].mxu0  ;;  %v9644_v9 = vpop.f32.mrb[13].mxu1 }
 0x35f   : > { %v9645_v10 = vadd.f32 %v9644_v9, %v9643_v7  ;;  %v9749_v11 = vpop.f32.mrb[15].mxu0 }
 0x360   : > { %v9750_v12 = vadd.f32 %v9749_v11, %v9748_v8 }
 0x361   : > { %v11755_v14 = vpack.c.bf16 %v9645_v10, %v9610_v63 }
 0x363   : > { %11756 = vmatprep.subr.bf16.mxu0 %v11755_v14 }
 0x364   : > { %11758 = vmatpush3.bf16.msra.mxu0 %v11755_v14 }
 0x37d   : > { %v9713_v15 = vpop.f32.mrb[14].mxu1 }
 0x37e   : > { %v9714_v16 = vpop.f32.mrb[15].mxu1 }
 0x37f   : > { %v9715_v17 = vadd.f32 %v9714_v16, %v9713_v15 }
 0x381   : > { %v11759_v21 = vpack.c.bf16 %v9715_v17, %v9680_v6  ;;  %v8873_v17 = vld [vmem:[%s15681_s4 + $0x50] sm:$0xff] }
 0x383   : > { %11760 = vmatprep.subr.bf16.mxu0 %v11759_v21 }
 0x384   : > { %11762 = vmatpush3.bf16.msra.mxu0 %v11759_v21 }
 0x39d   : > { %v9783_v22 = vpop.f32.mrb[16].mxu1 }
 0x39e   : > { %v9784_v23 = vpop.f32.mrb[17].mxu1 }
 0x39f   : > { %v9785_v24 = vadd.f32 %v9784_v23, %v9783_v22  ;;  %v8874_v23 = vld [vmem:[%s15681_s4 + $0x58] sm:$0xff] }
 0x3a1   : > { %v11763_v25 = vpack.c.bf16 %v9785_v24, %v9750_v12  ;;  %v8913_v24 = vld [vmem:[%s15681_s4 + $0x150] sm:$0xff] }
 0x3a3   : > { %11764 = vmatprep.subr.bf16.mxu0 %v11763_v25 }
 0x3a4   : > { %11766 = vmatpush3.bf16.msra.mxu0 %v11763_v25  ;;  %v8914_v25 = vld [vmem:[%s15681_s4 + $0x158] sm:$0xff] }
 0x3a5   : > { %11816 = vmatprep.subr.bf16.mxu0 %v11815_v40 }
 0x3a7   : > { %10465 = vmatmul.mubr.f32.vlgmr.msra.gmra.mrb[16].mxu0 %v2332_v26 }
 0x3a8   : > { %11818 = vmatpush3.bf16.msra.mxu0 %v11815_v40  ;;  %v11859_v40 = vpack.c.bf16 %v8918_v38, %v8917_v37  ;;  %v8925_v38 = vld [vmem:[%s15681_s4 + $0x1a0] sm:$0xff] }
 0x3a9   : > { %11820 = vmatprep.subr.bf16.mxu0 %v11819_v46 }
 0x3ac   : > { %11822 = vmatpush3.bf16.msra.mxu0 %v11819_v46  ;;  %v11879_v46 = vpack.c.bf16 %v8932_v44, %v8931_v43  ;;  %v11951_v44 = vpack.c.bf16 %v8976_v42, %v8975_v41  ;;  %v8984_v41 = vld [vmem:[%s15681_s4 + $0x318] sm:$0xff] }
 0x3ad   : > { %11824 = vmatprep.subr.bf16.mxu0 %v11823_v53 }
 0x3b0   : > { %11826 = vmatpush3.bf16.msra.mxu0 %v11823_v53  ;;  %v11883_v53 = vpack.c.bf16 %v8934_v52, %v8933_v51  ;;  %v11955_v52 = vpack.c.bf16 %v8978_v50, %v8977_v49  ;;  %v8988_v49 = vld [vmem:[%s15681_s4 + $0x338] sm:$0xff] }
 0x3b1   : > { %11828 = vmatprep.subr.bf16.mxu0 %v11827_v56 }
 0x3b4   : > { %11830 = vmatpush3.bf16.msra.mxu0 %v11827_v56  ;;  %v11887_v56 = vpack.c.bf16 %v8936_v54, %v8935_v58  ;;  %v11975_v54 = vpack.c.bf16 %v8992_v47, %v8991_v19  ;;  %v9004_v19 = vld [vmem:[%s15681_s4 + $0x398] sm:$0xff] }
 0x3b5   : > { %11848 = vmatprep.subr.bf16.mxu0 %v11847_v62 }
 0x47a   : > { %v14352_v27 = vpop.f32.mrb[16].mxu0 }
 0x47b   : > { %v14354_v28 = vpop.f32.mrb[17].mxu0  ;;  %v2412_v29 = vsel %vm2408_vm2, %v14352_v27, 0.0  ;;  %v2416_v33 = vmul.f32 %v14352_v27, %v14352_v27 }
 0x47c   : > { %2413 = vadd.xlane.f32.xlu1 %v2412_v29  ;;  %v2415_v30 = vmul.f32 %v14354_v28, %v14354_v28  ;;  %v2409_v32 = vsel %vm2408_vm2, %v14354_v28, 0.0  ;;  %v11851_v29 = vpack.c.bf16 %v8914_v25, %v8913_v24 }
 0x47d   : > { %v2420_v34 = vsel %vm2408_vm2, %v2416_v33, 0.0 }
 0x47e   : > { %v2417_v31 = vsel %vm2408_vm2, %v2415_v30, 0.0  ;;  %v8876_v30 = vld [vmem:[%s15681_s4 + $0x68] sm:$0xff] }
 0x47f   : > { %2418 = vadd.xlane.f32.xlu0 %v2417_v31  ;;  %v8915_v31 = vld [vmem:[%s15681_s4 + $0x160] sm:$0xff] }
 0x480   : > { %2410 = vadd.xlane.f32.xlu1 %v2409_v32  ;;  %v8916_v32 = vld [vmem:[%s15681_s4 + $0x168] sm:$0xff] }
 0x484   : > { %2421 = vadd.xlane.f32.xlu1 %v2420_v34  ;;  %v11855_v34 = vpack.c.bf16 %v8916_v32, %v8915_v31 }
 0x509   : > { %v2414_v63 = vpop.xlane.xlu1 %2413 }
 0x50a   : > { %v2424_v1 = vmul.f32 0.015625, %v2414_v63  ;;  %v8901_v63 = vld [vmem:[%s15681_s4 + $0x100] sm:$0xff] }
 0x50c   : > { %v2419_v0 = vpop.xlane.xlu0 %2418  ;;  %v2428_v6 = vmul.f32 %v2424_v1, %v2424_v1  ;;  %v2432_v14 = vsub.f32 %v14352_v27, %v2424_v1  ;;  %v8875_v27 = vld [vmem:[%s15681_s4 + $0x60] sm:$0xff]  ;;  %v8952_v1 = vld [vmem:[%s15681_s4 + $0x248] sm:$0xff] }
 0x50d   : > { %v2411_v48 = vpop.xlane.xlu1 %2410  ;;  %v2425_v3 = vmul.f32 0.015625, %v2419_v0  ;;  %v11791_v33 = vpack.c.bf16 %v8876_v30, %v8875_v27  ;;  %v8902_v0 = vld [vmem:[%s15681_s4 + $0x108] sm:$0xff]  ;;  %v8921_v27 = vld [vmem:[%s15681_s4 + $0x180] sm:$0xff] }
 0x50e   : > { %v2423_v2 = vmul.f32 0.015625, %v2411_v48  ;;  %v8951_v48 = vld [vmem:[%s15681_s4 + $0x240] sm:$0xff]  ;;  %v8972_v30 = vld [vmem:[%s15681_s4 + $0x2c8] sm:$0xff] }
 0x510   : > { %v2427_v4 = vmul.f32 %v2423_v2, %v2423_v2  ;;  %v2431_v11 = vsub.f32 %v14354_v28, %v2423_v2  ;;  %v11787_v28 = vpack.c.bf16 %v8874_v23, %v8873_v17  ;;  %v11831_v2 = vpack.c.bf16 %v8902_v0, %v8901_v63  ;;  %v8908_v17 = vld [vmem:[%s15681_s4 + $0x138] sm:$0xff]  ;;  %v8995_v63 = vld [vmem:[%s15681_s4 + $0x360] sm:$0xff]  ;;  %v8996_v0 = vld [vmem:[%s15681_s4 + $0x368] sm:$0xff] }
 0x511   : > { %v2422_v5 = vpop.xlane.xlu1 %2421  ;;  %v8958_v23 = vld [vmem:[%s15681_s4 + $0x278] sm:$0xff] }
 0x512   : > { %v2429_v20 = vsub.f32 %v2425_v3, %v2427_v4  ;;  %v2426_v7 = vmul.f32 0.015625, %v2422_v5  ;;  %v11911_v3 = vpack.c.bf16 %v8952_v1, %v8951_v48  ;;  %v8903_v4 = vld [vmem:[%s15681_s4 + $0x110] sm:$0xff]  ;;  %v8904_v5 = vld [vmem:[%s15681_s4 + $0x118] sm:$0xff]  ;;  %v11983_v1 = vpack.c.bf16 %v8996_v0, %v8995_v63  ;;  %v3793_v0 = vld [vmem:[%s15682_s5 + $0x8] sm:$0xff] }
 0x514   : > { %v2433_v8 = vadd.f32 1e-05, %v2429_v20  ;;  %v2430_v9 = vsub.f32 %v2426_v7, %v2428_v6  ;;  %v8953_v6 = vld [vmem:[%s15681_s4 + $0x250] sm:$0xff]  ;;  %v8954_v20 = vld [vmem:[%s15681_s4 + $0x258] sm:$0xff]  ;;  %v11835_v7 = vpack.c.bf16 %v8904_v5, %v8903_v4 }
 0x515   : > { %v8997_v4 = vld [vmem:[%s15681_s4 + $0x370] sm:$0xff]  ;;  %v8998_v5 = vld [vmem:[%s15681_s4 + $0x378] sm:$0xff] }
 0x516   : > { %12410 = vrsqrt.f32 %v2433_v8  ;;  %v2434_v10 = vadd.f32 1e-05, %v2430_v9  ;;  %v8905_v8 = vld [vmem:[%s15681_s4 + $0x120] sm:$0xff]  ;;  %v8906_v9 = vld [vmem:[%s15681_s4 + $0x128] sm:$0xff] }
 0x518   : > { %12412 = vrsqrt.f32 %v2434_v10  ;;  %v11915_v10 = vpack.c.bf16 %v8954_v20, %v8953_v6  ;;  %v11987_v20 = vpack.c.bf16 %v8998_v5, %v8997_v4 }
 0x520   : > { %v12411_v12 = vpop.eup %12410 }
 0x521   : > { %v2437_v15 = vmul.f32 %v12411_v12, %v2431_v11  ;;  %v8955_v11 = vld [vmem:[%s15681_s4 + $0x260] sm:$0xff]  ;;  %v8956_v12 = vld [vmem:[%s15681_s4 + $0x268] sm:$0xff] }
 0x522   : > { %v12413_v16 = vpop.eup %12412 }
 0x523   : > { %v14431_v21 = vmax.f32 %v2437_v15, 0.0  ;;  %v2438_v22 = vmul.f32 %v12413_v16, %v2432_v14  ;;  %v11839_v14 = vpack.c.bf16 %v8906_v9, %v8905_v8  ;;  %v11919_v15 = vpack.c.bf16 %v8956_v12, %v8955_v11  ;;  %v8907_v16 = vld [vmem:[%s15681_s4 + $0x130] sm:$0xff]  ;;  %v8962_v8 = vld [vmem:[%s15681_s4 + $0x288] sm:$0xff]  ;;  %v9011_v9 = vld [vmem:[%s15681_s4 + $0x3c0] sm:$0xff] }
 0x524   : > { %v11843_v24 = vpack.c.bf16 %v8908_v17, %v8907_v16  ;;  %v9013_v16 = vld [vmem:[%s15681_s4 + $0x3d0] sm:$0xff]  ;;  %v9014_v17 = vld [vmem:[%s15681_s4 + $0x3d8] sm:$0xff] }
 0x525   : > { %v14442_v26 = vmax.f32 %v2438_v22, 0.0  ;;  %10483 = vmatprep.mubr.msk.f32.mxu1 %vm2408_vm2, %v14431_v21  ;;  %10540 = vmatprep.mubr.msk.f32.mxu0 %vm2408_vm2, %v14431_v21  ;;  %2441 = vst.msk [vmem:[%s14453_s19] sm:$0xff] %vm2408_vm2, %v14431_v21  ;;  %v8957_v22 = vld [vmem:[%s15681_s4 + $0x270] sm:$0xff] }
 0x526   : > { %v11923_v25 = vpack.c.bf16 %v8958_v23, %v8957_v22  ;;  %v8965_v23 = vld [vmem:[%s15681_s4 + $0x2a0] sm:$0xff] }
 0x527   : > { %10484 = vmatmul.mubr.msk.f32.vlgmr.msra.gmra.mrb[18].mxu1 %vm2408_vm2, %v14442_v26  ;;  %10541 = vmatmul.mubr.msk.f32.vlgmr.msra.gmra.mrb[18].mxu0 %vm2408_vm2, %v14442_v26  ;;  %2442 = vst.msk [vmem:[%s14453_s19 + $0x8] sm:$0xff] %vm2408_vm2, %v14442_v26 }
 0x528   : > { %11786 = vmatpush3.bf16.msra.mxu1 %v11783_v60  ;;  %11850 = vmatpush3.bf16.msra.mxu0 %v11847_v62  ;;  %v8938_v60 = vld [vmem:[%s15681_s4 + $0x1f8] sm:$0xff] }
 0x529   : > { %10502 = vmatprep.mubr.msk.f32.mxu1 %vm2408_vm2, %v14431_v21  ;;  %10578 = vmatprep.mubr.msk.f32.mxu0 %vm2408_vm2, %v14431_v21  ;;  %v11891_v62 = vpack.c.bf16 %v8938_v60, %v8937_v59  ;;  %v8945_v60 = vld [vmem:[%s15681_s4 + $0x220] sm:$0xff] }
 0x52a   : > { %11788 = vmatprep.subr.bf16.mxu1 %v11787_v28  ;;  %11852 = vmatprep.subr.bf16.mxu0 %v11851_v29 }
 0x52c   : > { %11790 = vmatpush3.bf16.msra.mxu1 %v11787_v28  ;;  %11854 = vmatpush3.bf16.msra.mxu0 %v11851_v29  ;;  %v8922_v28 = vld [vmem:[%s15681_s4 + $0x188] sm:$0xff]  ;;  %v8971_v29 = vld [vmem:[%s15681_s4 + $0x2c0] sm:$0xff] }
 0x52d   : > { %11792 = vmatprep.subr.bf16.mxu1 %v11791_v33  ;;  %11856 = vmatprep.subr.bf16.mxu0 %v11855_v34  ;;  %v11863_v31 = vpack.c.bf16 %v8922_v28, %v8921_v27  ;;  %v11943_v32 = vpack.c.bf16 %v8972_v30, %v8971_v29  ;;  %v9015_v27 = vld [vmem:[%s15681_s4 + $0x3e0] sm:$0xff]  ;;  %v9016_v28 = vld [vmem:[%s15681_s4 + $0x3e8] sm:$0xff] }
 0x52e   : > { %v12015_v30 = vpack.c.bf16 %v9016_v28, %v9015_v27 }
 0x530   : > { %11794 = vmatpush3.bf16.msra.mxu1 %v11791_v33  ;;  %11858 = vmatpush3.bf16.msra.mxu0 %v11855_v34  ;;  %v8923_v33 = vld [vmem:[%s15681_s4 + $0x190] sm:$0xff]  ;;  %v8924_v34 = vld [vmem:[%s15681_s4 + $0x198] sm:$0xff] }
 0x531   : > { %11796 = vmatprep.subr.bf16.mxu1 %v11795_v39  ;;  %11860 = vmatprep.subr.bf16.mxu0 %v11859_v40  ;;  %v11867_v37 = vpack.c.bf16 %v8924_v34, %v8923_v33  ;;  %v9017_v33 = vld [vmem:[%s15681_s4 + $0x3f0] sm:$0xff]  ;;  %v9018_v34 = vld [vmem:[%s15681_s4 + $0x3f8] sm:$0xff] }
 0x534   : > { %11798 = vmatpush3.bf16.msra.mxu1 %v11795_v39  ;;  %11862 = vmatpush3.bf16.msra.mxu0 %v11859_v40  ;;  %v8926_v39 = vld [vmem:[%s15681_s4 + $0x1a8] sm:$0xff]  ;;  %v11947_v40 = vpack.c.bf16 %v8974_v36, %v8973_v35  ;;  %v12019_v36 = vpack.c.bf16 %v9018_v34, %v9017_v33 }
 0x535   : > { %11800 = vmatprep.subr.bf16.mxu1 %v11799_v45  ;;  %11880 = vmatprep.subr.bf16.mxu0 %v11879_v46  ;;  %v11871_v43 = vpack.c.bf16 %v8926_v39, %v8925_v38  ;;  %v8982_v38 = vld [vmem:[%s15681_s4 + $0x308] sm:$0xff] }
 0x537   : > { %10503 = vmatmul.mubr.msk.f32.vlgmr.msra.gmra.mrb[20].mxu1 %vm2408_vm2, %v14442_v26  ;;  %10579 = vmatmul.mubr.msk.f32.vlgmr.msra.gmra.mrb[20].mxu0 %vm2408_vm2, %v14442_v26 }
 0x538   : > { %11802 = vmatpush3.bf16.msra.mxu1 %v11799_v45  ;;  %10521 = vmatprep.mubr.msk.f32.mxu1 %vm2408_vm2, %v14431_v21  ;;  %v8927_v45 = vld [vmem:[%s15681_s4 + $0x1b0] sm:$0xff] }
 0x539   : > { %11882 = vmatpush3.bf16.msra.mxu0 %v11879_v46  ;;  %10616 = vmatprep.mubr.msk.f32.mxu0 %vm2408_vm2, %v14431_v21  ;;  %v8928_v46 = vld [vmem:[%s15681_s4 + $0x1b8] sm:$0xff] }
 0x53a   : > { %11804 = vmatprep.subr.bf16.mxu1 %v11803_v18  ;;  %11884 = vmatprep.subr.bf16.mxu0 %v11883_v53  ;;  %v11875_v51 = vpack.c.bf16 %v8928_v46, %v8927_v45  ;;  %v8987_v46 = vld [vmem:[%s15681_s4 + $0x330] sm:$0xff] }
 0x53b   : > { %v11971_v50 = vpack.c.bf16 %v8988_v49, %v8987_v46  ;;  %v3792_v46 = vld [vmem:[%s15682_s5] sm:$0xff]  ;;  %v3795_v49 = vld [vmem:[%s15682_s5 + $0x18] sm:$0xff] }
 0x53c   : > { %11806 = vmatpush3.bf16.msra.mxu1 %v11803_v18  ;;  %v8941_v18 = vld [vmem:[%s15681_s4 + $0x200] sm:$0xff] }
 0x53d   : > { %11886 = vmatpush3.bf16.msra.mxu0 %v11883_v53  ;;  %11808 = vmatprep.subr.bf16.mxu1 %v11807_v55  ;;  %v8942_v53 = vld [vmem:[%s15681_s4 + $0x208] sm:$0xff] }
 0x53e   : > { %11888 = vmatprep.subr.bf16.mxu0 %v11887_v56  ;;  %v11895_v58 = vpack.c.bf16 %v8942_v53, %v8941_v18  ;;  %v9003_v53 = vld [vmem:[%s15681_s4 + $0x390] sm:$0xff] }
 0x53f   : > { %v11995_v47 = vpack.c.bf16 %v9004_v19, %v9003_v53  ;;  %v3798_v53 = vld [vmem:[%s15682_s5 + $0x30] sm:$0xff] }
 0x540   : > { %11810 = vmatpush3.bf16.msra.mxu1 %v11807_v55  ;;  %v8943_v55 = vld [vmem:[%s15681_s4 + $0x210] sm:$0xff] }
 0x541   : > { %11890 = vmatpush3.bf16.msra.mxu0 %v11887_v56  ;;  %11812 = vmatprep.subr.bf16.mxu1 %v11811_v61  ;;  %v8944_v56 = vld [vmem:[%s15681_s4 + $0x218] sm:$0xff] }
 0x542   : > { %11892 = vmatprep.subr.bf16.mxu0 %v11891_v62  ;;  %v11899_v59 = vpack.c.bf16 %v8944_v56, %v8943_v55  ;;  %v9007_v56 = vld [vmem:[%s15681_s4 + $0x3b0] sm:$0xff] }
 0x544   : > { %11814 = vmatpush3.bf16.msra.mxu1 %v11811_v61  ;;  %v8946_v61 = vld [vmem:[%s15681_s4 + $0x228] sm:$0xff] }
 0x545   : > { %11894 = vmatpush3.bf16.msra.mxu0 %v11891_v62  ;;  %11832 = vmatprep.subr.bf16.mxu1 %v11831_v2  ;;  %v11979_v62 = vpack.c.bf16 %v8994_v13, %v8993_v57  ;;  %v11903_v48 = vpack.c.bf16 %v8946_v61, %v8945_v60  ;;  %v9008_v57 = vld [vmem:[%s15681_s4 + $0x3b8] sm:$0xff] }
 0x546   : > { %11912 = vmatprep.subr.bf16.mxu0 %v11911_v3  ;;  %v12003_v13 = vpack.c.bf16 %v9008_v57, %v9007_v56 }
 0x547   : > { %10522 = vmatmul.mubr.msk.f32.vlgmr.msra.gmra.mrb[22].mxu1 %vm2408_vm2, %v14442_v26 }
 0x548   : > { %10617 = vmatmul.mubr.msk.f32.vlgmr.msra.gmra.mrb[22].mxu0 %vm2408_vm2, %v14442_v26  ;;  %11834 = vmatpush3.bf16.msra.mxu1 %v11831_v2  ;;  %v8947_v2 = vld [vmem:[%s15681_s4 + $0x230] sm:$0xff] }
 0x549   : > { %10559 = vmatprep.mubr.msk.f32.mxu1 %vm2408_vm2, %v14431_v21  ;;  %11914 = vmatpush3.bf16.msra.mxu0 %v11911_v3  ;;  %v8948_v3 = vld [vmem:[%s15681_s4 + $0x238] sm:$0xff] }
 0x54a   : > { %10654 = vmatprep.mubr.msk.f32.mxu0 %vm2408_vm2, %v14431_v21  ;;  %11836 = vmatprep.subr.bf16.mxu1 %v11835_v7  ;;  %v11907_v6 = vpack.c.bf16 %v8948_v3, %v8947_v2 }
 0x54b   : > { %11916 = vmatprep.subr.bf16.mxu0 %v11915_v10 }
 0x54c   : > { %11838 = vmatpush3.bf16.msra.mxu1 %v11835_v7  ;;  %v8961_v7 = vld [vmem:[%s15681_s4 + $0x280] sm:$0xff] }
 0x54d   : > { %11918 = vmatpush3.bf16.msra.mxu0 %v11915_v10  ;;  %11840 = vmatprep.subr.bf16.mxu1 %v11839_v14  ;;  %v9012_v10 = vld [vmem:[%s15681_s4 + $0x3c8] sm:$0xff]  ;;  %v11927_v11 = vpack.c.bf16 %v8962_v8, %v8961_v7 }
 0x54e   : > { %11920 = vmatprep.subr.bf16.mxu0 %v11919_v15  ;;  %v12007_v12 = vpack.c.bf16 %v9012_v10, %v9011_v9 }
 0x550   : > { %11842 = vmatpush3.bf16.msra.mxu1 %v11839_v14  ;;  %v8963_v14 = vld [vmem:[%s15681_s4 + $0x290] sm:$0xff] }
 0x551   : > { %11922 = vmatpush3.bf16.msra.mxu0 %v11919_v15  ;;  %11844 = vmatprep.subr.bf16.mxu1 %v11843_v24  ;;  %v8964_v15 = vld [vmem:[%s15681_s4 + $0x298] sm:$0xff] }
 0x552   : > { %11924 = vmatprep.subr.bf16.mxu0 %v11923_v25  ;;  %v11931_v22 = vpack.c.bf16 %v8964_v15, %v8963_v14 }
 0x554   : > { %11846 = vmatpush3.bf16.msra.mxu1 %v11843_v24  ;;  %v8966_v24 = vld [vmem:[%s15681_s4 + $0x2a8] sm:$0xff] }
 0x555   : > { %11926 = vmatpush3.bf16.msra.mxu0 %v11923_v25  ;;  %11864 = vmatprep.subr.bf16.mxu1 %v11863_v31  ;;  %v12011_v25 = vpack.c.bf16 %v9014_v17, %v9013_v16  ;;  %v11935_v29 = vpack.c.bf16 %v8966_v24, %v8965_v23 }
 0x556   : > { %11944 = vmatprep.subr.bf16.mxu0 %v11943_v32 }
 0x557   : > { %10560 = vmatmul.mubr.msk.f32.vlgmr.msra.gmra.mrb[24].mxu1 %vm2408_vm2, %v14442_v26 }
 0x558   : > { %10655 = vmatmul.mubr.msk.f32.vlgmr.msra.gmra.mrb[24].mxu0 %vm2408_vm2, %v14442_v26  ;;  %11866 = vmatpush3.bf16.msra.mxu1 %v11863_v31  ;;  %v8967_v31 = vld [vmem:[%s15681_s4 + $0x2b0] sm:$0xff] }
 0x559   : > { %10597 = vmatprep.mubr.msk.f32.mxu1 %vm2408_vm2, %v14431_v21  ;;  %11946 = vmatpush3.bf16.msra.mxu0 %v11943_v32  ;;  %v8968_v32 = vld [vmem:[%s15681_s4 + $0x2b8] sm:$0xff] }
 0x55a   : > { %10692 = vmatprep.mubr.msk.f32.mxu0 %vm2408_vm2, %v14431_v21  ;;  %11868 = vmatprep.subr.bf16.mxu1 %v11867_v37  ;;  %v11939_v35 = vpack.c.bf16 %v8968_v32, %v8967_v31 }
 0x55b   : > { %11948 = vmatprep.subr.bf16.mxu0 %v11947_v40 }
 0x55c   : > { %11870 = vmatpush3.bf16.msra.mxu1 %v11867_v37  ;;  %v8981_v37 = vld [vmem:[%s15681_s4 + $0x300] sm:$0xff] }
 0x55d   : > { %11950 = vmatpush3.bf16.msra.mxu0 %v11947_v40  ;;  %11872 = vmatprep.subr.bf16.mxu1 %v11871_v43  ;;  %v11959_v39 = vpack.c.bf16 %v8982_v38, %v8981_v37  ;;  %v8983_v40 = vld [vmem:[%s15681_s4 + $0x310] sm:$0xff] }
 0x55e   : > { %11952 = vmatprep.subr.bf16.mxu0 %v11951_v44  ;;  %v11963_v42 = vpack.c.bf16 %v8984_v41, %v8983_v40 }
 0x560   : > { %11874 = vmatpush3.bf16.msra.mxu1 %v11871_v43  ;;  %v8985_v43 = vld [vmem:[%s15681_s4 + $0x320] sm:$0xff] }
 0x561   : > { %11954 = vmatpush3.bf16.msra.mxu0 %v11951_v44  ;;  %11876 = vmatprep.subr.bf16.mxu1 %v11875_v51  ;;  %v8986_v44 = vld [vmem:[%s15681_s4 + $0x328] sm:$0xff] }
 0x562   : > { %11956 = vmatprep.subr.bf16.mxu0 %v11955_v52  ;;  %v11967_v45 = vpack.c.bf16 %v8986_v44, %v8985_v43 }
 0x564   : > { %11878 = vmatpush3.bf16.msra.mxu1 %v11875_v51  ;;  %v9001_v51 = vld [vmem:[%s15681_s4 + $0x380] sm:$0xff] }
 0x565   : > { %11958 = vmatpush3.bf16.msra.mxu0 %v11955_v52  ;;  %11896 = vmatprep.subr.bf16.mxu1 %v11895_v58  ;;  %v9002_v52 = vld [vmem:[%s15681_s4 + $0x388] sm:$0xff] }
 0x566   : > { %11976 = vmatprep.subr.bf16.mxu0 %v11975_v54  ;;  %v11991_v18 = vpack.c.bf16 %v9002_v52, %v9001_v51  ;;  %v3797_v51 = vld [vmem:[%s15682_s5 + $0x28] sm:$0xff]  ;;  %v3796_v52 = vld [vmem:[%s15682_s5 + $0x20] sm:$0xff] }
 0x567   : > { %10598 = vmatmul.mubr.msk.f32.vlgmr.msra.gmra.mrb[26].mxu1 %vm2408_vm2, %v14442_v26 }
 0x568   : > { %10693 = vmatmul.mubr.msk.f32.vlgmr.msra.gmra.mrb[26].mxu0 %vm2408_vm2, %v14442_v26  ;;  %11898 = vmatpush3.bf16.msra.mxu1 %v11895_v58  ;;  %v9005_v58 = vld [vmem:[%s15681_s4 + $0x3a0] sm:$0xff] }
 0x569   : > { %10635 = vmatprep.mubr.msk.f32.mxu1 %vm2408_vm2, %v14431_v21  ;;  %11978 = vmatpush3.bf16.msra.mxu0 %v11975_v54  ;;  %v9006_v54 = vld [vmem:[%s15681_s4 + $0x3a8] sm:$0xff] }
 0x56a   : > { %10730 = vmatprep.mubr.msk.f32.mxu0 %vm2408_vm2, %v14431_v21  ;;  %11900 = vmatprep.subr.bf16.mxu1 %v11899_v59  ;;  %v11999_v55 = vpack.c.bf16 %v9006_v54, %v9005_v58 }
 0x56b   : > { %11980 = vmatprep.subr.bf16.mxu0 %v11979_v62 }
 0x56c   : > { %11902 = vmatpush3.bf16.msra.mxu1 %v11899_v59 }
 0x56d   : > { %11982 = vmatpush3.bf16.msra.mxu0 %v11979_v62  ;;  %11904 = vmatprep.subr.bf16.mxu1 %v11903_v48 }
 0x56e   : > { %11984 = vmatprep.subr.bf16.mxu0 %v11983_v1 }
 0x570   : > { %11906 = vmatpush3.bf16.msra.mxu1 %v11903_v48 }
 0x571   : > { %11986 = vmatpush3.bf16.msra.mxu0 %v11983_v1  ;;  %11908 = vmatprep.subr.bf16.mxu1 %v11907_v6 }
 0x572   : > { %11988 = vmatprep.subr.bf16.mxu0 %v11987_v20 }
 0x574   : > { %11910 = vmatpush3.bf16.msra.mxu1 %v11907_v6 }
 0x575   : > { %11990 = vmatpush3.bf16.msra.mxu0 %v11987_v20  ;;  %11928 = vmatprep.subr.bf16.mxu1 %v11927_v11 }
 0x576   : > { %12008 = vmatprep.subr.bf16.mxu0 %v12007_v12 }
 0x577   : > { %10636 = vmatmul.mubr.msk.f32.vlgmr.msra.gmra.mrb[28].mxu1 %vm2408_vm2, %v14442_v26 }
 0x578   : > { %10731 = vmatmul.mubr.msk.f32.vlgmr.msra.gmra.mrb[28].mxu0 %vm2408_vm2, %v14442_v26  ;;  %11930 = vmatpush3.bf16.msra.mxu1 %v11927_v11 }
 0x579   : > { %10673 = vmatprep.mubr.msk.f32.mxu1 %vm2408_vm2, %v14431_v21  ;;  %12010 = vmatpush3.bf16.msra.mxu0 %v12007_v12 }
 0x57a   : > { %10768 = vmatprep.mubr.msk.f32.mxu0 %vm2408_vm2, %v14431_v21  ;;  %11932 = vmatprep.subr.bf16.mxu1 %v11931_v22 }
 0x57b   : > { %12012 = vmatprep.subr.bf16.mxu0 %v12011_v25 }
 0x57c   : > { %11934 = vmatpush3.bf16.msra.mxu1 %v11931_v22 }
 0x57d   : > { %12014 = vmatpush3.bf16.msra.mxu0 %v12011_v25  ;;  %11936 = vmatprep.subr.bf16.mxu1 %v11935_v29 }
 0x57e   : > { %12016 = vmatprep.subr.bf16.mxu0 %v12015_v30 }
 0x580   : > { %11938 = vmatpush3.bf16.msra.mxu1 %v11935_v29 }
 0x581   : > { %12018 = vmatpush3.bf16.msra.mxu0 %v12015_v30  ;;  %11940 = vmatprep.subr.bf16.mxu1 %v11939_v35 }
 0x582   : > { %12020 = vmatprep.subr.bf16.mxu0 %v12019_v36 }
 0x584   : > { %11942 = vmatpush3.bf16.msra.mxu1 %v11939_v35 }
 0x585   : > { %12022 = vmatpush3.bf16.msra.mxu0 %v12019_v36  ;;  %11960 = vmatprep.subr.bf16.mxu1 %v11959_v39 }
 0x587   : > { %10674 = vmatmul.mubr.msk.f32.vlgmr.msra.gmra.mrb[30].mxu1 %vm2408_vm2, %v14442_v26 }
 0x588   : > { %10769 = vmatmul.mubr.msk.f32.vlgmr.msra.gmra.mrb[30].mxu0 %vm2408_vm2, %v14442_v26  ;;  %11962 = vmatpush3.bf16.msra.mxu1 %v11959_v39 }
 0x589   : > { %10711 = vmatprep.mubr.msk.f32.mxu1 %vm2408_vm2, %v14431_v21  ;;  %11964 = vmatprep.subr.bf16.mxu1 %v11963_v42 }
 0x58c   : > { %11966 = vmatpush3.bf16.msra.mxu1 %v11963_v42 }
 0x58d   : > { %11968 = vmatprep.subr.bf16.mxu1 %v11967_v45 }
 0x590   : > { %11970 = vmatpush3.bf16.msra.mxu1 %v11967_v45 }
 0x591   : > { %11972 = vmatprep.subr.bf16.mxu1 %v11971_v50 }
 0x594   : > { %11974 = vmatpush3.bf16.msra.mxu1 %v11971_v50  ;;  %v3794_v50 = vld [vmem:[%s15682_s5 + $0x10] sm:$0xff] }
 0x595   : > { %11992 = vmatprep.subr.bf16.mxu1 %v11991_v18 }
 0x597   : > { %10712 = vmatmul.mubr.msk.f32.vlgmr.msra.gmra.mrb[32].mxu1 %vm2408_vm2, %v14442_v26 }
 0x598   : > { %11994 = vmatpush3.bf16.msra.mxu1 %v11991_v18  ;;  %10749 = vmatprep.mubr.msk.f32.mxu1 %vm2408_vm2, %v14431_v21  ;;  %v3799_v18 = vld [vmem:[%s15682_s5 + $0x38] sm:$0xff] }
 0x599   : > { %11996 = vmatprep.subr.bf16.mxu1 %v11995_v47 }
 0x59c   : > { %11998 = vmatpush3.bf16.msra.mxu1 %v11995_v47 }
 0x59d   : > { %12000 = vmatprep.subr.bf16.mxu1 %v11999_v55 }
 0x5a0   : > { %12002 = vmatpush3.bf16.msra.mxu1 %v11999_v55 }
 0x5a1   : > { %12004 = vmatprep.subr.bf16.mxu1 %v12003_v13 }
 0x5a4   : > { %12006 = vmatpush3.bf16.msra.mxu1 %v12003_v13 }
 0x5a7   : > { %10750 = vmatmul.mubr.msk.f32.vlgmr.msra.gmra.mrb[34].mxu1 %vm2408_vm2, %v14442_v26 }
 0x5a8   : > { %3864 = vmatprep.mubr.f32.mxu1 %v3793_v0 }
 0x5fa   : > { %v10485_v21 = vpop.f32.mrb[18].mxu1  ;;  %v10542_v59 = vpop.f32.mrb[18].mxu0 }
 0x5fb   : > { %v2523_v60 = vpop.f32.mrb[19].mxu1  ;;  %v2775_v61 = vpop.f32.mrb[19].mxu0 }
 0x5fc   : > { %v12025_v62 = vpack.c.bf16 %v10485_v21, %v2523_v60  ;;  %v12037_v63 = vpack.c.bf16 %v10542_v59, %v2775_v61 }
 0x60a   : > { %v10504_v48 = vpop.f32.mrb[20].mxu1  ;;  %v10580_v1 = vpop.f32.mrb[20].mxu0 }
 0x60b   : > { %v2607_v2 = vpop.f32.mrb[21].mxu1  ;;  %v2943_v3 = vpop.f32.mrb[21].mxu0 }
 0x60c   : > { %v12029_v4 = vpack.c.bf16 %v10504_v48, %v2607_v2  ;;  %v12045_v5 = vpack.c.bf16 %v10580_v1, %v2943_v3 }
 0x61a   : > { %v10523_v6 = vpop.f32.mrb[22].mxu1 }
 0x61b   : > { %v10618_v20 = vpop.f32.mrb[22].mxu0  ;;  %v2691_v26 = vpop.f32.mrb[23].mxu1 }
 0x61c   : > { %v12033_v7 = vpack.c.bf16 %v10523_v6, %v2691_v26  ;;  %v3111_v8 = vpop.f32.mrb[23].mxu0 }
 0x61d   : > { %v12053_v9 = vpack.c.bf16 %v10618_v20, %v3111_v8  ;;  %v3955_v8 = vld [vmem:[%s15683_s6 + $0x8] sm:$0xff] }
 0x62a   : > { %v10561_v10 = vpop.f32.mrb[24].mxu1 }
 0x62b   : > { %v10656_v11 = vpop.f32.mrb[24].mxu0  ;;  %v2859_v12 = vpop.f32.mrb[25].mxu1 }
 0x62c   : > { %v12041_v14 = vpack.c.bf16 %v10561_v10, %v2859_v12  ;;  %v3279_v15 = vpop.f32.mrb[25].mxu0  ;;  %v9049_v10 = vld [vmem:[%s15683_s6 + $0x50] sm:$0xff] }
 0x62d   : > { %v12027_v16 = vpack.c.bf16 %v10656_v11, %v3279_v15  ;;  %v9050_v11 = vld [vmem:[%s15683_s6 + $0x58] sm:$0xff] }
 0x62e   : > { %v14898_v12 = vpack.c.bf16 %v9050_v11, %v9049_v10  ;;  %v9026_v15 = vld [vmem:[%s15683_s6 + $0x18] sm:$0xff]  ;;  %v9056_v10 = vld [vmem:[%s15683_s6 + $0x68] sm:$0xff] }
 0x63a   : > { %v10599_v17 = vpop.f32.mrb[26].mxu1 }
 0x63b   : > { %v10694_v22 = vpop.f32.mrb[26].mxu0  ;;  %v3027_v23 = vpop.f32.mrb[27].mxu1 }
 0x63c   : > { %v12049_v24 = vpack.c.bf16 %v10599_v17, %v3027_v23  ;;  %v3447_v25 = vpop.f32.mrb[27].mxu0  ;;  %v9061_v17 = vld [vmem:[%s15683_s6 + $0x70] sm:$0xff] }
 0x63d   : > { %v12035_v27 = vpack.c.bf16 %v10694_v22, %v3447_v25  ;;  %v9062_v22 = vld [vmem:[%s15683_s6 + $0x78] sm:$0xff] }
 0x63e   : > { %v14916_v23 = vpack.c.bf16 %v9062_v22, %v9061_v17  ;;  %v4758_v22 = vld [vmem:[%s15684_s7 + $0x8] sm:$0xff] }
 0x64a   : > { %v10637_v28 = vpop.f32.mrb[28].mxu1 }
 0x64b   : > { %v10732_v29 = vpop.f32.mrb[28].mxu0  ;;  %v3195_v30 = vpop.f32.mrb[29].mxu1 }
 0x64c   : > { %v12023_v31 = vpack.c.bf16 %v10637_v28, %v3195_v30  ;;  %v3615_v32 = vpop.f32.mrb[29].mxu0 }
 0x64d   : > { %v12043_v33 = vpack.c.bf16 %v10732_v29, %v3615_v32 }
 0x64e   : > { %12024 = vmatprep.subr.bf16.mxu1 %v12023_v31 }
 0x64f   : > { %12026 = vmatpush3.bf16.msra.mxu1 %v12025_v62 }
 0x650   : > { %12028 = vmatprep.subr.bf16.mxu1 %v12027_v16 }
 0x653   : > { %12030 = vmatpush3.bf16.msra.mxu1 %v12029_v4 }
 0x65a   : > { %v10675_v34 = vpop.f32.mrb[30].mxu1 }
 0x65b   : > { %v10770_v35 = vpop.f32.mrb[30].mxu0  ;;  %v3363_v36 = vpop.f32.mrb[31].mxu1 }
 0x65c   : > { %v12031_v37 = vpack.c.bf16 %v10675_v34, %v3363_v36  ;;  %v3783_v38 = vpop.f32.mrb[31].mxu0 }
 0x65d   : > { %v12051_v39 = vpack.c.bf16 %v10770_v35, %v3783_v38 }
 0x65e   : > { %12032 = vmatprep.subr.bf16.mxu1 %v12031_v37 }
 0x65f   : > { %12034 = vmatpush3.bf16.msra.mxu1 %v12033_v7  ;;  %v3954_v7 = vld [vmem:[%s15683_s6] sm:$0xff] }
 0x660   : > { %12036 = vmatprep.subr.bf16.mxu1 %v12035_v27 }
 0x663   : > { %12038 = vmatpush3.bf16.msra.mxu1 %v12037_v63 }
 0x66a   : > { %v10713_v40 = vpop.f32.mrb[32].mxu1 }
 0x66b   : > { %v3531_v41 = vpop.f32.mrb[33].mxu1 }
 0x66c   : > { %v12039_v42 = vpack.c.bf16 %v10713_v40, %v3531_v41 }
 0x66e   : > { %12040 = vmatprep.subr.bf16.mxu1 %v12039_v42 }
 0x66f   : > { %12042 = vmatpush3.bf16.msra.mxu1 %v12041_v14  ;;  %v9025_v14 = vld [vmem:[%s15683_s6 + $0x10] sm:$0xff] }
 0x670   : > { %12044 = vmatprep.subr.bf16.mxu1 %v12043_v33  ;;  %v14907_v16 = vpack.c.bf16 %v9026_v15, %v9025_v14  ;;  %v9067_v14 = vld [vmem:[%s15683_s6 + $0x80] sm:$0xff]  ;;  %v9068_v15 = vld [vmem:[%s15683_s6 + $0x88] sm:$0xff] }
 0x671   : > { %v15050_v17 = vpack.c.bf16 %v9068_v15, %v9067_v14 }
 0x673   : > { %12046 = vmatpush3.bf16.msra.mxu1 %v12045_v5 }
 0x67a   : > { %v10751_v43 = vpop.f32.mrb[34].mxu1 }
 0x67b   : > { %v3699_v44 = vpop.f32.mrb[35].mxu1 }
 0x67c   : > { %v12047_v45 = vpack.c.bf16 %v10751_v43, %v3699_v44 }
 0x67e   : > { %12048 = vmatprep.subr.bf16.mxu1 %v12047_v45 }
 0x67f   : > { %12050 = vmatpush3.bf16.msra.mxu1 %v12049_v24 }
 0x680   : > { %12052 = vmatprep.subr.bf16.mxu1 %v12051_v39 }
 0x683   : > { %12054 = vmatpush3.bf16.msra.mxu1 %v12053_v9  ;;  %v14888_v9 = vpack.c.bf16 %v3955_v8, %v3954_v7  ;;  %v9055_v8 = vld [vmem:[%s15683_s6 + $0x60] sm:$0xff] }
 0x684   : > { %12359 = vmatprep.subr.bf16.mxu1 %v14898_v12  ;;  %v15032_v11 = vpack.c.bf16 %v9056_v10, %v9055_v8 }
 0x685   : > { %12056 = vmatprep.subr.bf16.mxu0 %v14888_v9 }
 0x686   : > { %3865 = vmatmul.mubr.f32.vlgmr.msra.gmra.mrb[36].mxu1 %v3792_v46  ;;  %12058 = vmatpush3.bf16.msra.mxu0 %v14888_v9 }
 0x687   : > { %3869 = vmatprep.mubr.f32.mxu1 %v3795_v49  ;;  %12360 = vmatpush3.bf16.msra.mxu1 %v14898_v12 }
 0x688   : > { %12060 = vmatprep.subr.bf16.mxu0 %v14907_v16  ;;  %12084 = vmatprep.subr.bf16.mxu1 %v14916_v23 }
 0x68a   : > { %3870 = vmatmul.mubr.f32.gmra.mrb[38].mxu1 %v3794_v50 }
 0x68b   : > { %3874 = vmatprep.mubr.f32.mxu1 %v3797_v51 }
 0x68e   : > { %3875 = vmatmul.mubr.f32.gmra.mrb[40].mxu1 %v3796_v52 }
 0x68f   : > { %3879 = vmatprep.mubr.f32.mxu1 %v3799_v18 }
 0x692   : > { %3880 = vmatmul.mubr.f32.gmra.mrb[42].mxu1 %v3798_v53 }
 0x759   : > { %v9996_v19 = vpop.f32.mrb[36].mxu1 }
 0x75a   : > { %v9997_v47 = vpop.f32.mrb[37].mxu1 }
 0x75b   : > { %v14854_v58 = vadd.f32 %v9997_v47, %v9996_v19 }
 0x75d   : > { %v9999_v54 = vpop.f32.mrb[38].mxu1  ;;  %v3886_v55 = vsel %vm3885_vm3, %v14854_v58, 0.0  ;;  %v3898_v56 = vmul.f32 %v14854_v58, %v14854_v58 }
 0x75e   : > { %v10000_v57 = vpop.f32.mrb[39].mxu1  ;;  %3887 = vadd.xlane.f32.xlu0 %v3886_v55 }
 0x75f   : > { %v14860_v13 = vadd.f32 %v10000_v57, %v9999_v54  ;;  %v3902_v60 = vsel %vm3885_vm3, %v3898_v56, 0.0 }
 0x761   : > { %v10002_v21 = vpop.f32.mrb[40].mxu1  ;;  %v3889_v59 = vsel %vm3885_vm3, %v14860_v13, 0.0  ;;  %v3899_v61 = vmul.f32 %v14860_v13, %v14860_v13 }
 0x762   : > { %v10003_v62 = vpop.f32.mrb[41].mxu1  ;;  %3890 = vadd.xlane.f32.xlu1 %v3889_v59  ;;  %3903 = vadd.xlane.f32.xlu0 %v3902_v60 }
 0x763   : > { %v14867_v63 = vadd.f32 %v10003_v62, %v10002_v21  ;;  %v3905_v48 = vsel %vm3885_vm3, %v3899_v61, 0.0  ;;  %v9032_v21 = vld [vmem:[%s15683_s6 + $0x28] sm:$0xff] }
 0x765   : > { %v10005_v0 = vpop.f32.mrb[42].mxu1  ;;  %v3892_v1 = vsel %vm3885_vm3, %v14867_v63, 0.0  ;;  %v3900_v2 = vmul.f32 %v14867_v63, %v14867_v63 }
 0x766   : > { %v10006_v3 = vpop.f32.mrb[43].mxu1  ;;  %3906 = vadd.xlane.f32.xlu1 %v3905_v48  ;;  %3893 = vadd.xlane.f32.xlu0 %v3892_v1 }
 0x767   : > { %v14874_v4 = vadd.f32 %v10006_v3, %v10005_v0  ;;  %v3908_v6 = vsel %vm3885_vm3, %v3900_v2, 0.0 }
 0x769   : > { %v3895_v5 = vsel %vm3885_vm3, %v14874_v4, 0.0  ;;  %v3901_v20 = vmul.f32 %v14874_v4, %v14874_v4 }
 0x76a   : > { %3896 = vadd.xlane.f32.xlu1 %v3895_v5  ;;  %3909 = vadd.xlane.f32.xlu0 %v3908_v6  ;;  %v9038_v5 = vld [vmem:[%s15683_s6 + $0x38] sm:$0xff] }
 0x76b   : > { %v3911_v26 = vsel %vm3885_vm3, %v3901_v20, 0.0  ;;  %v9043_v20 = vld [vmem:[%s15683_s6 + $0x40] sm:$0xff] }
 0x76e   : > { %3912 = vadd.xlane.f32.xlu1 %v3911_v26  ;;  %v9044_v26 = vld [vmem:[%s15683_s6 + $0x48] sm:$0xff] }
 0x76f   : > { %v15004_v7 = vpack.c.bf16 %v9044_v26, %v9043_v20 }
 0x7eb   : > { %v3888_v24 = vpop.xlane.xlu0 %3887 }
 0x7ec   : > { %v3914_v25 = vmul.f32 0.0625, %v3888_v24  ;;  %v4759_v24 = vld [vmem:[%s15684_s7 + $0x10] sm:$0xff] }
 0x7ee   : > { %v3922_v29 = vmul.f32 %v3914_v25, %v3914_v25  ;;  %v3930_v53 = vsub.f32 %v14854_v58, %v3914_v25  ;;  %v9031_v58 = vld [vmem:[%s15683_s6 + $0x20] sm:$0xff] }
 0x7ef   : > { %v3891_v27 = vpop.xlane.xlu1 %3890  ;;  %v3904_v28 = vpop.xlane.xlu0 %3903  ;;  %v14944_v61 = vpack.c.bf16 %v9032_v21, %v9031_v58 }
 0x7f0   : > { %v3915_v30 = vmul.f32 0.0625, %v3891_v27  ;;  %v3918_v31 = vmul.f32 0.0625, %v3904_v28 }
 0x7f2   : > { %v3926_v32 = vsub.f32 %v3918_v31, %v3922_v29  ;;  %v3923_v35 = vmul.f32 %v3915_v30, %v3915_v30  ;;  %v3931_v55 = vsub.f32 %v14860_v13, %v3915_v30 }
 0x7f3   : > { %v3907_v33 = vpop.xlane.xlu1 %3906  ;;  %v3894_v34 = vpop.xlane.xlu0 %3893 }
 0x7f4   : > { %v3934_v36 = vadd.f32 1e-05, %v3926_v32  ;;  %v3919_v37 = vmul.f32 0.0625, %v3907_v33  ;;  %v3916_v38 = vmul.f32 0.0625, %v3894_v34 }
 0x7f6   : > { %12414 = vrsqrt.f32 %v3934_v36  ;;  %v3927_v39 = vsub.f32 %v3919_v37, %v3923_v35  ;;  %v3924_v43 = vmul.f32 %v3916_v38, %v3916_v38  ;;  %v3932_v13 = vsub.f32 %v14867_v63, %v3916_v38 }
 0x7f7   : > { %v3897_v40 = vpop.xlane.xlu1 %3896  ;;  %v3910_v41 = vpop.xlane.xlu0 %3909 }
 0x7f8   : > { %v3935_v42 = vadd.f32 1e-05, %v3927_v39  ;;  %v3917_v44 = vmul.f32 0.0625, %v3897_v40  ;;  %v3920_v45 = vmul.f32 0.0625, %v3910_v41 }
 0x7fa   : > { %12416 = vrsqrt.f32 %v3935_v42  ;;  %v3928_v46 = vsub.f32 %v3920_v45, %v3924_v43  ;;  %v3925_v50 = vmul.f32 %v3917_v44, %v3917_v44  ;;  %v3933_v48 = vsub.f32 %v14874_v4, %v3917_v44  ;;  %v9037_v4 = vld [vmem:[%s15683_s6 + $0x30] sm:$0xff] }
 0x7fb   : > { %v3913_v49 = vpop.xlane.xlu1 %3912  ;;  %v14980_v6 = vpack.c.bf16 %v9038_v5, %v9037_v4 }
 0x7fc   : > { %v3936_v51 = vadd.f32 1e-05, %v3928_v46  ;;  %v3921_v52 = vmul.f32 0.0625, %v3913_v49 }
 0x7fe   : > { %12418 = vrsqrt.f32 %v3936_v51  ;;  %v3929_v18 = vsub.f32 %v3921_v52, %v3925_v50 }
 0x800   : > { %v12415_v19 = vpop.eup %12414  ;;  %v3937_v47 = vadd.f32 1e-05, %v3929_v18 }
 0x801   : > { %v3942_v54 = vmul.f32 %v12415_v19, %v3930_v53 }
 0x802   : > { %12420 = vrsqrt.f32 %v3937_v47 }
 0x803   : > { %v14929_v56 = vmax.f32 %v3942_v54, 0.0 }
 0x804   : > { %v12417_v57 = vpop.eup %12416 }
 0x805   : > { %v3943_v59 = vmul.f32 %v12417_v57, %v3931_v55  ;;  %10775 = vmatprep.mubr.msk.f32.mxu0 %vm3885_vm3, %v14929_v56  ;;  %3950 = vst.msk [vmem:[%s529_s23] sm:$0xff] %vm3885_vm3, %v14929_v56 }
 0x807   : > { %v14941_v60 = vmax.f32 %v3943_v59, 0.0 }
 0x808   : > { %v12419_v62 = vpop.eup %12418 }
 0x809   : > { %v3944_v0 = vmul.f32 %v12419_v62, %v3932_v13  ;;  %10776 = vmatmul.mubr.msk.f32.vlgmr.msra.gmra.mrb[32].mxu0 %vm3885_vm3, %v14941_v60  ;;  %3951 = vst.msk [vmem:[%s529_s23 + $0x8] sm:$0xff] %vm3885_vm3, %v14941_v60 }
 0x80a   : > { %12062 = vmatpush3.bf16.msra.mxu0 %v14907_v16 }
 0x80b   : > { %v14952_v1 = vmax.f32 %v3944_v0, 0.0  ;;  %12064 = vmatprep.subr.bf16.mxu0 %v14944_v61 }
 0x80c   : > { %v12421_v2 = vpop.eup %12420 }
 0x80d   : > { %v3945_v63 = vmul.f32 %v12421_v2, %v3933_v48  ;;  %10778 = vmatprep.mubr.msk.f32.mxu0 %vm3885_vm3, %v14952_v1  ;;  %10828 = vmatprep.mubr.msk.f32.mxu1 %vm3885_vm3, %v14952_v1  ;;  %3952 = vst.msk [vmem:[%s529_s23 + $0x10] sm:$0xff] %vm3885_vm3, %v14952_v1 }
 0x80f   : > { %v14961_v3 = vmax.f32 %v3945_v63, 0.0 }
 0x811   : > { %10779 = vmatmul.mubr.msk.f32.gmra.mrb[34].mxu0 %vm3885_vm3, %v14961_v3  ;;  %10829 = vmatmul.mubr.msk.f32.vlgmr.msra.gmra.mrb[44].mxu1 %vm3885_vm3, %v14961_v3  ;;  %3953 = vst.msk [vmem:[%s529_s23 + $0x18] sm:$0xff] %vm3885_vm3, %v14961_v3  ;;  %s15590_s23 = scalar_lea.hbm %s15688_s11, %s9224_s29 }
 0x812   : > { %10785 = vmatprep.mubr.msk.f32.mxu0 %vm3885_vm3, %v14929_v56  ;;  %12086 = vmatpush3.bf16.msra.mxu1 %v14916_v23 }
 0x813   : > { %10845 = vmatprep.mubr.msk.f32.mxu1 %vm3885_vm3, %v14929_v56 }
 0x815   : > { %10786 = vmatmul.mubr.msk.f32.vlgmr.msra.gmra.mrb[36].mxu0 %vm3885_vm3, %v14941_v60  ;;  %10846 = vmatmul.mubr.msk.f32.vlgmr.msra.gmra.mrb[46].mxu1 %vm3885_vm3, %v14941_v60 }
 0x816   : > { %12066 = vmatpush3.bf16.msra.mxu0 %v14944_v61  ;;  %10788 = vmatprep.mubr.msk.f32.mxu0 %vm3885_vm3, %v14952_v1 }
 0x817   : > { %10848 = vmatprep.mubr.msk.f32.mxu1 %vm3885_vm3, %v14952_v1  ;;  %12068 = vmatprep.subr.bf16.mxu0 %v14980_v6 }
 0x819   : > { %10789 = vmatmul.mubr.msk.f32.gmra.mrb[38].mxu0 %vm3885_vm3, %v14961_v3  ;;  %10849 = vmatmul.mubr.msk.f32.gmra.mrb[48].mxu1 %vm3885_vm3, %v14961_v3 }
 0x81a   : > { %10795 = vmatprep.mubr.msk.f32.mxu0 %vm3885_vm3, %v14929_v56  ;;  %4846 = vmatprep.mubr.f32.mxu1 %v4758_v22 }
 0x81d   : > { %10796 = vmatmul.mubr.msk.f32.vlgmr.msra.gmra.mrb[40].mxu0 %vm3885_vm3, %v14941_v60 }
 0x81e   : > { %12070 = vmatpush3.bf16.msra.mxu0 %v14980_v6  ;;  %10798 = vmatprep.mubr.msk.f32.mxu0 %vm3885_vm3, %v14952_v1 }
 0x81f   : > { %12072 = vmatprep.subr.bf16.mxu0 %v15004_v7 }
 0x821   : > { %10799 = vmatmul.mubr.msk.f32.gmra.mrb[42].mxu0 %vm3885_vm3, %v14961_v3 }
 0x822   : > { %10805 = vmatprep.mubr.msk.f32.mxu0 %vm3885_vm3, %v14929_v56 }
 0x825   : > { %10806 = vmatmul.mubr.msk.f32.vlgmr.msra.gmra.mrb[44].mxu0 %vm3885_vm3, %v14941_v60 }
 0x826   : > { %12074 = vmatpush3.bf16.msra.mxu0 %v15004_v7  ;;  %10808 = vmatprep.mubr.msk.f32.mxu0 %vm3885_vm3, %v14952_v1 }
 0x827   : > { %12076 = vmatprep.subr.bf16.mxu0 %v14898_v12 }
 0x829   : > { %10809 = vmatmul.mubr.msk.f32.gmra.mrb[46].mxu0 %vm3885_vm3, %v14961_v3 }
 0x82a   : > { %10815 = vmatprep.mubr.msk.f32.mxu0 %vm3885_vm3, %v14929_v56 }
 0x82d   : > { %10816 = vmatmul.mubr.msk.f32.vlgmr.msra.gmra.mrb[48].mxu0 %vm3885_vm3, %v14941_v60 }
 0x82e   : > { %12078 = vmatpush3.bf16.msra.mxu0 %v14898_v12  ;;  %10818 = vmatprep.mubr.msk.f32.mxu0 %vm3885_vm3, %v14952_v1 }
 0x82f   : > { %12080 = vmatprep.subr.bf16.mxu0 %v15032_v11 }
 0x831   : > { %10819 = vmatmul.mubr.msk.f32.gmra.mrb[50].mxu0 %vm3885_vm3, %v14961_v3 }
 0x832   : > { %10825 = vmatprep.mubr.msk.f32.mxu0 %vm3885_vm3, %v14929_v56 }
 0x835   : > { %10826 = vmatmul.mubr.msk.f32.vlgmr.msra.gmra.mrb[52].mxu0 %vm3885_vm3, %v14941_v60 }
 0x836   : > { %12082 = vmatpush3.bf16.msra.mxu0 %v15032_v11  ;;  %10835 = vmatprep.mubr.msk.f32.mxu0 %vm3885_vm3, %v14929_v56 }
 0x837   : > { %12088 = vmatprep.subr.bf16.mxu0 %v15050_v17 }
 0x839   : > { %10836 = vmatmul.mubr.msk.f32.vlgmr.msra.gmra.mrb[54].mxu0 %vm3885_vm3, %v14941_v60 }
 0x83a   : > { %10838 = vmatprep.mubr.msk.f32.mxu0 %vm3885_vm3, %v14952_v1  ;;  %12090 = vmatpush3.bf16.msra.mxu0 %v15050_v17 }
 0x83d   : > { %10839 = vmatmul.mubr.msk.f32.gmra.mrb[56].mxu0 %vm3885_vm3, %v14961_v3 }
 0x83e   : > { %10855 = vmatprep.mubr.msk.f32.mxu0 %vm3885_vm3, %v14929_v56 }
 0x841   : > { %10856 = vmatmul.mubr.msk.f32.vlgmr.msra.gmra.mrb[58].mxu0 %vm3885_vm3, %v14941_v60 }
 0x842   : > { %10858 = vmatprep.mubr.msk.f32.mxu0 %vm3885_vm3, %v14952_v1 }
 0x845   : > { %10859 = vmatmul.mubr.msk.f32.gmra.mrb[60].mxu0 %vm3885_vm3, %v14961_v3 }
 0x846   : > { %10869 = vmatprep.mubr.msk.f32.mxu0 %vm4769_vm4, %v4759_v24 }
 0x8dc   : > { %v10777_v25 = vpop.f32.mrb[32].mxu0 }
 0x8dd   : > { %v4034_v27 = vpop.f32.mrb[33].mxu0 }
 0x8de   : > { %v12093_v28 = vpack.c.bf16 %v10777_v25, %v4034_v27 }
 0x8e4   : > { %v10780_v29 = vpop.f32.mrb[34].mxu0  ;;  %v10830_v30 = vpop.f32.mrb[44].mxu1 }
 0x8e5   : > { %v4044_v31 = vpop.f32.mrb[35].mxu0  ;;  %v4484_v32 = vpop.f32.mrb[45].mxu1 }
 0x8e6   : > { %v12097_v33 = vpack.c.bf16 %v10780_v29, %v4044_v31  ;;  %v12103_v34 = vpack.c.bf16 %v10830_v30, %v4484_v32  ;;  %v4762_v29 = vld [vmem:[%s15684_s7 + $0x28] sm:$0xff]  ;;  %v4765_v30 = vld [vmem:[%s15684_s7 + $0x40] sm:$0xff]  ;;  %v4768_v32 = vld [vmem:[%s15684_s7 + $0x58] sm:$0xff] }
 0x8e7   : > { %v4757_v31 = vld [vmem:[%s15684_s7] sm:$0xff] }
 0x8e8   : > { %v10787_v35 = vpop.f32.mrb[36].mxu0  ;;  %v10847_v36 = vpop.f32.mrb[46].mxu1 }
 0x8e9   : > { %v4122_v37 = vpop.f32.mrb[37].mxu0  ;;  %v4650_v38 = vpop.f32.mrb[47].mxu1 }
 0x8ea   : > { %v12101_v39 = vpack.c.bf16 %v10787_v35, %v4122_v37  ;;  %v12115_v40 = vpack.c.bf16 %v10847_v36, %v4650_v38  ;;  %v4764_v35 = vld [vmem:[%s15684_s7 + $0x38] sm:$0xff]  ;;  %v4763_v36 = vld [vmem:[%s15684_s7 + $0x30] sm:$0xff]  ;;  %v4766_v38 = vld [vmem:[%s15684_s7 + $0x48] sm:$0xff] }
 0x8eb   : > { %v4767_v37 = vld [vmem:[%s15684_s7 + $0x50] sm:$0xff] }
 0x8ec   : > { %v10790_v41 = vpop.f32.mrb[38].mxu0  ;;  %v10850_v42 = vpop.f32.mrb[48].mxu1 }
 0x8ed   : > { %v4132_v43 = vpop.f32.mrb[39].mxu0  ;;  %v4660_v44 = vpop.f32.mrb[49].mxu1 }
 0x8ee   : > { %v12105_v45 = vpack.c.bf16 %v10790_v41, %v4132_v43  ;;  %v12119_v46 = vpack.c.bf16 %v10850_v42, %v4660_v44 }
 0x8f0   : > { %v10797_v49 = vpop.f32.mrb[40].mxu0 }
 0x8f1   : > { %v4210_v50 = vpop.f32.mrb[41].mxu0 }
 0x8f2   : > { %v12109_v51 = vpack.c.bf16 %v10797_v49, %v4210_v50 }
 0x8f4   : > { %v10800_v52 = vpop.f32.mrb[42].mxu0 }
 0x8f5   : > { %v4220_v18 = vpop.f32.mrb[43].mxu0 }
 0x8f6   : > { %v12113_v53 = vpack.c.bf16 %v10800_v52, %v4220_v18 }
 0x8f8   : > { %v10807_v19 = vpop.f32.mrb[44].mxu0 }
 0x8f9   : > { %v4298_v47 = vpop.f32.mrb[45].mxu0 }
 0x8fa   : > { %v12117_v54 = vpack.c.bf16 %v10807_v19, %v4298_v47 }
 0x8fc   : > { %v10810_v55 = vpop.f32.mrb[46].mxu0 }
 0x8fd   : > { %v4308_v57 = vpop.f32.mrb[47].mxu0 }
 0x8fe   : > { %v12121_v58 = vpack.c.bf16 %v10810_v55, %v4308_v57 }
 0x900   : > { %v10817_v21 = vpop.f32.mrb[48].mxu0 }
 0x901   : > { %v4386_v59 = vpop.f32.mrb[49].mxu0 }
 0x902   : > { %v12091_v13 = vpack.c.bf16 %v10817_v21, %v4386_v59 }
 0x904   : > { %v10820_v62 = vpop.f32.mrb[50].mxu0  ;;  %12092 = vmatprep.subr.bf16.mxu1 %v12091_v13 }
 0x905   : > { %v4396_v0 = vpop.f32.mrb[51].mxu0  ;;  %12094 = vmatpush3.bf16.msra.mxu1 %v12093_v28 }
 0x906   : > { %v12095_v48 = vpack.c.bf16 %v10820_v62, %v4396_v0 }
 0x908   : > { %v10827_v2 = vpop.f32.mrb[52].mxu0  ;;  %12096 = vmatprep.subr.bf16.mxu1 %v12095_v48 }
 0x909   : > { %v4474_v63 = vpop.f32.mrb[53].mxu0  ;;  %12098 = vmatpush3.bf16.msra.mxu1 %v12097_v33  ;;  %v4761_v33 = vld [vmem:[%s15684_s7 + $0x20] sm:$0xff] }
 0x90a   : > { %v12099_v4 = vpack.c.bf16 %v10827_v2, %v4474_v63 }
 0x90c   : > { %v10837_v5 = vpop.f32.mrb[54].mxu0  ;;  %12100 = vmatprep.subr.bf16.mxu1 %v12099_v4 }
 0x90d   : > { %v4562_v20 = vpop.f32.mrb[55].mxu0  ;;  %12102 = vmatpush3.bf16.msra.mxu1 %v12101_v39 }
 0x90e   : > { %v12107_v26 = vpack.c.bf16 %v10837_v5, %v4562_v20  ;;  %12104 = vmatprep.subr.bf16.mxu1 %v12103_v34  ;;  %v4760_v34 = vld [vmem:[%s15684_s7 + $0x18] sm:$0xff] }
 0x910   : > { %v10840_v8 = vpop.f32.mrb[56].mxu0 }
 0x911   : > { %v4572_v10 = vpop.f32.mrb[57].mxu0  ;;  %12106 = vmatpush3.bf16.msra.mxu1 %v12105_v45 }
 0x912   : > { %v12111_v14 = vpack.c.bf16 %v10840_v8, %v4572_v10  ;;  %12108 = vmatprep.subr.bf16.mxu1 %v12107_v26 }
 0x914   : > { %v10857_v15 = vpop.f32.mrb[58].mxu0 }
 0x915   : > { %v4738_v22 = vpop.f32.mrb[59].mxu0  ;;  %12110 = vmatpush3.bf16.msra.mxu1 %v12109_v51 }
 0x916   : > { %v12123_v24 = vpack.c.bf16 %v10857_v15, %v4738_v22  ;;  %12112 = vmatprep.subr.bf16.mxu1 %v12111_v14 }
 0x918   : > { %v10860_v25 = vpop.f32.mrb[60].mxu0  ;;  %12124 = vmatprep.subr.bf16.mxu0 %v12123_v24 }
 0x919   : > { %v4748_v27 = vpop.f32.mrb[61].mxu0  ;;  %12114 = vmatpush3.bf16.msra.mxu1 %v12113_v53  ;;  %12126 = vmatpush3.bf16.msra.mxu0 %v12123_v24 }
 0x91a   : > { %v12127_v28 = vpack.c.bf16 %v10860_v25, %v4748_v27  ;;  %12116 = vmatprep.subr.bf16.mxu1 %v12115_v40 }
 0x91c   : > { %12128 = vmatprep.subr.bf16.mxu0 %v12127_v28 }
 0x91d   : > { %12118 = vmatpush3.bf16.msra.mxu1 %v12117_v54  ;;  %12130 = vmatpush3.bf16.msra.mxu0 %v12127_v28 }
 0x91e   : > { %12120 = vmatprep.subr.bf16.mxu1 %v12119_v46  ;;  %12132 = vmatprep.subr.bf16.mxu0 %v14888_v9 }
 0x920   : > { %10870 = vmatmul.mubr.msk.f32.vlgmr.msra.gmra.mrb[62].mxu0 %vm4769_vm4, %v4762_v29 }
 0x921   : > { %12122 = vmatpush3.bf16.msra.mxu1 %v12121_v58  ;;  %10872 = vmatprep.mubr.msk.f32.mxu0 %vm4769_vm4, %v4765_v30 }
 0x922   : > { %12134 = vmatpush3.bf16.msra.mxu0 %v14888_v9  ;;  %12148 = vmatprep.subr.bf16.mxu1 %v15004_v7 }
 0x923   : > { %12136 = vmatprep.subr.bf16.mxu0 %v14907_v16 }
 0x924   : > { %4847 = vmatmul.mubr.f32.vlgmr.msra.gmra.mrb[50].mxu1 %v4757_v31  ;;  %10873 = vmatmul.mubr.msk.f32.gmra.mrb[64].mxu0 %vm4769_vm4, %v4768_v32 }
 0x925   : > { %4851 = vmatprep.mubr.f32.mxu1 %v4761_v33  ;;  %12150 = vmatpush3.bf16.msra.mxu1 %v15004_v7 }
 0x926   : > { %12156 = vmatprep.subr.bf16.mxu1 %v15032_v11 }
 0x928   : > { %4852 = vmatmul.mubr.f32.gmra.mrb[52].mxu1 %v4760_v34 }
 0x929   : > { %4856 = vmatprep.mubr.f32.mxu1 %v4764_v35 }
 0x92c   : > { %4857 = vmatmul.mubr.f32.gmra.mrb[54].mxu1 %v4763_v36 }
 0x92d   : > { %4861 = vmatprep.mubr.f32.mxu1 %v4767_v37 }
 0x930   : > { %4862 = vmatmul.mubr.f32.gmra.mrb[56].mxu1 %v4766_v38 }
 0x9f3   : > { %v10871_v39 = vpop.f32.mrb[62].mxu0 }
 0x9f4   : > { %v4933_v40 = vpop.f32.mrb[63].mxu0 }
 0x9f7   : > { %v10094_v41 = vpop.f32.mrb[50].mxu1  ;;  %v10874_v42 = vpop.f32.mrb[64].mxu0 }
 0x9f8   : > { %v10095_v43 = vpop.f32.mrb[51].mxu1  ;;  %v4943_v44 = vpop.f32.mrb[65].mxu0 }
 0x9f9   : > { %v10096_v45 = vadd.f32 %v10095_v43, %v10094_v41 }
 0x9fb   : > { %v15119_v46 = vadd.f32 %v10096_v45, %v4933_v40  ;;  %v10097_v49 = vpop.f32.mrb[52].mxu1 }
 0x9fc   : > { %v10098_v50 = vpop.f32.mrb[53].mxu1 }
 0x9fd   : > { %v10099_v51 = vadd.f32 %v10098_v50, %v10097_v49  ;;  %v4952_v52 = vsel %vm3885_vm3, %v15119_v46, 0.0  ;;  %v4964_v18 = vmul.f32 %v15119_v46, %v15119_v46 }
 0x9fe   : > { %4953 = vadd.xlane.f32.xlu0 %v4952_v52 }
 0x9ff   : > { %v15125_v53 = vadd.f32 %v10871_v39, %v10099_v51  ;;  %v10100_v19 = vpop.f32.mrb[54].mxu1  ;;  %v4968_v57 = vsel %vm3885_vm3, %v4964_v18, 0.0 }
 0xa00   : > { %v10101_v47 = vpop.f32.mrb[55].mxu1 }
 0xa01   : > { %v10102_v54 = vadd.f32 %v10101_v47, %v10100_v19  ;;  %v4955_v55 = vsel %vm3885_vm3, %v15125_v53, 0.0  ;;  %v4965_v58 = vmul.f32 %v15125_v53, %v15125_v53 }
 0xa02   : > { %4956 = vadd.xlane.f32.xlu1 %v4955_v55  ;;  %4969 = vadd.xlane.f32.xlu0 %v4968_v57 }
 0xa03   : > { %v4944_v21 = vadd.f32 %v10102_v54, %v4943_v44  ;;  %v10103_v59 = vpop.f32.mrb[56].mxu1  ;;  %v4971_v0 = vsel %vm3885_vm3, %v4965_v58, 0.0 }
 0xa04   : > { %v10104_v13 = vpop.f32.mrb[57].mxu1 }
 0xa05   : > { %v10105_v62 = vadd.f32 %v10104_v13, %v10103_v59  ;;  %v4958_v48 = vsel %vm3885_vm3, %v4944_v21, 0.0  ;;  %v4966_v2 = vmul.f32 %v4944_v21, %v4944_v21 }
 0xa06   : > { %4972 = vadd.xlane.f32.xlu1 %v4971_v0  ;;  %4959 = vadd.xlane.f32.xlu0 %v4958_v48  ;;  %v5795_v48 = vld [vmem:[%s15685_s8 + $0x10] sm:$0xff] }
 0xa07   : > { %v15134_v63 = vadd.f32 %v10874_v42, %v10105_v62  ;;  %v4974_v5 = vsel %vm3885_vm3, %v4966_v2, 0.0 }
 0xa09   : > { %v4961_v4 = vsel %vm3885_vm3, %v15134_v63, 0.0  ;;  %v4967_v20 = vmul.f32 %v15134_v63, %v15134_v63 }
 0xa0a   : > { %4962 = vadd.xlane.f32.xlu1 %v4961_v4  ;;  %4975 = vadd.xlane.f32.xlu0 %v4974_v5 }
 0xa0b   : > { %v4977_v26 = vsel %vm3885_vm3, %v4967_v20, 0.0 }
 0xa0e   : > { %4978 = vadd.xlane.f32.xlu1 %v4977_v26 }
 0xa8b   : > { %v4954_v8 = vpop.xlane.xlu0 %4953 }
 0xa8c   : > { %v4980_v10 = vmul.f32 0.0625, %v4954_v8 }
 0xa8e   : > { %v4988_v22 = vmul.f32 %v4980_v10, %v4980_v10  ;;  %v4996_v50 = vsub.f32 %v15119_v46, %v4980_v10 }
 0xa8f   : > { %v4957_v14 = vpop.xlane.xlu1 %4956  ;;  %v4970_v15 = vpop.xlane.xlu0 %4969 }
 0xa90   : > { %v4981_v24 = vmul.f32 0.0625, %v4957_v14  ;;  %v4984_v25 = vmul.f32 0.0625, %v4970_v15 }
 0xa92   : > { %v4992_v27 = vsub.f32 %v4984_v25, %v4988_v22  ;;  %v4989_v30 = vmul.f32 %v4981_v24, %v4981_v24  ;;  %v4997_v19 = vsub.f32 %v15125_v53, %v4981_v24 }
 0xa93   : > { %v4973_v28 = vpop.xlane.xlu1 %4972  ;;  %v4960_v29 = vpop.xlane.xlu0 %4959 }
 0xa94   : > { %v5000_v31 = vadd.f32 1e-05, %v4992_v27  ;;  %v4985_v32 = vmul.f32 0.0625, %v4973_v28  ;;  %v4982_v33 = vmul.f32 0.0625, %v4960_v29 }
 0xa96   : > { %12422 = vrsqrt.f32 %v5000_v31  ;;  %v4993_v34 = vsub.f32 %v4985_v32, %v4989_v30  ;;  %v4990_v38 = vmul.f32 %v4982_v33, %v4982_v33  ;;  %v4998_v58 = vsub.f32 %v4944_v21, %v4982_v33 }
 0xa97   : > { %v4963_v35 = vpop.xlane.xlu1 %4962  ;;  %v4976_v36 = vpop.xlane.xlu0 %4975 }
 0xa98   : > { %v5001_v37 = vadd.f32 1e-05, %v4993_v34  ;;  %v4983_v39 = vmul.f32 0.0625, %v4963_v35  ;;  %v4986_v40 = vmul.f32 0.0625, %v4976_v36 }
 0xa9a   : > { %12424 = vrsqrt.f32 %v5001_v37  ;;  %v4994_v41 = vsub.f32 %v4986_v40, %v4990_v38  ;;  %v4991_v43 = vmul.f32 %v4983_v39, %v4983_v39  ;;  %v4999_v46 = vsub.f32 %v15134_v63, %v4983_v39 }
 0xa9b   : > { %v4979_v42 = vpop.xlane.xlu1 %4978 }
 0xa9c   : > { %v5002_v44 = vadd.f32 1e-05, %v4994_v41  ;;  %v4987_v45 = vmul.f32 0.0625, %v4979_v42 }
 0xa9e   : > { %12426 = vrsqrt.f32 %v5002_v44  ;;  %v4995_v49 = vsub.f32 %v4987_v45, %v4991_v43 }
 0xaa0   : > { %v12423_v51 = vpop.eup %12422  ;;  %v5003_v52 = vadd.f32 1e-05, %v4995_v49 }
 0xaa1   : > { %v5008_v18 = vmul.f32 %v12423_v51, %v4996_v50 }
 0xaa2   : > { %12428 = vrsqrt.f32 %v5003_v52 }
 0xaa3   : > { %v5012_v47 = vmax.f32 %v5008_v18, 0.0 }
 0xaa4   : > { %v12425_v54 = vpop.eup %12424 }
 0xaa5   : > { %v5009_v55 = vmul.f32 %v12425_v54, %v4997_v19  ;;  %10879 = vmatprep.mubr.msk.f32.mxu0 %vm3885_vm3, %v5012_v47  ;;  %10919 = vmatprep.mubr.msk.f32.mxu1 %vm3885_vm3, %v5012_v47  ;;  %v5798_v19 = vld [vmem:[%s15685_s8 + $0x28] sm:$0xff]  ;;  %v5801_v54 = vld [vmem:[%s15685_s8 + $0x40] sm:$0xff] }
 0xaa7   : > { %v5013_v57 = vmax.f32 %v5009_v55, 0.0 }
 0xaa8   : > { %v12427_v59 = vpop.eup %12426 }
 0xaa9   : > { %v5010_v13 = vmul.f32 %v12427_v59, %v4998_v58  ;;  %10880 = vmatmul.mubr.msk.f32.vlgmr.msra.gmra.mrb[66].mxu0 %vm3885_vm3, %v5013_v57  ;;  %10920 = vmatmul.mubr.msk.f32.vlgmr.msra.gmra.mrb[58].mxu1 %vm3885_vm3, %v5013_v57  ;;  %v5804_v58 = vld [vmem:[%s15685_s8 + $0x58] sm:$0xff] }
 0xaaa   : > { %12138 = vmatpush3.bf16.msra.mxu0 %v14907_v16  ;;  %12158 = vmatpush3.bf16.msra.mxu1 %v15032_v11 }
 0xaab   : > { %v5014_v53 = vmax.f32 %v5010_v13, 0.0  ;;  %12140 = vmatprep.subr.bf16.mxu0 %v14944_v61  ;;  %12164 = vmatprep.subr.bf16.mxu1 %v15050_v17 }
 0xaac   : > { %v12429_v62 = vpop.eup %12428 }
 0xaad   : > { %v5011_v0 = vmul.f32 %v12429_v62, %v4999_v46  ;;  %10882 = vmatprep.mubr.msk.f32.mxu0 %vm3885_vm3, %v5014_v53  ;;  %10922 = vmatprep.mubr.msk.f32.mxu1 %vm3885_vm3, %v5014_v53 }
 0xaaf   : > { %v5015_v21 = vmax.f32 %v5011_v0, 0.0 }
 0xab1   : > { %10883 = vmatmul.mubr.msk.f32.gmra.mrb[68].mxu0 %vm3885_vm3, %v5015_v21  ;;  %10923 = vmatmul.mubr.msk.f32.gmra.mrb[60].mxu1 %vm3885_vm3, %v5015_v21 }
 0xab2   : > { %10889 = vmatprep.mubr.msk.f32.mxu0 %vm3885_vm3, %v5012_v47  ;;  %10939 = vmatprep.mubr.msk.f32.mxu1 %vm3885_vm3, %v5012_v47 }
 0xab5   : > { %10890 = vmatmul.mubr.msk.f32.vlgmr.msra.gmra.mrb[70].mxu0 %vm3885_vm3, %v5013_v57  ;;  %10940 = vmatmul.mubr.msk.f32.vlgmr.msra.gmra.mrb[62].mxu1 %vm3885_vm3, %v5013_v57 }
 0xab6   : > { %12142 = vmatpush3.bf16.msra.mxu0 %v14944_v61  ;;  %10892 = vmatprep.mubr.msk.f32.mxu0 %vm3885_vm3, %v5014_v53 }
 0xab7   : > { %10942 = vmatprep.mubr.msk.f32.mxu1 %vm3885_vm3, %v5014_v53  ;;  %12166 = vmatpush3.bf16.msra.mxu1 %v15050_v17 }
 0xab8   : > { %12144 = vmatprep.subr.bf16.mxu0 %v14980_v6 }
 0xab9   : > { %10893 = vmatmul.mubr.msk.f32.gmra.mrb[72].mxu0 %vm3885_vm3, %v5015_v21  ;;  %10943 = vmatmul.mubr.msk.f32.gmra.mrb[64].mxu1 %vm3885_vm3, %v5015_v21 }
 0xaba   : > { %10899 = vmatprep.mubr.msk.f32.mxu0 %vm3885_vm3, %v5012_v47  ;;  %10959 = vmatprep.mubr.msk.f32.mxu1 %vm3885_vm3, %v5012_v47 }
 0xabd   : > { %10900 = vmatmul.mubr.msk.f32.vlgmr.msra.gmra.mrb[74].mxu0 %vm3885_vm3, %v5013_v57  ;;  %10960 = vmatmul.mubr.msk.f32.vlgmr.msra.gmra.mrb[66].mxu1 %vm3885_vm3, %v5013_v57 }
 0xabe   : > { %12146 = vmatpush3.bf16.msra.mxu0 %v14980_v6  ;;  %10902 = vmatprep.mubr.msk.f32.mxu0 %vm3885_vm3, %v5014_v53 }
 0xabf   : > { %10962 = vmatprep.mubr.msk.f32.mxu1 %vm3885_vm3, %v5014_v53  ;;  %12152 = vmatprep.subr.bf16.mxu0 %v14898_v12 }
 0xac1   : > { %10903 = vmatmul.mubr.msk.f32.gmra.mrb[76].mxu0 %vm3885_vm3, %v5015_v21  ;;  %10963 = vmatmul.mubr.msk.f32.gmra.mrb[68].mxu1 %vm3885_vm3, %v5015_v21 }
 0xac2   : > { %10909 = vmatprep.mubr.msk.f32.mxu0 %vm3885_vm3, %v5012_v47  ;;  %10973 = vmatprep.mubr.msk.f32.mxu1 %vm4769_vm4, %v5795_v48 }
 0xac5   : > { %10910 = vmatmul.mubr.msk.f32.vlgmr.msra.gmra.mrb[78].mxu0 %vm3885_vm3, %v5013_v57 }
 0xac6   : > { %12154 = vmatpush3.bf16.msra.mxu0 %v14898_v12  ;;  %10912 = vmatprep.mubr.msk.f32.mxu0 %vm3885_vm3, %v5014_v53  ;;  %v5794_v12 = vld [vmem:[%s15685_s8 + $0x8] sm:$0xff] }
 0xac7   : > { %12160 = vmatprep.subr.bf16.mxu0 %v14916_v23 }
 0xac9   : > { %10913 = vmatmul.mubr.msk.f32.gmra.mrb[80].mxu0 %vm3885_vm3, %v5015_v21 }
 0xaca   : > { %10929 = vmatprep.mubr.msk.f32.mxu0 %vm3885_vm3, %v5012_v47 }
 0xacd   : > { %10930 = vmatmul.mubr.msk.f32.vlgmr.msra.gmra.mrb[82].mxu0 %vm3885_vm3, %v5013_v57 }
 0xace   : > { %10932 = vmatprep.mubr.msk.f32.mxu0 %vm3885_vm3, %v5014_v53  ;;  %12162 = vmatpush3.bf16.msra.mxu0 %v14916_v23 }
 0xad1   : > { %10933 = vmatmul.mubr.msk.f32.gmra.mrb[84].mxu0 %vm3885_vm3, %v5015_v21 }
 0xad2   : > { %10949 = vmatprep.mubr.msk.f32.mxu0 %vm3885_vm3, %v5012_v47 }
 0xad5   : > { %10950 = vmatmul.mubr.msk.f32.vlgmr.msra.gmra.mrb[86].mxu0 %vm3885_vm3, %v5013_v57 }
 0xad6   : > { %10952 = vmatprep.mubr.msk.f32.mxu0 %vm3885_vm3, %v5014_v53 }
 0xad9   : > { %10953 = vmatmul.mubr.msk.f32.gmra.mrb[88].mxu0 %vm3885_vm3, %v5015_v21 }
 0xada   : > { %5881 = vmatprep.mubr.f32.mxu0 %v5794_v12 }
 0xb7c   : > { %v10881_v23 = vpop.f32.mrb[66].mxu0  ;;  %v10921_v2 = vpop.f32.mrb[58].mxu1 }
 0xb7d   : > { %v5094_v63 = vpop.f32.mrb[67].mxu0  ;;  %v5434_v4 = vpop.f32.mrb[59].mxu1 }
 0xb7e   : > { %v12169_v5 = vpack.c.bf16 %v10881_v23, %v5094_v63  ;;  %v12167_v20 = vpack.c.bf16 %v10921_v2, %v5434_v4 }
 0xb80   : > { %12168 = vmatprep.subr.bf16.mxu0 %v12167_v20  ;;  %v5797_v20 = vld [vmem:[%s15685_s8 + $0x20] sm:$0xff] }
 0xb81   : > { %12170 = vmatpush3.bf16.msra.mxu0 %v12169_v5  ;;  %v5793_v5 = vld [vmem:[%s15685_s8] sm:$0xff] }
 0xb84   : > { %v10884_v26 = vpop.f32.mrb[68].mxu0  ;;  %v10924_v8 = vpop.f32.mrb[60].mxu1 }
 0xb85   : > { %v5104_v10 = vpop.f32.mrb[69].mxu0  ;;  %v5444_v14 = vpop.f32.mrb[61].mxu1 }
 0xb86   : > { %v12173_v15 = vpack.c.bf16 %v10884_v26, %v5104_v10  ;;  %v12171_v22 = vpack.c.bf16 %v10924_v8, %v5444_v14  ;;  %v5796_v26 = vld [vmem:[%s15685_s8 + $0x18] sm:$0xff]  ;;  %v5799_v10 = vld [vmem:[%s15685_s8 + $0x30] sm:$0xff] }
 0xb87   : > { %v5800_v8 = vld [vmem:[%s15685_s8 + $0x38] sm:$0xff]  ;;  %v5803_v14 = vld [vmem:[%s15685_s8 + $0x50] sm:$0xff] }
 0xb88   : > { %v10891_v24 = vpop.f32.mrb[70].mxu0  ;;  %v10941_v25 = vpop.f32.mrb[62].mxu1  ;;  %12172 = vmatprep.subr.bf16.mxu0 %v12171_v22 }
 0xb89   : > { %v5179_v27 = vpop.f32.mrb[71].mxu0  ;;  %v5604_v28 = vpop.f32.mrb[63].mxu1  ;;  %12174 = vmatpush3.bf16.msra.mxu0 %v12173_v15  ;;  %v5802_v15 = vld [vmem:[%s15685_s8 + $0x48] sm:$0xff] }
 0xb8a   : > { %v12177_v29 = vpack.c.bf16 %v10891_v24, %v5179_v27  ;;  %v12183_v30 = vpack.c.bf16 %v10941_v25, %v5604_v28 }
 0xb8c   : > { %v10894_v31 = vpop.f32.mrb[72].mxu0  ;;  %v10944_v32 = vpop.f32.mrb[64].mxu1 }
 0xb8d   : > { %v5189_v33 = vpop.f32.mrb[73].mxu0  ;;  %v5614_v34 = vpop.f32.mrb[65].mxu1 }
 0xb8e   : > { %v12181_v35 = vpack.c.bf16 %v10894_v31, %v5189_v33  ;;  %v12187_v36 = vpack.c.bf16 %v10944_v32, %v5614_v34 }
 0xb90   : > { %v10901_v37 = vpop.f32.mrb[74].mxu0  ;;  %v10961_v38 = vpop.f32.mrb[66].mxu1 }
 0xb91   : > { %v5264_v39 = vpop.f32.mrb[75].mxu0  ;;  %v5774_v40 = vpop.f32.mrb[67].mxu1 }
 0xb92   : > { %v12185_v41 = vpack.c.bf16 %v10901_v37, %v5264_v39  ;;  %v12199_v42 = vpack.c.bf16 %v10961_v38, %v5774_v40 }
 0xb94   : > { %v10904_v43 = vpop.f32.mrb[76].mxu0  ;;  %v10964_v44 = vpop.f32.mrb[68].mxu1  ;;  %12200 = vmatprep.subr.bf16.mxu1 %v12199_v42 }
 0xb95   : > { %v5274_v45 = vpop.f32.mrb[77].mxu0  ;;  %v5784_v49 = vpop.f32.mrb[69].mxu1  ;;  %12202 = vmatpush3.bf16.msra.mxu1 %v12199_v42 }
 0xb96   : > { %v12189_v50 = vpack.c.bf16 %v10904_v43, %v5274_v45  ;;  %v12203_v51 = vpack.c.bf16 %v10964_v44, %v5784_v49 }
 0xb98   : > { %v10911_v52 = vpop.f32.mrb[78].mxu0  ;;  %12204 = vmatprep.subr.bf16.mxu1 %v12203_v51 }
 0xb99   : > { %v5349_v18 = vpop.f32.mrb[79].mxu0  ;;  %12206 = vmatpush3.bf16.msra.mxu1 %v12203_v51 }
 0xb9a   : > { %v12193_v47 = vpack.c.bf16 %v10911_v52, %v5349_v18  ;;  %12208 = vmatprep.subr.bf16.mxu1 %v14888_v9 }
 0xb9c   : > { %v10914_v55 = vpop.f32.mrb[80].mxu0  ;;  %10974 = vmatmul.mubr.msk.f32.vlgmr.msra.gmra.mrb[70].mxu1 %vm4769_vm4, %v5798_v19 }
 0xb9d   : > { %v5359_v57 = vpop.f32.mrb[81].mxu0  ;;  %10976 = vmatprep.mubr.msk.f32.mxu1 %vm4769_vm4, %v5801_v54  ;;  %12210 = vmatpush3.bf16.msra.mxu1 %v14888_v9 }
 0xb9e   : > { %v12197_v59 = vpack.c.bf16 %v10914_v55, %v5359_v57  ;;  %12212 = vmatprep.subr.bf16.mxu1 %v14907_v16 }
 0xba0   : > { %v10931_v13 = vpop.f32.mrb[82].mxu0  ;;  %10977 = vmatmul.mubr.msk.f32.gmra.mrb[72].mxu1 %vm4769_vm4, %v5804_v58 }
 0xba1   : > { %v5519_v46 = vpop.f32.mrb[83].mxu0 }
 0xba2   : > { %v12175_v53 = vpack.c.bf16 %v10931_v13, %v5519_v46 }
 0xba4   : > { %v10934_v62 = vpop.f32.mrb[84].mxu0  ;;  %12176 = vmatprep.subr.bf16.mxu0 %v12175_v53 }
 0xba5   : > { %v5529_v0 = vpop.f32.mrb[85].mxu0  ;;  %12178 = vmatpush3.bf16.msra.mxu0 %v12177_v29 }
 0xba6   : > { %v12179_v21 = vpack.c.bf16 %v10934_v62, %v5529_v0 }
 0xba8   : > { %v10951_v12 = vpop.f32.mrb[86].mxu0  ;;  %12180 = vmatprep.subr.bf16.mxu0 %v12179_v21 }
 0xba9   : > { %v5689_v48 = vpop.f32.mrb[87].mxu0  ;;  %12182 = vmatpush3.bf16.msra.mxu0 %v12181_v35 }
 0xbaa   : > { %v12191_v23 = vpack.c.bf16 %v10951_v12, %v5689_v48  ;;  %12184 = vmatprep.subr.bf16.mxu0 %v12183_v30 }
 0xbac   : > { %v10954_v2 = vpop.f32.mrb[88].mxu0 }
 0xbad   : > { %v5699_v63 = vpop.f32.mrb[89].mxu0  ;;  %12186 = vmatpush3.bf16.msra.mxu0 %v12185_v41 }
 0xbae   : > { %v12195_v4 = vpack.c.bf16 %v10954_v2, %v5699_v63  ;;  %12188 = vmatprep.subr.bf16.mxu0 %v12187_v36 }
 0xbb1   : > { %12190 = vmatpush3.bf16.msra.mxu0 %v12189_v50 }
 0xbb2   : > { %12192 = vmatprep.subr.bf16.mxu0 %v12191_v23 }
 0xbb5   : > { %12194 = vmatpush3.bf16.msra.mxu0 %v12193_v47 }
 0xbb6   : > { %12196 = vmatprep.subr.bf16.mxu0 %v12195_v4 }
 0xbb9   : > { %12198 = vmatpush3.bf16.msra.mxu0 %v12197_v59 }
 0xbba   : > { %12224 = vmatprep.subr.bf16.mxu0 %v15004_v7 }
 0xbbc   : > { %5882 = vmatmul.mubr.f32.vlgmr.msra.gmra.mrb[90].mxu0 %v5793_v5 }
 0xbbd   : > { %5886 = vmatprep.mubr.f32.mxu0 %v5797_v20  ;;  %12226 = vmatpush3.bf16.msra.mxu0 %v15004_v7 }
 0xbbe   : > { %12232 = vmatprep.subr.bf16.mxu0 %v15032_v11 }
 0xbc0   : > { %5887 = vmatmul.mubr.f32.gmra.mrb[92].mxu0 %v5796_v26 }
 0xbc1   : > { %5891 = vmatprep.mubr.f32.mxu0 %v5800_v8 }
 0xbc4   : > { %5892 = vmatmul.mubr.f32.gmra.mrb[94].mxu0 %v5799_v10 }
 0xbc5   : > { %5896 = vmatprep.mubr.f32.mxu0 %v5803_v14 }
 0xbc8   : > { %5897 = vmatmul.mubr.f32.gmra.mrb[96].mxu0 %v5802_v15 }
 0xc6f   : > { %v10975_v22 = vpop.f32.mrb[70].mxu1 }
 0xc70   : > { %v5968_v24 = vpop.f32.mrb[71].mxu1 }
 0xc73   : > { %v10978_v25 = vpop.f32.mrb[72].mxu1 }
 0xc74   : > { %v5978_v27 = vpop.f32.mrb[73].mxu1 }
 0xc8f   : > { %v10200_v28 = vpop.f32.mrb[90].mxu0 }
 0xc90   : > { %v10201_v29 = vpop.f32.mrb[91].mxu0 }
 0xc91   : > { %v10202_v30 = vadd.f32 %v10201_v29, %v10200_v28 }
 0xc93   : > { %v15239_v31 = vadd.f32 %v10202_v30, %v5968_v24  ;;  %v10203_v32 = vpop.f32.mrb[92].mxu0 }
 0xc94   : > { %v10204_v33 = vpop.f32.mrb[93].mxu0 }
 0xc95   : > { %v10205_v34 = vadd.f32 %v10204_v33, %v10203_v32  ;;  %v5987_v35 = vsel %vm3885_vm3, %v15239_v31, 0.0  ;;  %v5999_v36 = vmul.f32 %v15239_v31, %v15239_v31 }
 0xc96   : > { %5988 = vadd.xlane.f32.xlu0 %v5987_v35 }
 0xc97   : > { %v15245_v37 = vadd.f32 %v10975_v22, %v10205_v34  ;;  %v10206_v38 = vpop.f32.mrb[94].mxu0  ;;  %v6003_v42 = vsel %vm3885_vm3, %v5999_v36, 0.0 }
 0xc98   : > { %v10207_v39 = vpop.f32.mrb[95].mxu0 }
 0xc99   : > { %v10208_v40 = vadd.f32 %v10207_v39, %v10206_v38  ;;  %v5990_v41 = vsel %vm3885_vm3, %v15245_v37, 0.0  ;;  %v6000_v43 = vmul.f32 %v15245_v37, %v15245_v37 }
 0xc9a   : > { %5991 = vadd.xlane.f32.xlu1 %v5990_v41  ;;  %6004 = vadd.xlane.f32.xlu0 %v6003_v42 }
 0xc9b   : > { %v15252_v44 = vadd.f32 %v10208_v40, %v5978_v27  ;;  %v10209_v45 = vpop.f32.mrb[96].mxu0  ;;  %v6006_v51 = vsel %vm3885_vm3, %v6000_v43, 0.0 }
 0xc9c   : > { %v10210_v49 = vpop.f32.mrb[97].mxu0 }
 0xc9d   : > { %v10211_v50 = vadd.f32 %v10210_v49, %v10209_v45  ;;  %v5993_v52 = vsel %vm3885_vm3, %v15252_v44, 0.0  ;;  %v6001_v18 = vmul.f32 %v15252_v44, %v15252_v44  ;;  %v9157_v49 = vld [vmem:[%s15683_s6 + $0x70] sm:$0xff] }
 0xc9e   : > { %6007 = vadd.xlane.f32.xlu1 %v6006_v51  ;;  %5994 = vadd.xlane.f32.xlu0 %v5993_v52  ;;  %v6851_v52 = vld [vmem:[%s15686_s9 + $0x8] sm:$0xff] }
 0xc9f   : > { %v15259_v19 = vadd.f32 %v10978_v25, %v10211_v50  ;;  %v6009_v54 = vsel %vm3885_vm3, %v6001_v18, 0.0  ;;  %v9158_v50 = vld [vmem:[%s15683_s6 + $0x78] sm:$0xff]  ;;  %v6852_v18 = vld [vmem:[%s15686_s9 + $0x10] sm:$0xff] }
 0xca0   : > { %v15368_v51 = vpack.c.bf16 %v9158_v50, %v9157_v49 }
 0xca1   : > { %v5996_v47 = vsel %vm3885_vm3, %v15259_v19, 0.0  ;;  %v6002_v55 = vmul.f32 %v15259_v19, %v15259_v19 }
 0xca2   : > { %5997 = vadd.xlane.f32.xlu1 %v5996_v47  ;;  %6010 = vadd.xlane.f32.xlu0 %v6009_v54 }
 0xca3   : > { %v6012_v57 = vsel %vm3885_vm3, %v6002_v55, 0.0 }
 0xca6   : > { %6013 = vadd.xlane.f32.xlu1 %v6012_v57 }
 0xd23   : > { %v5989_v58 = vpop.xlane.xlu0 %5988 }
 0xd24   : > { %v6015_v59 = vmul.f32 0.0625, %v5989_v58 }
 0xd26   : > { %v6023_v53 = vmul.f32 %v6015_v59, %v6015_v59  ;;  %v6031_v30 = vsub.f32 %v15239_v31, %v6015_v59 }
 0xd27   : > { %v5992_v13 = vpop.xlane.xlu1 %5991  ;;  %v6005_v46 = vpop.xlane.xlu0 %6004 }
 0xd28   : > { %v6016_v62 = vmul.f32 0.0625, %v5992_v13  ;;  %v6019_v0 = vmul.f32 0.0625, %v6005_v46 }
 0xd2a   : > { %v6027_v21 = vsub.f32 %v6019_v0, %v6023_v53  ;;  %v6024_v23 = vmul.f32 %v6016_v62, %v6016_v62  ;;  %v6032_v35 = vsub.f32 %v15245_v37, %v6016_v62 }
 0xd2b   : > { %v6008_v12 = vpop.xlane.xlu1 %6007  ;;  %v5995_v48 = vpop.xlane.xlu0 %5994 }
 0xd2c   : > { %v6035_v2 = vadd.f32 1e-05, %v6027_v21  ;;  %v6020_v63 = vmul.f32 0.0625, %v6008_v12  ;;  %v6017_v4 = vmul.f32 0.0625, %v5995_v48 }
 0xd2e   : > { %12430 = vrsqrt.f32 %v6035_v2  ;;  %v6028_v5 = vsub.f32 %v6020_v63, %v6024_v23  ;;  %v6025_v10 = vmul.f32 %v6017_v4, %v6017_v4  ;;  %v6033_v40 = vsub.f32 %v15252_v44, %v6017_v4 }
 0xd2f   : > { %v5998_v20 = vpop.xlane.xlu1 %5997  ;;  %v6011_v26 = vpop.xlane.xlu0 %6010 }
 0xd30   : > { %v6036_v8 = vadd.f32 1e-05, %v6028_v5  ;;  %v6018_v14 = vmul.f32 0.0625, %v5998_v20  ;;  %v6021_v15 = vmul.f32 0.0625, %v6011_v26 }
 0xd32   : > { %12432 = vrsqrt.f32 %v6036_v8  ;;  %v6029_v22 = vsub.f32 %v6021_v15, %v6025_v10  ;;  %v6026_v25 = vmul.f32 %v6018_v14, %v6018_v14 }
 0xd33   : > { %v6014_v24 = vpop.xlane.xlu1 %6013 }
 0xd34   : > { %v6037_v27 = vadd.f32 1e-05, %v6029_v22  ;;  %v6022_v28 = vmul.f32 0.0625, %v6014_v24 }
 0xd36   : > { %12434 = vrsqrt.f32 %v6037_v27  ;;  %v6030_v29 = vsub.f32 %v6022_v28, %v6026_v25 }
 0xd38   : > { %v12431_v32 = vpop.eup %12430  ;;  %v6038_v33 = vadd.f32 1e-05, %v6030_v29 }
 0xd39   : > { %v6043_v34 = vmul.f32 %v12431_v32, %v6031_v30 }
 0xd3a   : > { %12436 = vrsqrt.f32 %v6038_v33 }
 0xd3b   : > { %v15274_v36 = vadd.f32 %v6043_v34, %v14929_v56  ;;  %v6034_v56 = vsub.f32 %v15259_v19, %v6018_v14 }
 0xd3c   : > { %v12433_v38 = vpop.eup %12432 }
 0xd3d   : > { %v6044_v39 = vmul.f32 %v12433_v38, %v6032_v35  ;;  %10983 = vmatprep.mubr.msk.f32.mxu1 %vm3885_vm3, %v15274_v36  ;;  %11023 = vmatprep.mubr.msk.f32.mxu0 %vm3885_vm3, %v15274_v36  ;;  %6051 = vst.msk [vmem:[%s534_s21] sm:$0xff] %vm3885_vm3, %v15274_v36 }
 0xd3f   : > { %v15283_v31 = vadd.f32 %v6044_v39, %v14941_v60  ;;  %v6855_v39 = vld [vmem:[%s15686_s9 + $0x28] sm:$0xff] }
 0xd40   : > { %v12435_v37 = vpop.eup %12434 }
 0xd41   : > { %v6045_v41 = vmul.f32 %v12435_v37, %v6033_v40  ;;  %10984 = vmatmul.mubr.msk.f32.vlgmr.msra.gmra.mrb[74].mxu1 %vm3885_vm3, %v15283_v31  ;;  %11024 = vmatmul.mubr.msk.f32.vlgmr.msra.gmra.mrb[98].mxu0 %vm3885_vm3, %v15283_v31  ;;  %6052 = vst.msk [vmem:[%s534_s21 + $0x8] sm:$0xff] %vm3885_vm3, %v15283_v31  ;;  %v6858_v37 = vld [vmem:[%s15686_s9 + $0x40] sm:$0xff] }
 0xd42   : > { %12214 = vmatpush3.bf16.msra.mxu1 %v14907_v16  ;;  %12234 = vmatpush3.bf16.msra.mxu0 %v15032_v11 }
 0xd43   : > { %v15296_v60 = vadd.f32 %v6045_v41, %v14952_v1  ;;  %12216 = vmatprep.subr.bf16.mxu1 %v14944_v61  ;;  %12240 = vmatprep.subr.bf16.mxu0 %v15050_v17  ;;  %v9145_v1 = vld [vmem:[%s15683_s6 + $0x50] sm:$0xff] }
 0xd44   : > { %v12437_v42 = vpop.eup %12436 }
 0xd45   : > { %v6046_v43 = vmul.f32 %v12437_v42, %v6034_v56  ;;  %10986 = vmatprep.mubr.msk.f32.mxu1 %vm3885_vm3, %v15296_v60  ;;  %11026 = vmatprep.mubr.msk.f32.mxu0 %vm3885_vm3, %v15296_v60  ;;  %6053 = vst.msk [vmem:[%s534_s21 + $0x10] sm:$0xff] %vm3885_vm3, %v15296_v60  ;;  %v6861_v42 = vld [vmem:[%s15686_s9 + $0x58] sm:$0xff] }
 0xd47   : > { %v15307_v44 = vadd.f32 %v6046_v43, %v14961_v3  ;;  %v9146_v3 = vld [vmem:[%s15683_s6 + $0x58] sm:$0xff] }
 0xd48   : > { %v15344_v45 = vpack.c.bf16 %v9146_v3, %v9145_v1 }
 0xd49   : > { %10987 = vmatmul.mubr.msk.f32.gmra.mrb[76].mxu1 %vm3885_vm3, %v15307_v44  ;;  %11027 = vmatmul.mubr.msk.f32.gmra.mrb[100].mxu0 %vm3885_vm3, %v15307_v44  ;;  %6054 = vst.msk [vmem:[%s534_s21 + $0x18] sm:$0xff] %vm3885_vm3, %v15307_v44  ;;  %s12462_s21 = scalar_lea.vmem %s12461_s18, 512 }
 0xd4a   : > { %10993 = vmatprep.mubr.msk.f32.mxu1 %vm3885_vm3, %v15274_v36  ;;  %11043 = vmatprep.mubr.msk.f32.mxu0 %vm3885_vm3, %v15274_v36  ;;  %p12464_p1 = scmp.lt.s32.totalorder %s12462_s21, %s12456_s25 }
 0xd4c   : > { %p12465_p2 = por %p12464_p1, %p12463_p0 }
 0xd4d   : > { %10994 = vmatmul.mubr.msk.f32.vlgmr.msra.gmra.mrb[78].mxu1 %vm3885_vm3, %v15283_v31  ;;  %11044 = vmatmul.mubr.msk.f32.vlgmr.msra.gmra.mrb[102].mxu0 %vm3885_vm3, %v15283_v31 }
 0xd4e   : > { %12218 = vmatpush3.bf16.msra.mxu1 %v14944_v61  ;;  %10996 = vmatprep.mubr.msk.f32.mxu1 %vm3885_vm3, %v15296_v60  ;;  %p12466_p3 = pnand %p12465_p2, %p12459_p13 }
 0xd4f   : > { %11046 = vmatprep.mubr.msk.f32.mxu0 %vm3885_vm3, %v15296_v60  ;;  %12242 = vmatpush3.bf16.msra.mxu0 %v15050_v17 }
 0xd50   : > { %12220 = vmatprep.subr.bf16.mxu1 %v14980_v6 }
 0xd51   : > { %10997 = vmatmul.mubr.msk.f32.gmra.mrb[80].mxu1 %vm3885_vm3, %v15307_v44  ;;  %11047 = vmatmul.mubr.msk.f32.gmra.mrb[104].mxu0 %vm3885_vm3, %v15307_v44 }
 0xd52   : > { %11003 = vmatprep.mubr.msk.f32.mxu1 %vm3885_vm3, %v15274_v36  ;;  %11063 = vmatprep.mubr.msk.f32.mxu0 %vm3885_vm3, %v15274_v36 }
 0xd55   : > { %11004 = vmatmul.mubr.msk.f32.vlgmr.msra.gmra.mrb[82].mxu1 %vm3885_vm3, %v15283_v31  ;;  %11064 = vmatmul.mubr.msk.f32.vlgmr.msra.gmra.mrb[106].mxu0 %vm3885_vm3, %v15283_v31 }
 0xd56   : > { %12222 = vmatpush3.bf16.msra.mxu1 %v14980_v6  ;;  %11006 = vmatprep.mubr.msk.f32.mxu1 %vm3885_vm3, %v15296_v60 }
 0xd57   : > { %11066 = vmatprep.mubr.msk.f32.mxu0 %vm3885_vm3, %v15296_v60  ;;  %12228 = vmatprep.subr.bf16.mxu1 %v15344_v45 }
 0xd59   : > { %11007 = vmatmul.mubr.msk.f32.gmra.mrb[84].mxu1 %vm3885_vm3, %v15307_v44  ;;  %11067 = vmatmul.mubr.msk.f32.gmra.mrb[108].mxu0 %vm3885_vm3, %v15307_v44 }
 0xd5a   : > { %11013 = vmatprep.mubr.msk.f32.mxu1 %vm3885_vm3, %v15274_v36  ;;  %11077 = vmatprep.mubr.msk.f32.mxu0 %vm4769_vm4, %v6852_v18 }
 0xd5d   : > { %11014 = vmatmul.mubr.msk.f32.vlgmr.msra.gmra.mrb[86].mxu1 %vm3885_vm3, %v15283_v31 }
 0xd5e   : > { %12230 = vmatpush3.bf16.msra.mxu1 %v15344_v45  ;;  %11016 = vmatprep.mubr.msk.f32.mxu1 %vm3885_vm3, %v15296_v60 }
 0xd5f   : > { %12236 = vmatprep.subr.bf16.mxu1 %v15368_v51 }
 0xd61   : > { %11017 = vmatmul.mubr.msk.f32.gmra.mrb[88].mxu1 %vm3885_vm3, %v15307_v44 }
 0xd62   : > { %11033 = vmatprep.mubr.msk.f32.mxu1 %vm3885_vm3, %v15274_v36 }
 0xd65   : > { %11034 = vmatmul.mubr.msk.f32.vlgmr.msra.gmra.mrb[90].mxu1 %vm3885_vm3, %v15283_v31 }
 0xd66   : > { %11036 = vmatprep.mubr.msk.f32.mxu1 %vm3885_vm3, %v15296_v60  ;;  %12238 = vmatpush3.bf16.msra.mxu1 %v15368_v51 }
 0xd69   : > { %11037 = vmatmul.mubr.msk.f32.gmra.mrb[92].mxu1 %vm3885_vm3, %v15307_v44 }
 0xd6a   : > { %11053 = vmatprep.mubr.msk.f32.mxu1 %vm3885_vm3, %v15274_v36 }
 0xd6d   : > { %11054 = vmatmul.mubr.msk.f32.vlgmr.msra.gmra.mrb[94].mxu1 %vm3885_vm3, %v15283_v31 }
 0xd6e   : > { %11056 = vmatprep.mubr.msk.f32.mxu1 %vm3885_vm3, %v15296_v60 }
 0xd71   : > { %11057 = vmatmul.mubr.msk.f32.gmra.mrb[96].mxu1 %vm3885_vm3, %v15307_v44 }
 0xd72   : > { %6938 = vmatprep.mubr.f32.mxu1 %v6851_v52 }
 0xe14   : > { %v10985_v19 = vpop.f32.mrb[74].mxu1  ;;  %v11025_v47 = vpop.f32.mrb[98].mxu0 }
 0xe15   : > { %v6135_v54 = vpop.f32.mrb[75].mxu1  ;;  %v6483_v55 = vpop.f32.mrb[99].mxu0 }
 0xe16   : > { %v12245_v57 = vpack.c.bf16 %v10985_v19, %v6135_v54  ;;  %v12243_v58 = vpack.c.bf16 %v11025_v47, %v6483_v55 }
 0xe18   : > { %12244 = vmatprep.subr.bf16.mxu1 %v12243_v58  ;;  %v6850_v58 = vld [vmem:[%s15686_s9] sm:$0xff] }
 0xe19   : > { %12246 = vmatpush3.bf16.msra.mxu1 %v12245_v57 }
 0xe1c   : > { %v10988_v59 = vpop.f32.mrb[76].mxu1  ;;  %v11028_v13 = vpop.f32.mrb[100].mxu0 }
 0xe1d   : > { %v6145_v46 = vpop.f32.mrb[77].mxu1  ;;  %v6493_v53 = vpop.f32.mrb[101].mxu0 }
 0xe1e   : > { %v12249_v62 = vpack.c.bf16 %v10988_v59, %v6145_v46  ;;  %v12247_v0 = vpack.c.bf16 %v11028_v13, %v6493_v53  ;;  %v6854_v59 = vld [vmem:[%s15686_s9 + $0x20] sm:$0xff]  ;;  %v6853_v13 = vld [vmem:[%s15686_s9 + $0x18] sm:$0xff]  ;;  %v6856_v53 = vld [vmem:[%s15686_s9 + $0x30] sm:$0xff] }
 0xe1f   : > { %v6857_v46 = vld [vmem:[%s15686_s9 + $0x38] sm:$0xff] }
 0xe20   : > { %v10995_v21 = vpop.f32.mrb[78].mxu1  ;;  %v11045_v12 = vpop.f32.mrb[102].mxu0  ;;  %12248 = vmatprep.subr.bf16.mxu1 %v12247_v0 }
 0xe21   : > { %v6222_v48 = vpop.f32.mrb[79].mxu1  ;;  %v6657_v23 = vpop.f32.mrb[103].mxu0  ;;  %12250 = vmatpush3.bf16.msra.mxu1 %v12249_v62  ;;  %v6860_v62 = vld [vmem:[%s15686_s9 + $0x50] sm:$0xff] }
 0xe22   : > { %v12253_v2 = vpack.c.bf16 %v10995_v21, %v6222_v48  ;;  %v12259_v63 = vpack.c.bf16 %v11045_v12, %v6657_v23 }
 0xe24   : > { %v10998_v4 = vpop.f32.mrb[80].mxu1  ;;  %v11048_v5 = vpop.f32.mrb[104].mxu0 }
 0xe25   : > { %v6232_v20 = vpop.f32.mrb[81].mxu1  ;;  %v6667_v26 = vpop.f32.mrb[105].mxu0 }
 0xe26   : > { %v12257_v8 = vpack.c.bf16 %v10998_v4, %v6232_v20  ;;  %v12263_v10 = vpack.c.bf16 %v11048_v5, %v6667_v26 }
 0xe28   : > { %v11005_v14 = vpop.f32.mrb[82].mxu1  ;;  %v11065_v15 = vpop.f32.mrb[106].mxu0 }
 0xe29   : > { %v6309_v22 = vpop.f32.mrb[83].mxu1  ;;  %v6831_v24 = vpop.f32.mrb[107].mxu0 }
 0xe2a   : > { %v12261_v25 = vpack.c.bf16 %v11005_v14, %v6309_v22  ;;  %v12275_v27 = vpack.c.bf16 %v11065_v15, %v6831_v24 }
 0xe2c   : > { %v11008_v28 = vpop.f32.mrb[84].mxu1  ;;  %v11068_v29 = vpop.f32.mrb[108].mxu0  ;;  %12276 = vmatprep.subr.bf16.mxu0 %v12275_v27 }
 0xe2d   : > { %v6319_v30 = vpop.f32.mrb[85].mxu1  ;;  %v6841_v32 = vpop.f32.mrb[109].mxu0  ;;  %12278 = vmatpush3.bf16.msra.mxu0 %v12275_v27 }
 0xe2e   : > { %v12265_v33 = vpack.c.bf16 %v11008_v28, %v6319_v30  ;;  %v12279_v34 = vpack.c.bf16 %v11068_v29, %v6841_v32 }
 0xe30   : > { %v11015_v35 = vpop.f32.mrb[86].mxu1  ;;  %12280 = vmatprep.subr.bf16.mxu0 %v12279_v34 }
 0xe31   : > { %v6396_v38 = vpop.f32.mrb[87].mxu1  ;;  %12282 = vmatpush3.bf16.msra.mxu0 %v12279_v34 }
 0xe32   : > { %v12269_v40 = vpack.c.bf16 %v11015_v35, %v6396_v38  ;;  %12284 = vmatprep.subr.bf16.mxu0 %v14888_v9 }
 0xe34   : > { %v11018_v41 = vpop.f32.mrb[88].mxu1  ;;  %11078 = vmatmul.mubr.msk.f32.vlgmr.msra.gmra.mrb[110].mxu0 %vm4769_vm4, %v6855_v39 }
 0xe35   : > { %v6406_v56 = vpop.f32.mrb[89].mxu1  ;;  %11080 = vmatprep.mubr.msk.f32.mxu0 %vm4769_vm4, %v6858_v37  ;;  %12286 = vmatpush3.bf16.msra.mxu0 %v14888_v9 }
 0xe36   : > { %v12273_v43 = vpack.c.bf16 %v11018_v41, %v6406_v56  ;;  %12288 = vmatprep.subr.bf16.mxu0 %v14907_v16 }
 0xe38   : > { %v11035_v1 = vpop.f32.mrb[90].mxu1  ;;  %11081 = vmatmul.mubr.msk.f32.gmra.mrb[112].mxu0 %vm4769_vm4, %v6861_v42 }
 0xe39   : > { %v6570_v3 = vpop.f32.mrb[91].mxu1 }
 0xe3a   : > { %v12251_v49 = vpack.c.bf16 %v11035_v1, %v6570_v3 }
 0xe3c   : > { %v11038_v50 = vpop.f32.mrb[92].mxu1  ;;  %12252 = vmatprep.subr.bf16.mxu1 %v12251_v49 }
 0xe3d   : > { %v6580_v52 = vpop.f32.mrb[93].mxu1  ;;  %12254 = vmatpush3.bf16.msra.mxu1 %v12253_v2 }
 0xe3e   : > { %v12255_v18 = vpack.c.bf16 %v11038_v50, %v6580_v52 }
 0xe40   : > { %v11055_v19 = vpop.f32.mrb[94].mxu1  ;;  %12256 = vmatprep.subr.bf16.mxu1 %v12255_v18 }
 0xe41   : > { %v6744_v47 = vpop.f32.mrb[95].mxu1  ;;  %12258 = vmatpush3.bf16.msra.mxu1 %v12257_v8 }
 0xe42   : > { %v12267_v54 = vpack.c.bf16 %v11055_v19, %v6744_v47  ;;  %12260 = vmatprep.subr.bf16.mxu1 %v12259_v63 }
 0xe44   : > { %v11058_v9 = vpop.f32.mrb[96].mxu1 }
 0xe45   : > { %v6754_v55 = vpop.f32.mrb[97].mxu1  ;;  %12262 = vmatpush3.bf16.msra.mxu1 %v12261_v25 }
 0xe46   : > { %v12271_v57 = vpack.c.bf16 %v11058_v9, %v6754_v55  ;;  %12264 = vmatprep.subr.bf16.mxu1 %v12263_v10 }
 0xe49   : > { %12266 = vmatpush3.bf16.msra.mxu1 %v12265_v33 }
 0xe4a   : > { %12268 = vmatprep.subr.bf16.mxu1 %v12267_v54 }
 0xe4d   : > { %12270 = vmatpush3.bf16.msra.mxu1 %v12269_v40 }
 0xe4e   : > { %12272 = vmatprep.subr.bf16.mxu1 %v12271_v57 }
 0xe51   : > { %12274 = vmatpush3.bf16.msra.mxu1 %v12273_v43 }
 0xe52   : > { %12300 = vmatprep.subr.bf16.mxu1 %v15004_v7 }
 0xe54   : > { %6939 = vmatmul.mubr.f32.vlgmr.msra.gmra.mrb[98].mxu1 %v6850_v58 }
 0xe55   : > { %6943 = vmatprep.mubr.f32.mxu1 %v6854_v59  ;;  %12302 = vmatpush3.bf16.msra.mxu1 %v15004_v7  ;;  %v6859_v7 = vld [vmem:[%s15686_s9 + $0x48] sm:$0xff] }
 0xe56   : > { %12308 = vmatprep.subr.bf16.mxu1 %v15032_v11 }
 0xe58   : > { %6944 = vmatmul.mubr.f32.gmra.mrb[100].mxu1 %v6853_v13 }
 0xe59   : > { %6948 = vmatprep.mubr.f32.mxu1 %v6857_v46 }
 0xe5c   : > { %6949 = vmatmul.mubr.f32.gmra.mrb[102].mxu1 %v6856_v53 }
 0xe5d   : > { %6953 = vmatprep.mubr.f32.mxu1 %v6860_v62 }
 0xe60   : > { %6954 = vmatmul.mubr.f32.gmra.mrb[104].mxu1 %v6859_v7 }
 0xf07   : > { %v11079_v0 = vpop.f32.mrb[110].mxu0 }
 0xf08   : > { %v7025_v21 = vpop.f32.mrb[111].mxu0 }
 0xf0b   : > { %v11082_v12 = vpop.f32.mrb[112].mxu0 }
 0xf0c   : > { %v7035_v48 = vpop.f32.mrb[113].mxu0 }
 0xf27   : > { %v10306_v23 = vpop.f32.mrb[98].mxu1 }
 0xf28   : > { %v10307_v2 = vpop.f32.mrb[99].mxu1 }
 0xf29   : > { %v10308_v63 = vadd.f32 %v10307_v2, %v10306_v23 }
 0xf2b   : > { %v15441_v4 = vadd.f32 %v10308_v63, %v7025_v21  ;;  %v10309_v5 = vpop.f32.mrb[100].mxu1 }
 0xf2c   : > { %v10310_v20 = vpop.f32.mrb[101].mxu1 }
 0xf2d   : > { %v10311_v26 = vadd.f32 %v10310_v20, %v10309_v5  ;;  %v7044_v8 = vsel %vm3885_vm3, %v15441_v4, 0.0  ;;  %v7056_v10 = vmul.f32 %v15441_v4, %v15441_v4 }
 0xf2e   : > { %7045 = vadd.xlane.f32.xlu0 %v7044_v8 }
 0xf2f   : > { %v15447_v14 = vadd.f32 %v11079_v0, %v10311_v26  ;;  %v10312_v15 = vpop.f32.mrb[102].mxu1  ;;  %v7060_v27 = vsel %vm3885_vm3, %v7056_v10, 0.0 }
 0xf30   : > { %v10313_v22 = vpop.f32.mrb[103].mxu1 }
 0xf31   : > { %v10314_v24 = vadd.f32 %v10313_v22, %v10312_v15  ;;  %v7047_v25 = vsel %vm3885_vm3, %v15447_v14, 0.0  ;;  %v7057_v28 = vmul.f32 %v15447_v14, %v15447_v14 }
 0xf32   : > { %7048 = vadd.xlane.f32.xlu1 %v7047_v25  ;;  %7061 = vadd.xlane.f32.xlu0 %v7060_v27 }
 0xf33   : > { %v7036_v29 = vadd.f32 %v10314_v24, %v7035_v48  ;;  %v10315_v30 = vpop.f32.mrb[104].mxu1  ;;  %v7063_v34 = vsel %vm3885_vm3, %v7057_v28, 0.0 }
 0xf34   : > { %v10316_v32 = vpop.f32.mrb[105].mxu1 }
 0xf35   : > { %v10317_v33 = vadd.f32 %v10316_v32, %v10315_v30  ;;  %v7050_v35 = vsel %vm3885_vm3, %v7036_v29, 0.0  ;;  %v7058_v38 = vmul.f32 %v7036_v29, %v7036_v29 }
 0xf36   : > { %7064 = vadd.xlane.f32.xlu1 %v7063_v34  ;;  %7051 = vadd.xlane.f32.xlu0 %v7050_v35 }
 0xf37   : > { %v15456_v39 = vadd.f32 %v11082_v12, %v10317_v33  ;;  %v7066_v37 = vsel %vm3885_vm3, %v7058_v38, 0.0 }
 0xf39   : > { %v7053_v40 = vsel %vm3885_vm3, %v15456_v39, 0.0  ;;  %v7059_v41 = vmul.f32 %v15456_v39, %v15456_v39 }
 0xf3a   : > { %7054 = vadd.xlane.f32.xlu1 %v7053_v40  ;;  %7067 = vadd.xlane.f32.xlu0 %v7066_v37 }
 0xf3b   : > { %v7069_v56 = vsel %vm3885_vm3, %v7059_v41, 0.0 }
 0xf3e   : > { %7070 = vadd.xlane.f32.xlu1 %v7069_v56 }
 0xfbb   : > { %v7046_v42 = vpop.xlane.xlu0 %7045 }
 0xfbc   : > { %v7072_v43 = vmul.f32 0.0625, %v7046_v42 }
 0xfbe   : > { %v7080_v49 = vmul.f32 %v7072_v43, %v7072_v43  ;;  %v7088_v63 = vsub.f32 %v15441_v4, %v7072_v43 }
 0xfbf   : > { %v7049_v1 = vpop.xlane.xlu1 %7048  ;;  %v7062_v3 = vpop.xlane.xlu0 %7061 }
 0xfc0   : > { %v7073_v50 = vmul.f32 0.0625, %v7049_v1  ;;  %v7076_v52 = vmul.f32 0.0625, %v7062_v3 }
 0xfc2   : > { %v7084_v18 = vsub.f32 %v7076_v52, %v7080_v49  ;;  %v7081_v54 = vmul.f32 %v7073_v50, %v7073_v50  ;;  %v7089_v8 = vsub.f32 %v15447_v14, %v7073_v50 }
 0xfc3   : > { %v7065_v19 = vpop.xlane.xlu1 %7064  ;;  %v7052_v47 = vpop.xlane.xlu0 %7051 }
 0xfc4   : > { %v7092_v9 = vadd.f32 1e-05, %v7084_v18  ;;  %v7077_v55 = vmul.f32 0.0625, %v7065_v19  ;;  %v7074_v57 = vmul.f32 0.0625, %v7052_v47 }
 0xfc6   : > { %12438 = vrsqrt.f32 %v7092_v9  ;;  %v7085_v58 = vsub.f32 %v7077_v55, %v7081_v54  ;;  %v7082_v53 = vmul.f32 %v7074_v57, %v7074_v57  ;;  %v7090_v25 = vsub.f32 %v7036_v29, %v7074_v57 }
 0xfc7   : > { %v7055_v59 = vpop.xlane.xlu1 %7054  ;;  %v7068_v13 = vpop.xlane.xlu0 %7067 }
 0xfc8   : > { %v7093_v46 = vadd.f32 1e-05, %v7085_v58  ;;  %v7075_v62 = vmul.f32 0.0625, %v7055_v59  ;;  %v7078_v7 = vmul.f32 0.0625, %v7068_v13 }
 0xfca   : > { %12440 = vrsqrt.f32 %v7093_v46  ;;  %v7086_v0 = vsub.f32 %v7078_v7, %v7082_v53  ;;  %v7083_v12 = vmul.f32 %v7075_v62, %v7075_v62  ;;  %v7091_v4 = vsub.f32 %v15456_v39, %v7075_v62 }
 0xfcb   : > { %v7071_v21 = vpop.xlane.xlu1 %7070 }
 0xfcc   : > { %v7094_v48 = vadd.f32 1e-05, %v7086_v0  ;;  %v7079_v23 = vmul.f32 0.0625, %v7071_v21 }
 0xfce   : > { %12442 = vrsqrt.f32 %v7094_v48  ;;  %v7087_v2 = vsub.f32 %v7079_v23, %v7083_v12  ;;  %v7890_v48 = vld [vmem:[%s15687_s10 + $0x28] sm:$0xff] }
 0xfd0   : > { %v12439_v5 = vpop.eup %12438  ;;  %v7095_v20 = vadd.f32 1e-05, %v7087_v2  ;;  %v7893_v2 = vld [vmem:[%s15687_s10 + $0x40] sm:$0xff] }
 0xfd1   : > { %v7100_v26 = vmul.f32 %v12439_v5, %v7088_v63 }
 0xfd2   : > { %12444 = vrsqrt.f32 %v7095_v20  ;;  %v7896_v20 = vld [vmem:[%s15687_s10 + $0x58] sm:$0xff] }
 0xfd3   : > { %v7104_v10 = vmax.f32 %v7100_v26, 0.0 }
 0xfd4   : > { %v12441_v15 = vpop.eup %12440 }
 0xfd5   : > { %v7101_v22 = vmul.f32 %v12441_v15, %v7089_v8  ;;  %11087 = vmatprep.mubr.msk.f32.mxu0 %vm3885_vm3, %v7104_v10  ;;  %11127 = vmatprep.mubr.msk.f32.mxu1 %vm3885_vm3, %v7104_v10 }
 0xfd7   : > { %v7105_v24 = vmax.f32 %v7101_v22, 0.0 }
 0xfd8   : > { %v12443_v27 = vpop.eup %12442 }
 0xfd9   : > { %v7102_v28 = vmul.f32 %v12443_v27, %v7090_v25  ;;  %11088 = vmatmul.mubr.msk.f32.vlgmr.msra.gmra.mrb[114].mxu0 %vm3885_vm3, %v7105_v24  ;;  %11128 = vmatmul.mubr.msk.f32.vlgmr.msra.gmra.mrb[106].mxu1 %vm3885_vm3, %v7105_v24 }
 0xfda   : > { %12290 = vmatpush3.bf16.msra.mxu0 %v14907_v16  ;;  %12310 = vmatpush3.bf16.msra.mxu1 %v15032_v11  ;;  %v7886_v16 = vld [vmem:[%s15687_s10 + $0x8] sm:$0xff] }
 0xfdb   : > { %v7106_v14 = vmax.f32 %v7102_v28, 0.0  ;;  %12292 = vmatprep.subr.bf16.mxu0 %v14944_v61  ;;  %12316 = vmatprep.subr.bf16.mxu1 %v15050_v17 }
 0xfdc   : > { %v12445_v30 = vpop.eup %12444 }
 0xfdd   : > { %v7103_v32 = vmul.f32 %v12445_v30, %v7091_v4  ;;  %11090 = vmatprep.mubr.msk.f32.mxu0 %vm3885_vm3, %v7106_v14  ;;  %11130 = vmatprep.mubr.msk.f32.mxu1 %vm3885_vm3, %v7106_v14 }
 0xfdf   : > { %v7107_v29 = vmax.f32 %v7103_v32, 0.0 }
 0xfe1   : > { %11091 = vmatmul.mubr.msk.f32.gmra.mrb[116].mxu0 %vm3885_vm3, %v7107_v29  ;;  %11131 = vmatmul.mubr.msk.f32.gmra.mrb[108].mxu1 %vm3885_vm3, %v7107_v29 }
 0xfe2   : > { %11097 = vmatprep.mubr.msk.f32.mxu0 %vm3885_vm3, %v7104_v10  ;;  %11147 = vmatprep.mubr.msk.f32.mxu1 %vm3885_vm3, %v7104_v10 }
 0xfe5   : > { %11098 = vmatmul.mubr.msk.f32.vlgmr.msra.gmra.mrb[118].mxu0 %vm3885_vm3, %v7105_v24  ;;  %11148 = vmatmul.mubr.msk.f32.vlgmr.msra.gmra.mrb[110].mxu1 %vm3885_vm3, %v7105_v24 }
 0xfe6   : > { %12294 = vmatpush3.bf16.msra.mxu0 %v14944_v61  ;;  %11100 = vmatprep.mubr.msk.f32.mxu0 %vm3885_vm3, %v7106_v14  ;;  %v7887_v61 = vld [vmem:[%s15687_s10 + $0x10] sm:$0xff] }
 0xfe7   : > { %11150 = vmatprep.mubr.msk.f32.mxu1 %vm3885_vm3, %v7106_v14  ;;  %12318 = vmatpush3.bf16.msra.mxu1 %v15050_v17 }
 0xfe8   : > { %12296 = vmatprep.subr.bf16.mxu0 %v14980_v6 }
 0xfe9   : > { %11101 = vmatmul.mubr.msk.f32.gmra.mrb[120].mxu0 %vm3885_vm3, %v7107_v29  ;;  %11151 = vmatmul.mubr.msk.f32.gmra.mrb[112].mxu1 %vm3885_vm3, %v7107_v29 }
 0xfea   : > { %11107 = vmatprep.mubr.msk.f32.mxu0 %vm3885_vm3, %v7104_v10  ;;  %11167 = vmatprep.mubr.msk.f32.mxu1 %vm3885_vm3, %v7104_v10 }
 0xfed   : > { %11108 = vmatmul.mubr.msk.f32.vlgmr.msra.gmra.mrb[122].mxu0 %vm3885_vm3, %v7105_v24  ;;  %11168 = vmatmul.mubr.msk.f32.vlgmr.msra.gmra.mrb[114].mxu1 %vm3885_vm3, %v7105_v24 }
 0xfee   : > { %12298 = vmatpush3.bf16.msra.mxu0 %v14980_v6  ;;  %11110 = vmatprep.mubr.msk.f32.mxu0 %vm3885_vm3, %v7106_v14 }
 0xfef   : > { %11170 = vmatprep.mubr.msk.f32.mxu1 %vm3885_vm3, %v7106_v14  ;;  %12304 = vmatprep.subr.bf16.mxu0 %v15344_v45 }
 0xff1   : > { %11111 = vmatmul.mubr.msk.f32.gmra.mrb[124].mxu0 %vm3885_vm3, %v7107_v29  ;;  %11171 = vmatmul.mubr.msk.f32.gmra.mrb[116].mxu1 %vm3885_vm3, %v7107_v29 }
 0xff2   : > { %11117 = vmatprep.mubr.msk.f32.mxu0 %vm3885_vm3, %v7104_v10  ;;  %11181 = vmatprep.mubr.msk.f32.mxu1 %vm4769_vm4, %v7887_v61  ;;  %v7888_v61 = vld [vmem:[%s15687_s10 + $0x18] sm:$0xff] }
 0xff5   : > { %11118 = vmatmul.mubr.msk.f32.vlgmr.msra.gmra.mrb[126].mxu0 %vm3885_vm3, %v7105_v24 }
 0xff6   : > { %12306 = vmatpush3.bf16.msra.mxu0 %v15344_v45  ;;  %11120 = vmatprep.mubr.msk.f32.mxu0 %vm3885_vm3, %v7106_v14 }
 0xff7   : > { %12312 = vmatprep.subr.bf16.mxu0 %v15368_v51 }
 0xff9   : > { %11121 = vmatmul.mubr.msk.f32.gmra.mrb[128].mxu0 %vm3885_vm3, %v7107_v29 }
 0xffa   : > { %11137 = vmatprep.mubr.msk.f32.mxu0 %vm3885_vm3, %v7104_v10 }
 0xffd   : > { %11138 = vmatmul.mubr.msk.f32.vlgmr.msra.gmra.mrb[130].mxu0 %vm3885_vm3, %v7105_v24 }
 0xffe   : > { %11140 = vmatprep.mubr.msk.f32.mxu0 %vm3885_vm3, %v7106_v14  ;;  %12314 = vmatpush3.bf16.msra.mxu0 %v15368_v51 }
0x1001   : > { %11141 = vmatmul.mubr.msk.f32.gmra.mrb[132].mxu0 %vm3885_vm3, %v7107_v29 }
0x1002   : > { %11157 = vmatprep.mubr.msk.f32.mxu0 %vm3885_vm3, %v7104_v10 }
0x1005   : > { %11158 = vmatmul.mubr.msk.f32.vlgmr.msra.gmra.mrb[134].mxu0 %vm3885_vm3, %v7105_v24 }
0x1006   : > { %11160 = vmatprep.mubr.msk.f32.mxu0 %vm3885_vm3, %v7106_v14 }
0x1009   : > { %11161 = vmatmul.mubr.msk.f32.gmra.mrb[136].mxu0 %vm3885_vm3, %v7107_v29  ;;  %v7885_v29 = vld [vmem:[%s15687_s10] sm:$0xff] }
0x100a   : > { %7973 = vmatprep.mubr.f32.mxu0 %v7886_v16  ;;  %v7889_v16 = vld [vmem:[%s15687_s10 + $0x20] sm:$0xff] }
0x10ac   : > { %v11089_v6 = vpop.f32.mrb[114].mxu0  ;;  %v11129_v11 = vpop.f32.mrb[106].mxu1 }
0x10ad   : > { %v7186_v17 = vpop.f32.mrb[115].mxu0  ;;  %v7526_v45 = vpop.f32.mrb[107].mxu1 }
0x10ae   : > { %v12321_v51 = vpack.c.bf16 %v11089_v6, %v7186_v17  ;;  %v12319_v33 = vpack.c.bf16 %v11129_v11, %v7526_v45  ;;  %v7892_v6 = vld [vmem:[%s15687_s10 + $0x38] sm:$0xff]  ;;  %v7891_v11 = vld [vmem:[%s15687_s10 + $0x30] sm:$0xff]  ;;  %v7894_v45 = vld [vmem:[%s15687_s10 + $0x48] sm:$0xff] }
0x10af   : > { %v7895_v17 = vld [vmem:[%s15687_s10 + $0x50] sm:$0xff] }
0x10b0   : > { %12320 = vmatprep.subr.bf16.mxu0 %v12319_v33 }
0x10b1   : > { %12322 = vmatpush3.bf16.msra.mxu0 %v12321_v51 }
0x10b4   : > { %v11092_v34 = vpop.f32.mrb[116].mxu0  ;;  %v11132_v35 = vpop.f32.mrb[108].mxu1 }
0x10b5   : > { %v7196_v38 = vpop.f32.mrb[117].mxu0  ;;  %v7536_v39 = vpop.f32.mrb[109].mxu1 }
0x10b6   : > { %v12325_v40 = vpack.c.bf16 %v11092_v34, %v7196_v38  ;;  %v12323_v37 = vpack.c.bf16 %v11132_v35, %v7536_v39 }
0x10b8   : > { %v11099_v41 = vpop.f32.mrb[118].mxu0  ;;  %v11149_v56 = vpop.f32.mrb[110].mxu1  ;;  %12324 = vmatprep.subr.bf16.mxu0 %v12323_v37 }
0x10b9   : > { %v7271_v42 = vpop.f32.mrb[119].mxu0  ;;  %v7696_v43 = vpop.f32.mrb[111].mxu1  ;;  %12326 = vmatpush3.bf16.msra.mxu0 %v12325_v40 }
0x10ba   : > { %v12329_v1 = vpack.c.bf16 %v11099_v41, %v7271_v42  ;;  %v12335_v3 = vpack.c.bf16 %v11149_v56, %v7696_v43 }
0x10bc   : > { %v11102_v49 = vpop.f32.mrb[120].mxu0  ;;  %v11152_v50 = vpop.f32.mrb[112].mxu1 }
0x10bd   : > { %v7281_v52 = vpop.f32.mrb[121].mxu0  ;;  %v7706_v18 = vpop.f32.mrb[113].mxu1 }
0x10be   : > { %v12333_v19 = vpack.c.bf16 %v11102_v49, %v7281_v52  ;;  %v12339_v47 = vpack.c.bf16 %v11152_v50, %v7706_v18 }
0x10c0   : > { %v11109_v54 = vpop.f32.mrb[122].mxu0  ;;  %v11169_v9 = vpop.f32.mrb[114].mxu1 }
0x10c1   : > { %v7356_v55 = vpop.f32.mrb[123].mxu0  ;;  %v7866_v57 = vpop.f32.mrb[115].mxu1 }
0x10c2   : > { %v12337_v58 = vpack.c.bf16 %v11109_v54, %v7356_v55  ;;  %v12351_v59 = vpack.c.bf16 %v11169_v9, %v7866_v57 }
0x10c4   : > { %v11112_v13 = vpop.f32.mrb[124].mxu0  ;;  %v11172_v46 = vpop.f32.mrb[116].mxu1  ;;  %12352 = vmatprep.subr.bf16.mxu1 %v12351_v59 }
0x10c5   : > { %v7366_v53 = vpop.f32.mrb[125].mxu0  ;;  %v7876_v62 = vpop.f32.mrb[117].mxu1  ;;  %12354 = vmatpush3.bf16.msra.mxu1 %v12351_v59 }
0x10c6   : > { %v12341_v7 = vpack.c.bf16 %v11112_v13, %v7366_v53  ;;  %v12355_v0 = vpack.c.bf16 %v11172_v46, %v7876_v62 }
0x10c8   : > { %v11119_v21 = vpop.f32.mrb[126].mxu0  ;;  %12356 = vmatprep.subr.bf16.mxu1 %v12355_v0 }
0x10c9   : > { %v7441_v12 = vpop.f32.mrb[127].mxu0  ;;  %12358 = vmatpush3.bf16.msra.mxu1 %v12355_v0 }
0x10ca   : > { %v12345_v23 = vpack.c.bf16 %v11119_v21, %v7441_v12 }
0x10cc   : > { %v11122_v63 = vpop.f32.mrb[128].mxu0  ;;  %11182 = vmatmul.mubr.msk.f32.vlgmr.msra.gmra.mrb[118].mxu1 %vm4769_vm4, %v7890_v48 }
0x10cd   : > { %v7451_v5 = vpop.f32.mrb[129].mxu0  ;;  %11184 = vmatprep.mubr.msk.f32.mxu1 %vm4769_vm4, %v7893_v2 }
0x10ce   : > { %v12349_v26 = vpack.c.bf16 %v11122_v63, %v7451_v5 }
0x10d0   : > { %v11139_v8 = vpop.f32.mrb[130].mxu0  ;;  %11185 = vmatmul.mubr.msk.f32.gmra.mrb[120].mxu1 %vm4769_vm4, %v7896_v20 }
0x10d1   : > { %v7611_v10 = vpop.f32.mrb[131].mxu0 }
0x10d2   : > { %v12327_v15 = vpack.c.bf16 %v11139_v8, %v7611_v10 }
0x10d4   : > { %v11142_v22 = vpop.f32.mrb[132].mxu0  ;;  %12328 = vmatprep.subr.bf16.mxu0 %v12327_v15 }
0x10d5   : > { %v7621_v24 = vpop.f32.mrb[133].mxu0  ;;  %12330 = vmatpush3.bf16.msra.mxu0 %v12329_v1 }
0x10d6   : > { %v12331_v25 = vpack.c.bf16 %v11142_v22, %v7621_v24 }
0x10d8   : > { %v11159_v27 = vpop.f32.mrb[134].mxu0  ;;  %12332 = vmatprep.subr.bf16.mxu0 %v12331_v25 }
0x10d9   : > { %v7781_v28 = vpop.f32.mrb[135].mxu0  ;;  %12334 = vmatpush3.bf16.msra.mxu0 %v12333_v19 }
0x10da   : > { %v12343_v4 = vpack.c.bf16 %v11159_v27, %v7781_v28  ;;  %12336 = vmatprep.subr.bf16.mxu0 %v12335_v3 }
0x10dc   : > { %v11162_v14 = vpop.f32.mrb[136].mxu0 }
0x10dd   : > { %v7791_v30 = vpop.f32.mrb[137].mxu0  ;;  %12338 = vmatpush3.bf16.msra.mxu0 %v12337_v58 }
0x10de   : > { %v12347_v32 = vpack.c.bf16 %v11162_v14, %v7791_v30  ;;  %12340 = vmatprep.subr.bf16.mxu0 %v12339_v47 }
0x10e1   : > { %12342 = vmatpush3.bf16.msra.mxu0 %v12341_v7 }
0x10e2   : > { %12344 = vmatprep.subr.bf16.mxu0 %v12343_v4 }
0x10e5   : > { %12346 = vmatpush3.bf16.msra.mxu0 %v12345_v23 }
0x10e6   : > { %12348 = vmatprep.subr.bf16.mxu0 %v12347_v32 }
0x10e9   : > { %12350 = vmatpush3.bf16.msra.mxu0 %v12349_v26 }
0x10ec   : > { %7974 = vmatmul.mubr.f32.vlgmr.msra.gmra.mrb[138].mxu0 %v7885_v29 }
0x10ed   : > { %7978 = vmatprep.mubr.f32.mxu0 %v7889_v16 }
0x10f0   : > { %7979 = vmatmul.mubr.f32.gmra.mrb[140].mxu0 %v7888_v61 }
0x10f1   : > { %7983 = vmatprep.mubr.f32.mxu0 %v7892_v6 }
0x10f4   : > { %7984 = vmatmul.mubr.f32.gmra.mrb[142].mxu0 %v7891_v11 }
0x10f5   : > { %7988 = vmatprep.mubr.f32.mxu0 %v7895_v17 }
0x10f8   : > { %7989 = vmatmul.mubr.f32.gmra.mrb[144].mxu0 %v7894_v45 }
0x119f   : > { %v11183_v51 = vpop.f32.mrb[118].mxu1 }
0x11a0   : > { %v8060_v33 = vpop.f32.mrb[119].mxu1 }
0x11a3   : > { %v11186_v34 = vpop.f32.mrb[120].mxu1 }
0x11a4   : > { %v8070_v35 = vpop.f32.mrb[121].mxu1 }
0x11bf   : > { %v10412_v38 = vpop.f32.mrb[138].mxu0 }
0x11c0   : > { %v10413_v39 = vpop.f32.mrb[139].mxu0 }
0x11c1   : > { %v10414_v40 = vadd.f32 %v10413_v39, %v10412_v38 }
0x11c3   : > { %v15555_v37 = vadd.f32 %v10414_v40, %v8060_v33  ;;  %v10415_v41 = vpop.f32.mrb[140].mxu0 }
0x11c4   : > { %v10416_v56 = vpop.f32.mrb[141].mxu0 }
0x11c5   : > { %v10417_v42 = vadd.f32 %v10416_v56, %v10415_v41  ;;  %v8079_v43 = vsel %vm3885_vm3, %v15555_v37, 0.0  ;;  %v8091_v1 = vmul.f32 %v15555_v37, %v15555_v37 }
0x11c6   : > { %8080 = vadd.xlane.f32.xlu0 %v8079_v43 }
0x11c7   : > { %v15561_v3 = vadd.f32 %v11183_v51, %v10417_v42  ;;  %v10418_v49 = vpop.f32.mrb[142].mxu0  ;;  %v8095_v19 = vsel %vm3885_vm3, %v8091_v1, 0.0 }
0x11c8   : > { %v10419_v50 = vpop.f32.mrb[143].mxu0 }
0x11c9   : > { %v10420_v52 = vadd.f32 %v10419_v50, %v10418_v49  ;;  %v8082_v18 = vsel %vm3885_vm3, %v15561_v3, 0.0  ;;  %v8092_v47 = vmul.f32 %v15561_v3, %v15561_v3 }
0x11ca   : > { %8083 = vadd.xlane.f32.xlu1 %v8082_v18  ;;  %8096 = vadd.xlane.f32.xlu0 %v8095_v19 }
0x11cb   : > { %v15568_v54 = vadd.f32 %v10420_v52, %v8070_v35  ;;  %v10421_v9 = vpop.f32.mrb[144].mxu0  ;;  %v8098_v58 = vsel %vm3885_vm3, %v8092_v47, 0.0 }
0x11cc   : > { %v10422_v55 = vpop.f32.mrb[145].mxu0 }
0x11cd   : > { %v10423_v57 = vadd.f32 %v10422_v55, %v10421_v9  ;;  %v8085_v59 = vsel %vm3885_vm3, %v15568_v54, 0.0  ;;  %v8093_v13 = vmul.f32 %v15568_v54, %v15568_v54 }
0x11ce   : > { %8099 = vadd.xlane.f32.xlu1 %v8098_v58  ;;  %8086 = vadd.xlane.f32.xlu0 %v8085_v59 }
0x11cf   : > { %v15575_v46 = vadd.f32 %v11186_v34, %v10423_v57  ;;  %v8101_v62 = vsel %vm3885_vm3, %v8093_v13, 0.0 }
0x11d1   : > { %v8088_v53 = vsel %vm3885_vm3, %v15575_v46, 0.0  ;;  %v8094_v7 = vmul.f32 %v15575_v46, %v15575_v46 }
0x11d2   : > { %8089 = vadd.xlane.f32.xlu1 %v8088_v53  ;;  %8102 = vadd.xlane.f32.xlu0 %v8101_v62 }
0x11d3   : > { %v8104_v0 = vsel %vm3885_vm3, %v8094_v7, 0.0 }
0x11d6   : > { %8105 = vadd.xlane.f32.xlu1 %v8104_v0 }
0x11d7   : > { %12469 = shalt.err (!%p12466_p3)
}
0x11d8   : > { %s12470_s30 = scalar_lea.hbm %s15590_s23, 256  ;;  %s12474_s16 = scalar_lea.hbm %s15688_s11, 512 }
0x11d9   : > { %p12471_p4 = scmp.ne.s32.totalorder %s15590_s23, %s12470_s30  ;;  %p12475_p9 = scmp.lt.u32.totalorder %s15590_s23, %s15688_s11 }
0x11da   : > { %p12476_p10 = scmp.lt.u32.totalorder %s12474_s16, %s12470_s30  ;;  %p12478_p12 = scmp.lt.u32.totalorder %s12470_s30, %s15590_s23 }
0x11db   : > { %p12472_p7 = pnand %p12471_p4, %p12674_p5 }
0x11dc   : > { %p12477_p11 = por %p12476_p10, %p12475_p9 }
0x11dd   : > { %p12473_p8 = pneg %p12472_p7 }
0x11de   : > { %p12479_p13 = por %p12478_p12, %p12477_p11 }
0x11e0   : > { %p12480_p0 = pnand %p12479_p13, %p12473_p8 }
0x11e2   : > { %12483 = shalt.err (!%p12480_p0)
}
0x11e3   : > { %12362 = dma.vmem_to_hbm [thread:$0]  (%p12674_p5), %s8183_s26, 256, %s15590_s23, %s8148_s0  }
0x11e4   : > { %s15615_s20 = scalar_lea.hbm %s15689_s12, %s9224_s29  ;;  %s8195_s27 = sshll.u32 %s14453_s19, 4  ;;  %s15618_s27 = int_to_ptr.vmem [resolvable:$true] %s8195_s27 }
0x11e5   : > { %s8153_s30 = scalar_lea.sflag [#allocation5], %s12953_s24  ;;  %s12484_s16 = scalar_lea.vmem %s15618_s27, 256 }
0x11e6   : > { %p12485_p1 = scmp.ne.s32.totalorder %s15618_s27, %s12484_s16  ;;  %s12553_s17 = smov [#allocation4]  }
0x11e7   : > { %s12488_s26 = sshll.u32 %s12553_s17, 4  ;;  %s12489_s26 = int_to_ptr.vmem [resolvable:$false] %s12488_s26 }
0x11e8   : > { %p12486_p2 = pnand %p12485_p1, %p12674_p5  ;;  %s12490_s22 = scalar_lea.vmem %s12489_s26, 512 }
0x11e9   : > { %p12491_p4 = scmp.lt.s32.totalorder %s15618_s27, %s12489_s26  ;;  %p12492_p7 = scmp.lt.s32.totalorder %s12490_s22, %s12484_s16 }
0x11ea   : > { %p12487_p3 = pneg %p12486_p2 }
0x11eb   : > { %p12493_p8 = por %p12492_p7, %p12491_p4 }
0x11ed   : > { %p12494_p9 = pnand %p12493_p8, %p12487_p3 }
0x11ef   : > { %12497 = shalt.err (!%p12494_p9)
}
0x11f0   : > { %s12498_s19 = scalar_lea.hbm %s15615_s20, 256  ;;  %s12502_s0 = scalar_lea.hbm %s15689_s12, 512 }
0x11f1   : > { %p12499_p10 = scmp.ne.s32.totalorder %s15615_s20, %s12498_s19  ;;  %p12503_p13 = scmp.lt.u32.totalorder %s15615_s20, %s15689_s12 }
0x11f2   : > { %p12504_p0 = scmp.lt.u32.totalorder %s12502_s0, %s12498_s19  ;;  %p12506_p2 = scmp.lt.u32.totalorder %s12498_s19, %s15615_s20 }
0x11f3   : > { %p12500_p11 = pnand %p12499_p10, %p12674_p5 }
0x11f4   : > { %p12505_p1 = por %p12504_p0, %p12503_p13 }
0x11f5   : > { %p12501_p12 = pneg %p12500_p11 }
0x11f6   : > { %p12507_p3 = por %p12506_p2, %p12505_p1 }
0x11f8   : > { %p12508_p4 = pnand %p12507_p3, %p12501_p12 }
0x11fa   : > { %12511 = shalt.err (!%p12508_p4)
}
0x11fb   : > { %s12554_s21 = smov 128   ;;  %s12555_s16 = smov 8  }
0x11fc   : > { %12363 = dma.vmem_to_hbm [thread:$0]  (%p12674_p5), %s15618_s27, 256, %s15615_s20, %s8153_s30, %s12554_s21, %s12554_s21, %s12555_s16  }
0x11fd   : > { %s539_s20 = scalar_lea.vmem %s15692_s15, %s14922_s1 }
0x1253   : > { %v8081_v21 = vpop.xlane.xlu0 %8080 }
0x1254   : > { %v8107_v12 = vmul.f32 0.0625, %v8081_v21 }
0x1256   : > { %v8115_v2 = vmul.f32 %v8107_v12, %v8107_v12  ;;  %v8123_v45 = vsub.f32 %v15555_v37, %v8107_v12 }
0x1257   : > { %v8084_v48 = vpop.xlane.xlu1 %8083  ;;  %v8097_v23 = vpop.xlane.xlu0 %8096 }
0x1258   : > { %v8108_v63 = vmul.f32 0.0625, %v8084_v48  ;;  %v8111_v5 = vmul.f32 0.0625, %v8097_v23 }
0x125a   : > { %v8119_v20 = vsub.f32 %v8111_v5, %v8115_v2  ;;  %v8116_v10 = vmul.f32 %v8108_v63, %v8108_v63  ;;  %v8124_v35 = vsub.f32 %v15561_v3, %v8108_v63 }
0x125b   : > { %v8100_v26 = vpop.xlane.xlu1 %8099  ;;  %v8087_v8 = vpop.xlane.xlu0 %8086 }
0x125c   : > { %v8127_v15 = vadd.f32 1e-05, %v8119_v20  ;;  %v8112_v22 = vmul.f32 0.0625, %v8100_v26  ;;  %v8109_v24 = vmul.f32 0.0625, %v8087_v8 }
0x125e   : > { %12446 = vrsqrt.f32 %v8127_v15  ;;  %v8120_v25 = vsub.f32 %v8112_v22, %v8116_v10  ;;  %v8117_v14 = vmul.f32 %v8109_v24, %v8109_v24  ;;  %v8125_v37 = vsub.f32 %v15568_v54, %v8109_v24 }
0x125f   : > { %v8090_v27 = vpop.xlane.xlu1 %8089  ;;  %v8103_v28 = vpop.xlane.xlu0 %8102 }
0x1260   : > { %v8128_v4 = vadd.f32 1e-05, %v8120_v25  ;;  %v8110_v30 = vmul.f32 0.0625, %v8090_v27  ;;  %v8113_v32 = vmul.f32 0.0625, %v8103_v28 }
0x1262   : > { %12448 = vrsqrt.f32 %v8128_v4  ;;  %v8121_v29 = vsub.f32 %v8113_v32, %v8117_v14  ;;  %v8118_v61 = vmul.f32 %v8110_v30, %v8110_v30  ;;  %v8126_v43 = vsub.f32 %v15575_v46, %v8110_v30 }
0x1263   : > { %v8106_v16 = vpop.xlane.xlu1 %8105 }
0x1264   : > { %v8129_v6 = vadd.f32 1e-05, %v8121_v29  ;;  %v8114_v11 = vmul.f32 0.0625, %v8106_v16 }
0x1266   : > { %12450 = vrsqrt.f32 %v8129_v6  ;;  %v8122_v17 = vsub.f32 %v8114_v11, %v8118_v61 }
0x1268   : > { %v12447_v51 = vpop.eup %12446  ;;  %v8130_v33 = vadd.f32 1e-05, %v8122_v17 }
0x1269   : > { %v8135_v34 = vmul.f32 %v12447_v51, %v8123_v45 }
0x126a   : > { %12452 = vrsqrt.f32 %v8130_v33 }
0x126b   : > { %v8139_v38 = vadd.f32 %v8135_v34, %v15274_v36 }
0x126c   : > { %v12449_v39 = vpop.eup %12448 }
0x126d   : > { %8143 = vst.msk [vmem:[%s539_s20] sm:$0xff] %vm3885_vm3, %v8139_v38  ;;  %v8136_v40 = vmul.f32 %v12449_v39, %v8124_v35 }
0x126f   : > { %v8140_v41 = vadd.f32 %v8136_v40, %v15283_v31 }
0x1270   : > { %v12451_v56 = vpop.eup %12450 }
0x1271   : > { %8144 = vst.msk [vmem:[%s539_s20 + $0x8] sm:$0xff] %vm3885_vm3, %v8140_v41  ;;  %v8137_v42 = vmul.f32 %v12451_v56, %v8125_v37 }
0x1273   : > { %v8141_v1 = vadd.f32 %v8137_v42, %v15296_v60 }
0x1274   : > { %v12453_v49 = vpop.eup %12452 }
0x1275   : > { %8145 = vst.msk [vmem:[%s539_s20 + $0x10] sm:$0xff] %vm3885_vm3, %v8141_v1  ;;  %v8138_v36 = vmul.f32 %v12453_v49, %v8126_v43 }
0x1277   : > { %v8142_v3 = vadd.f32 %v8138_v36, %v15307_v44 }
0x1279   : > { %8146 = vst.msk [vmem:[%s539_s20 + $0x18] sm:$0xff] %vm3885_vm3, %v8142_v3 }
0x127a PF: > { %s15715_s1 = sld [smem:[#allocation11_spill]]  ;;  %s15716_s27 = sld [smem:[#allocation8_spill]] }
0x1280   : > { %p12373_p5 = scmp.ge.s32.totalorder %s15715_s1, 2  ;;  %s8219_s17 = sand.u32 1, %s15716_s27  }
0x1281   : > { %s8220_s26 = scalar_lea.sflag [#allocation3], %s8219_s17 }
0x1282   : > { %p12367_p7 = pnand %p12373_p5, %p12678_p6 }
0x1284   : > { %12529 = dma.done.wait (!%p12367_p7), %s8220_s26, 256  }
0x1285   : > { %12531 = vsyncadd (!%p12367_p7), %s8220_s26, 4294967040  ;;  %s8229_s22 = scalar_lea.sflag [#allocation5], %s8219_s17 }
0x1286   : > { %12533 = dma.done.wait (!%p12367_p7), %s8229_s22, 256  }
0x1287   : > { %12535 = vsyncadd (!%p12367_p7), %s8229_s22, 4294967040  ;;  %s15718_s21 = sld [smem:[#allocation12_spill]]  ;;  %s15719_s18 = sld [smem:[#allocation9_spill]] }
0x1288   : > { %s15720_s19 = sld [smem:[#allocation10_spill]]  ;;  %s15721_s20 = sld [smem:[#allocation13_spill]] }
0x128d   : > { %p29_p8 = scmp.ge.s32.totalorder %s15718_s21, 4  }
0x128f   :  { %31 = sbr.rel (!%p29_p8) target bundleno = 8 (0x8), region = 190 }
0x1296   :  { %8258 = vsyncpa [#allocation3], 1 }
0x1297   :  { %8260 = vsyncpa [#allocation3 + $0x1], 1 }
0x1298   :  { %8261 = vsyncpa [#allocation5], 1 }
0x1299   :  { %8263 = vsyncpa [#allocation5 + $0x1], 1 }

</bundles_post_ra>
